<compile_context>
chip_gen: v7x
topology: tpu7x:2x2x1
jax: 0.10.0
libtpu: 0.0.40
codegen_flags: <defaults>
</compile_context>

<pallas_src>
import math

import jax
import jax.numpy as jnp
import numpy as np
from jax.experimental import pallas as pl
from jax.experimental.pallas import tpu as pltpu

# ---------------------------------------------------------------------------
# Static LeNet geometry (fc1 = 16*5*5 forces a 32x32 spatial input).
# ---------------------------------------------------------------------------
KK = 5                              # conv kernel size
C1, C2 = 6, 16                      # conv output channels
F1, F2 = 120, 84                    # fc1 / fc2 widths
F1P = F2P = OUTP = 128              # fc widths padded to full 128-lane vregs
H_IN = W_IN = 32
CONV1_OUT = H_IN - KK + 1           # 28
POOL1_OUT = CONV1_OUT // 2          # 14
CONV2_OUT = POOL1_OUT - KK + 1      # 10
POOL2_OUT = CONV2_OUT // 2          # 5
LC = 128                            # padded lane width of pooled / fc activations
BB_ALIGN = 16                       # keeps bf16 row-slab slices sublane-tile aligned
assert C2 * POOL2_OUT * POOL2_OUT == 16 * 5 * 5


# ---------------------------------------------------------------------------
# Fused forward kernel (one grid step == one batch block of BB images).
# ---------------------------------------------------------------------------
def _make_kernel(bb):
    f32, bf16 = jnp.float32, jnp.bfloat16

    def kernel(x_ref, w1_ref, b1_ref, w2_ref, b2_ref, w3_ref, b3_ref,
               w4_ref, b4_ref, w5_ref, b5_ref, out_ref, a1_scr):
        # x_ref:   (32*bb, Cin*32)  bf16, rows ordered (h, b), lanes (ci, w)
        # a1_scr:  (14*bb, 128)     f32 pooled conv1 activations, rows (ph, b)

        # ---- conv1 (+ horizontal half of maxpool1): 5 full-batch MXU matmuls ----
        # Weight N-dim packs [even output cols | odd output cols] as two 128-lane
        # halves, so the stride-2 column max is a plain tile-aligned elementwise max.
        acc1 = None
        for kh in range(KK):
            lhs = x_ref[kh * bb:(kh + CONV1_OUT) * bb, :]            # (28*bb, Cin*32)
            t = jnp.dot(lhs, w1_ref[kh], preferred_element_type=f32)  # (28*bb, 256)
            acc1 = t if acc1 is None else acc1 + t
        hmax1 = jnp.maximum(acc1[:, :LC], acc1[:, LC:])               # (28*bb, 128)
        out1 = jnp.maximum(hmax1 + b1_ref[...], 0.0)                  # bias + ReLU

        # ---- vertical half of maxpool1 -> lane-dense scratch ----
        for r in range(POOL1_OUT):                                    # 14, unrolled
            a1_scr[r * bb:(r + 1) * bb, :] = jnp.maximum(
                out1[(2 * r) * bb:(2 * r + 1) * bb, :],
                out1[(2 * r + 1) * bb:(2 * r + 2) * bb, :])

        # ---- conv2 (+ horizontal half of maxpool2) ----
        acc2 = None
        for kh in range(KK):
            lhs = a1_scr[kh * bb:(kh + CONV2_OUT) * bb, :].astype(bf16)  # (10*bb,128)
            t = jnp.dot(lhs, w2_ref[kh], preferred_element_type=f32)     # (10*bb,256)
            acc2 = t if acc2 is None else acc2 + t
        hmax2 = jnp.maximum(acc2[:, :LC], acc2[:, LC:])
        out2 = jnp.maximum(hmax2 + b2_ref[...], 0.0)                  # (10*bb, 128)

        # ---- vertical half of maxpool2 fused with fc1 (5 accumulated matmuls) ----
        acc3 = None
        for r in range(POOL2_OUT):                                    # 5, unrolled
            v = jnp.maximum(out2[(2 * r) * bb:(2 * r + 1) * bb, :],
                            out2[(2 * r + 1) * bb:(2 * r + 2) * bb, :])   # (bb, 128)
            t = jnp.dot(v.astype(bf16), w3_ref[r], preferred_element_type=f32)
            acc3 = t if acc3 is None else acc3 + t
        h1 = jnp.maximum(acc3 + b3_ref[...], 0.0)                     # (bb, 128)

        # ---- fc2 -> ReLU -> fc3 (lane-dense 128-wide output store) ----
        h2 = jnp.maximum(
            jnp.dot(h1.astype(bf16), w4_ref[...], preferred_element_type=f32)
            + b4_ref[...], 0.0)
        out_ref[...] = (jnp.dot(h2.astype(bf16), w5_ref[...],
                                preferred_element_type=f32) + b5_ref[...])

    return kernel


# ---------------------------------------------------------------------------
# Wrapper
# ---------------------------------------------------------------------------
def _round_up(a, m):
    return ((a + m - 1) // m) * m


def _const_spec(arr):
    nd = arr.ndim
    return pl.BlockSpec(arr.shape, lambda i, _nd=nd: (0,) * _nd)


def lenet_forward(kparams, x_nchw, out_dim, batch_block=128):
    (w1, b1, w2, b2, w3, b3, w4, b4, w5, b5) = kparams
    n, cin, h, w = x_nchw.shape
    assert h == H_IN and w == W_IN, "LeNet fc1=16*5*5 implies 32x32 input"

    # Batch-block sizing: BB images per grid step; for real batches keep >=2 grid
    # steps so dimension_semantics=("parallel",) can feed both v7x TensorCores.
    bb = max(BB_ALIGN, _round_up(min(batch_block, n), BB_ALIGN))
    nb = pl.cdiv(n, bb)
    if nb == 1 and n > BB_ALIGN:
        bb = max(BB_ALIGN, _round_up(pl.cdiv(n, 2), BB_ALIGN))
        nb = pl.cdiv(n, bb)
    n_pad = nb * bb

    # Boundary-only layout prep (cheap XLA ops, done once per call):
    # rows (h, b) per block, lanes (ci, w); bf16 halves the input DMA.
    xp = jnp.pad(x_nchw, ((0, n_pad - n), (0, 0), (0, 0), (0, 0)))
    xk = xp.reshape(nb, bb, cin, H_IN, W_IN).transpose(0, 3, 1, 2, 4)
    xk = xk.reshape(nb, H_IN * bb, cin * W_IN).astype(jnp.bfloat16)

    out = pl.pallas_call(
        _make_kernel(bb),
        out_shape=jax.ShapeDtypeStruct((nb, bb, OUTP), jnp.float32),
        grid=(nb,),
        in_specs=[
            pl.BlockSpec((None, H_IN * bb, cin * W_IN), lambda i: (i, 0, 0)),
            _const_spec(w1), _const_spec(b1),
            _const_spec(w2), _const_spec(b2),
            _const_spec(w3), _const_spec(b3),
            _const_spec(w4), _const_spec(b4),
            _const_spec(w5), _const_spec(b5),
        ],
        out_specs=pl.BlockSpec((None, bb, OUTP), lambda i: (i, 0, 0)),
        scratch_shapes=[pltpu.VMEM((POOL1_OUT * bb, LC), jnp.float32)],
        compiler_params=pltpu.CompilerParams(dimension_semantics=("parallel",)),
    )(xk, w1, b1, w2, b2, w3, b3, w4, b4, w5, b5)

    return out.reshape(n_pad, OUTP)[:n, :out_dim]


# ---------------------------------------------------------------------------
# Parameters: PyTorch-layout params + one-time offline repacking.
# ---------------------------------------------------------------------------
def init_torch_params(key, in_ch, out_dim):
    ks = jax.random.split(key, 10)

    def unif(k, shape, fan_in):
        b = 1.0 / math.sqrt(fan_in)
        return jax.random.uniform(k, shape, jnp.float32, -b, b)

    return {
        "conv1_w": unif(ks[0], (C1, in_ch, KK, KK), in_ch * KK * KK),
        "conv1_b": unif(ks[1], (C1,), in_ch * KK * KK),
        "conv2_w": unif(ks[2], (C2, C1, KK, KK), C1 * KK * KK),
        "conv2_b": unif(ks[3], (C2,), C1 * KK * KK),
        "fc1_w": unif(ks[4], (F1, C2 * POOL2_OUT * POOL2_OUT), C2 * 25),
        "fc1_b": unif(ks[5], (F1,), C2 * 25),
        "fc2_w": unif(ks[6], (F2, F1), F1),
        "fc2_b": unif(ks[7], (F2,), F1),
        "fc3_w": unif(ks[8], (out_dim, F2), F2),
        "fc3_b": unif(ks[9], (out_dim,), F2),
    }


def prepare_kernel_params(p, in_ch, out_dim, mxu_dtype=jnp.bfloat16):
    """One-time offline repack: banded conv weights with the 2x2-pool column
    selection, fc1 flatten permutation and all zero padding folded in.
    Weights are stored in bf16 (MXU operands); biases stay f32."""
    c1w = np.asarray(p["conv1_w"], np.float32)      # (6, Cin, 5, 5)
    c1b = np.asarray(p["conv1_b"], np.float32)
    c2w = np.asarray(p["conv2_w"], np.float32)      # (16, 6, 5, 5)
    c2b = np.asarray(p["conv2_b"], np.float32)
    f1w = np.asarray(p["fc1_w"], np.float32)        # (120, 400) cols = c*25+h*5+w
    f1b = np.asarray(p["fc1_b"], np.float32)
    f2w = np.asarray(p["fc2_w"], np.float32)        # (84, 120)
    f2b = np.asarray(p["fc2_b"], np.float32)
    f3w = np.asarray(p["fc3_w"], np.float32)        # (out, 84)
    f3b = np.asarray(p["fc3_b"], np.float32)

    # conv1: 5 banded matrices (one per kh); rows = input lane (ci*32 + wi),
    # cols = [even output cols | odd output cols], each half lane = pw*6 + co.
    W1 = np.zeros((KK, in_ch * W_IN, 2 * LC), np.float32)
    for kh in range(KK):
        for pw in range(POOL1_OUT):                  # 14 pooled output columns
            for kw in range(KK):
                for ci in range(in_ch):
                    vec = c1w[:, ci, kh, kw]         # (6,) over co
                    W1[kh, ci * W_IN + 2 * pw + kw,
                       pw * C1: pw * C1 + C1] = vec
                    W1[kh, ci * W_IN + 2 * pw + 1 + kw,
                       LC + pw * C1: LC + pw * C1 + C1] = vec
    b1 = np.zeros((1, LC), np.float32)
    b1[0, :POOL1_OUT * C1] = np.tile(c1b, POOL1_OUT)

    # conv2: rows = pooled-conv1 lane (pw1*6 + ci), cols = [even | odd], half
    # lane = pw2*16 + co.
    W2 = np.zeros((KK, LC, 2 * LC), np.float32)
    for kh in range(KK):
        for pw in range(POOL2_OUT):                  # 5 pooled output columns
            for kw in range(KK):
                blk = c2w[:, :, kh, kw].T            # (ci, co) = (6, 16)
                re = (2 * pw + kw) * C1
                ro = (2 * pw + 1 + kw) * C1
                W2[kh, re:re + C1, pw * C2: pw * C2 + C2] = blk
                W2[kh, ro:ro + C1, LC + pw * C2: LC + pw * C2 + C2] = blk
    b2 = np.zeros((1, LC), np.float32)
    b2[0, :POOL2_OUT * C2] = np.tile(c2b, POOL2_OUT)

    # fc1 as 5 per-pooled-row matrices; PyTorch (c,h,w) flatten order folded in.
    W3 = np.zeros((POOL2_OUT, LC, F1P), np.float32)
    for ph in range(POOL2_OUT):
        for pw in range(POOL2_OUT):
            for c in range(C2):
                W3[ph, pw * C2 + c, :F1] = f1w[:, c * 25 + ph * POOL2_OUT + pw]
    b3 = np.zeros((1, F1P), np.float32)
    b3[0, :F1] = f1b

    W4 = np.zeros((F1P, F2P), np.float32)
    W4[:F1, :F2] = f2w.T
    b4 = np.zeros((1, F2P), np.float32)
    b4[0, :F2] = f2b

    W5 = np.zeros((F2P, OUTP), np.float32)
    W5[:F2, :out_dim] = f3w.T
    b5 = np.zeros((1, OUTP), np.float32)
    b5[0, :out_dim] = f3b

    md = mxu_dtype
    return (jnp.asarray(W1).astype(md), jnp.asarray(b1),
            jnp.asarray(W2).astype(md), jnp.asarray(b2),
            jnp.asarray(W3).astype(md), jnp.asarray(b3),
            jnp.asarray(W4).astype(md), jnp.asarray(b4),
            jnp.asarray(W5).astype(md), jnp.asarray(b5))


# ---------------------------------------------------------------------------
# Pure-JAX reference (matches the PyTorch module) for a numeric sanity check.
# ---------------------------------------------------------------------------
def lenet_reference(p, x):
    def pool2(y):
        n, c, h, w = y.shape
        return jnp.max(y.reshape(n, c, h // 2, 2, w // 2, 2), axis=(3, 5))

    y = jax.lax.conv_general_dilated(
        x, p["conv1_w"], (1, 1), "VALID",
        dimension_numbers=("NCHW", "OIHW", "NCHW")) + p["conv1_b"][None, :, None, None]
    y = pool2(jnp.maximum(y, 0.0))
    y = jax.lax.conv_general_dilated(
        y, p["conv2_w"], (1, 1), "VALID",
        dimension_numbers=("NCHW", "OIHW", "NCHW")) + p["conv2_b"][None, :, None, None]
    y = pool2(jnp.maximum(y, 0.0))
    y = y.reshape(y.shape[0], -1)                     # PyTorch (c, h, w) order
    y = jnp.maximum(y @ p["fc1_w"].T + p["fc1_b"], 0.0)
    y = jnp.maximum(y @ p["fc2_w"].T + p["fc2_b"], 0.0)
    return y @ p["fc3_w"].T + p["fc3_b"]


if __name__ == "__main__":
    key = jax.random.PRNGKey(0)
    pkey, xkey = jax.random.split(key)

    input_shape = (1, 32, 32)        # LeNet: fc1 expects 16*5*5 -> 32x32 spatial
    out_dim = 10
    batch = 2

    raw = init_torch_params(pkey, input_shape[0], out_dim)
    kparams = prepare_kernel_params(raw, input_shape[0], out_dim)
    x = jax.random.normal(xkey, (batch,) + input_shape, jnp.float32)

    fwd = jax.jit(lenet_forward, static_argnums=(2,))
    out = jax.block_until_ready(fwd(kparams, x, out_dim))

    assert out.shape == (batch, out_dim), out.shape
    assert bool(jnp.all(jnp.isfinite(out)))

    ref = lenet_reference(raw, x)
    err = float(jnp.max(jnp.abs(out - ref)))
    # bf16 MXU operands with f32 accumulation: expected error is O(5e-3); a genuine
    # layout / permutation bug would produce O(0.1 - 1) errors, so 3e-2 still catches
    # real regressions.
    assert err < 3e-2, f"mismatch vs reference: max abs err {err}"

    print("KERNEL_OK")
</pallas_src>

<mosaic_0001>
module attributes {stable_mosaic.version = 11 : i64} {
  func.func @kernel(%arg0: i32, %arg1: memref<1x512x32xbf16, #tpu.memory_space<vmem>>, %arg2: memref<5x32x256xbf16, #tpu.memory_space<vmem>>, %arg3: memref<1x128xf32, #tpu.memory_space<vmem>>, %arg4: memref<5x128x256xbf16, #tpu.memory_space<vmem>>, %arg5: memref<1x128xf32, #tpu.memory_space<vmem>>, %arg6: memref<5x128x128xbf16, #tpu.memory_space<vmem>>, %arg7: memref<1x128xf32, #tpu.memory_space<vmem>>, %arg8: memref<128x128xbf16, #tpu.memory_space<vmem>>, %arg9: memref<1x128xf32, #tpu.memory_space<vmem>>, %arg10: memref<128x128xbf16, #tpu.memory_space<vmem>>, %arg11: memref<1x128xf32, #tpu.memory_space<vmem>>, %arg12: memref<1x16x128xf32, #tpu.memory_space<vmem>>, %arg13: memref<224x128xf32, #tpu.memory_space<vmem>>) attributes {dimension_semantics = [#tpu.dimension_semantics<parallel>], iteration_bounds = array<i64: 1>, scalar_prefetch = 0 : i64, scratch_operands = 1 : i64, tpu.core_type = #tpu.core_type<tc>, window_params = [{transform_indices = @transform_0, window_bounds = array<i64: 1, 512, 32>}, {pipeline_mode = #tpu.pipeline_mode<synchronous>, transform_indices = @transform_1, window_bounds = array<i64: 5, 32, 256>}, {pipeline_mode = #tpu.pipeline_mode<synchronous>, transform_indices = @transform_2, window_bounds = array<i64: 1, 128>}, {pipeline_mode = #tpu.pipeline_mode<synchronous>, transform_indices = @transform_3, window_bounds = array<i64: 5, 128, 256>}, {pipeline_mode = #tpu.pipeline_mode<synchronous>, transform_indices = @transform_4, window_bounds = array<i64: 1, 128>}, {pipeline_mode = #tpu.pipeline_mode<synchronous>, transform_indices = @transform_5, window_bounds = array<i64: 5, 128, 128>}, {pipeline_mode = #tpu.pipeline_mode<synchronous>, transform_indices = @transform_6, window_bounds = array<i64: 1, 128>}, {pipeline_mode = #tpu.pipeline_mode<synchronous>, transform_indices = @transform_7, window_bounds = array<i64: 128, 128>}, {pipeline_mode = #tpu.pipeline_mode<synchronous>, transform_indices = @transform_8, window_bounds = array<i64: 1, 128>}, {pipeline_mode = #tpu.pipeline_mode<synchronous>, transform_indices = @transform_9, window_bounds = array<i64: 128, 128>}, {pipeline_mode = #tpu.pipeline_mode<synchronous>, transform_indices = @transform_10, window_bounds = array<i64: 1, 128>}, {transform_indices = @transform_11, window_bounds = array<i64: 1, 16, 128>}]} {
    %c0 = arith.constant 0 : index
    %c0_0 = arith.constant 0 : index
    %c0_1 = arith.constant 0 : index
    %0 = vector.load %arg1[%c0, %c0_0, %c0_1] : memref<1x512x32xbf16, #tpu.memory_space<vmem>>, vector<1x448x32xbf16>
    %1 = vector.shape_cast %0 : vector<1x448x32xbf16> to vector<448x32xbf16>
    %c0_2 = arith.constant 0 : index
    %c0_3 = arith.constant 0 : index
    %c0_4 = arith.constant 0 : index
    %2 = vector.load %arg2[%c0_2, %c0_3, %c0_4] : memref<5x32x256xbf16, #tpu.memory_space<vmem>>, vector<1x32x256xbf16>
    %3 = vector.shape_cast %2 : vector<1x32x256xbf16> to vector<32x256xbf16>
    %cst = arith.constant dense<0.000000e+00> : vector<448x256xf32>
    %4 = tpu.matmul %1, %3, %cst {dimension_numbers = #tpu.dot_dimension_numbers<[1], [0], [0], [1], [0, 0, 1, 1], [], []>} : vector<448x32xbf16>, vector<32x256xbf16>, vector<448x256xf32> -> vector<448x256xf32>
    %c0_5 = arith.constant 0 : index
    %c16 = arith.constant 16 : index
    %c0_6 = arith.constant 0 : index
    %5 = vector.load %arg1[%c0_5, %c16, %c0_6] : memref<1x512x32xbf16, #tpu.memory_space<vmem>>, vector<1x448x32xbf16>
    %6 = vector.shape_cast %5 : vector<1x448x32xbf16> to vector<448x32xbf16>
    %c1 = arith.constant 1 : index
    %c0_7 = arith.constant 0 : index
    %c0_8 = arith.constant 0 : index
    %7 = vector.load %arg2[%c1, %c0_7, %c0_8] : memref<5x32x256xbf16, #tpu.memory_space<vmem>>, vector<1x32x256xbf16>
    %8 = vector.shape_cast %7 : vector<1x32x256xbf16> to vector<32x256xbf16>
    %cst_9 = arith.constant dense<0.000000e+00> : vector<448x256xf32>
    %9 = tpu.matmul %6, %8, %cst_9 {dimension_numbers = #tpu.dot_dimension_numbers<[1], [0], [0], [1], [0, 0, 1, 1], [], []>} : vector<448x32xbf16>, vector<32x256xbf16>, vector<448x256xf32> -> vector<448x256xf32>
    %10 = arith.addf %4, %9 : vector<448x256xf32>
    %c0_10 = arith.constant 0 : index
    %c32 = arith.constant 32 : index
    %c0_11 = arith.constant 0 : index
    %11 = vector.load %arg1[%c0_10, %c32, %c0_11] : memref<1x512x32xbf16, #tpu.memory_space<vmem>>, vector<1x448x32xbf16>
    %12 = vector.shape_cast %11 : vector<1x448x32xbf16> to vector<448x32xbf16>
    %c2 = arith.constant 2 : index
    %c0_12 = arith.constant 0 : index
    %c0_13 = arith.constant 0 : index
    %13 = vector.load %arg2[%c2, %c0_12, %c0_13] : memref<5x32x256xbf16, #tpu.memory_space<vmem>>, vector<1x32x256xbf16>
    %14 = vector.shape_cast %13 : vector<1x32x256xbf16> to vector<32x256xbf16>
    %cst_14 = arith.constant dense<0.000000e+00> : vector<448x256xf32>
    %15 = tpu.matmul %12, %14, %cst_14 {dimension_numbers = #tpu.dot_dimension_numbers<[1], [0], [0], [1], [0, 0, 1, 1], [], []>} : vector<448x32xbf16>, vector<32x256xbf16>, vector<448x256xf32> -> vector<448x256xf32>
    %16 = arith.addf %10, %15 : vector<448x256xf32>
    %c0_15 = arith.constant 0 : index
    %c48 = arith.constant 48 : index
    %c0_16 = arith.constant 0 : index
    %17 = vector.load %arg1[%c0_15, %c48, %c0_16] : memref<1x512x32xbf16, #tpu.memory_space<vmem>>, vector<1x448x32xbf16>
    %18 = vector.shape_cast %17 : vector<1x448x32xbf16> to vector<448x32xbf16>
    %c3 = arith.constant 3 : index
    %c0_17 = arith.constant 0 : index
    %c0_18 = arith.constant 0 : index
    %19 = vector.load %arg2[%c3, %c0_17, %c0_18] : memref<5x32x256xbf16, #tpu.memory_space<vmem>>, vector<1x32x256xbf16>
    %20 = vector.shape_cast %19 : vector<1x32x256xbf16> to vector<32x256xbf16>
    %cst_19 = arith.constant dense<0.000000e+00> : vector<448x256xf32>
    %21 = tpu.matmul %18, %20, %cst_19 {dimension_numbers = #tpu.dot_dimension_numbers<[1], [0], [0], [1], [0, 0, 1, 1], [], []>} : vector<448x32xbf16>, vector<32x256xbf16>, vector<448x256xf32> -> vector<448x256xf32>
    %22 = arith.addf %16, %21 : vector<448x256xf32>
    %c0_20 = arith.constant 0 : index
    %c64 = arith.constant 64 : index
    %c0_21 = arith.constant 0 : index
    %23 = vector.load %arg1[%c0_20, %c64, %c0_21] : memref<1x512x32xbf16, #tpu.memory_space<vmem>>, vector<1x448x32xbf16>
    %24 = vector.shape_cast %23 : vector<1x448x32xbf16> to vector<448x32xbf16>
    %c4 = arith.constant 4 : index
    %c0_22 = arith.constant 0 : index
    %c0_23 = arith.constant 0 : index
    %25 = vector.load %arg2[%c4, %c0_22, %c0_23] : memref<5x32x256xbf16, #tpu.memory_space<vmem>>, vector<1x32x256xbf16>
    %26 = vector.shape_cast %25 : vector<1x32x256xbf16> to vector<32x256xbf16>
    %cst_24 = arith.constant dense<0.000000e+00> : vector<448x256xf32>
    %27 = tpu.matmul %24, %26, %cst_24 {dimension_numbers = #tpu.dot_dimension_numbers<[1], [0], [0], [1], [0, 0, 1, 1], [], []>} : vector<448x32xbf16>, vector<32x256xbf16>, vector<448x256xf32> -> vector<448x256xf32>
    %28 = arith.addf %22, %27 : vector<448x256xf32>
    %29 = vector.extract_strided_slice %28 {offsets = [0, 0], sizes = [448, 128], strides = [1, 1]} : vector<448x256xf32> to vector<448x128xf32>
    %30 = vector.extract_strided_slice %28 {offsets = [0, 128], sizes = [448, 128], strides = [1, 1]} : vector<448x256xf32> to vector<448x128xf32>
    %31 = arith.maximumf %29, %30 : vector<448x128xf32>
    %c0_25 = arith.constant 0 : index
    %c0_26 = arith.constant 0 : index
    %32 = vector.load %arg3[%c0_25, %c0_26] : memref<1x128xf32, #tpu.memory_space<vmem>>, vector<1x128xf32>
    %33 = vector.broadcast %32 : vector<1x128xf32> to vector<448x128xf32>
    %34 = arith.addf %31, %33 : vector<448x128xf32>
    %cst_27 = arith.constant 0.000000e+00 : f32
    %35 = vector.broadcast %cst_27 : f32 to vector<448x128xf32>
    %36 = arith.maximumf %34, %35 : vector<448x128xf32>
    %37 = vector.extract_strided_slice %36 {offsets = [0, 0], sizes = [16, 128], strides = [1, 1]} : vector<448x128xf32> to vector<16x128xf32>
    %38 = vector.extract_strided_slice %36 {offsets = [16, 0], sizes = [16, 128], strides = [1, 1]} : vector<448x128xf32> to vector<16x128xf32>
    %39 = arith.maximumf %37, %38 : vector<16x128xf32>
    %c0_28 = arith.constant 0 : index
    %c0_29 = arith.constant 0 : index
    %40 = vector.load %arg13[%c0_28, %c0_29] : memref<224x128xf32, #tpu.memory_space<vmem>>, vector<16x128xf32>
    tpu.vector_store %arg13[%c0_28, %c0_29], %39 {strides = array<i32>} : memref<224x128xf32, #tpu.memory_space<vmem>>, vector<16x128xf32>,
    %41 = vector.extract_strided_slice %36 {offsets = [32, 0], sizes = [16, 128], strides = [1, 1]} : vector<448x128xf32> to vector<16x128xf32>
    %42 = vector.extract_strided_slice %36 {offsets = [48, 0], sizes = [16, 128], strides = [1, 1]} : vector<448x128xf32> to vector<16x128xf32>
    %43 = arith.maximumf %41, %42 : vector<16x128xf32>
    %c16_30 = arith.constant 16 : index
    %c0_31 = arith.constant 0 : index
    %44 = vector.load %arg13[%c16_30, %c0_31] : memref<224x128xf32, #tpu.memory_space<vmem>>, vector<16x128xf32>
    tpu.vector_store %arg13[%c16_30, %c0_31], %43 {strides = array<i32>} : memref<224x128xf32, #tpu.memory_space<vmem>>, vector<16x128xf32>,
    %45 = vector.extract_strided_slice %36 {offsets = [64, 0], sizes = [16, 128], strides = [1, 1]} : vector<448x128xf32> to vector<16x128xf32>
    %46 = vector.extract_strided_slice %36 {offsets = [80, 0], sizes = [16, 128], strides = [1, 1]} : vector<448x128xf32> to vector<16x128xf32>
    %47 = arith.maximumf %45, %46 : vector<16x128xf32>
    %c32_32 = arith.constant 32 : index
    %c0_33 = arith.constant 0 : index
    %48 = vector.load %arg13[%c32_32, %c0_33] : memref<224x128xf32, #tpu.memory_space<vmem>>, vector<16x128xf32>
    tpu.vector_store %arg13[%c32_32, %c0_33], %47 {strides = array<i32>} : memref<224x128xf32, #tpu.memory_space<vmem>>, vector<16x128xf32>,
    %49 = vector.extract_strided_slice %36 {offsets = [96, 0], sizes = [16, 128], strides = [1, 1]} : vector<448x128xf32> to vector<16x128xf32>
    %50 = vector.extract_strided_slice %36 {offsets = [112, 0], sizes = [16, 128], strides = [1, 1]} : vector<448x128xf32> to vector<16x128xf32>
    %51 = arith.maximumf %49, %50 : vector<16x128xf32>
    %c48_34 = arith.constant 48 : index
    %c0_35 = arith.constant 0 : index
    %52 = vector.load %arg13[%c48_34, %c0_35] : memref<224x128xf32, #tpu.memory_space<vmem>>, vector<16x128xf32>
    tpu.vector_store %arg13[%c48_34, %c0_35], %51 {strides = array<i32>} : memref<224x128xf32, #tpu.memory_space<vmem>>, vector<16x128xf32>,
    %53 = vector.extract_strided_slice %36 {offsets = [128, 0], sizes = [16, 128], strides = [1, 1]} : vector<448x128xf32> to vector<16x128xf32>
    %54 = vector.extract_strided_slice %36 {offsets = [144, 0], sizes = [16, 128], strides = [1, 1]} : vector<448x128xf32> to vector<16x128xf32>
    %55 = arith.maximumf %53, %54 : vector<16x128xf32>
    %c64_36 = arith.constant 64 : index
    %c0_37 = arith.constant 0 : index
    %56 = vector.load %arg13[%c64_36, %c0_37] : memref<224x128xf32, #tpu.memory_space<vmem>>, vector<16x128xf32>
    tpu.vector_store %arg13[%c64_36, %c0_37], %55 {strides = array<i32>} : memref<224x128xf32, #tpu.memory_space<vmem>>, vector<16x128xf32>,
    %57 = vector.extract_strided_slice %36 {offsets = [160, 0], sizes = [16, 128], strides = [1, 1]} : vector<448x128xf32> to vector<16x128xf32>
    %58 = vector.extract_strided_slice %36 {offsets = [176, 0], sizes = [16, 128], strides = [1, 1]} : vector<448x128xf32> to vector<16x128xf32>
    %59 = arith.maximumf %57, %58 : vector<16x128xf32>
    %c80 = arith.constant 80 : index
    %c0_38 = arith.constant 0 : index
    %60 = vector.load %arg13[%c80, %c0_38] : memref<224x128xf32, #tpu.memory_space<vmem>>, vector<16x128xf32>
    tpu.vector_store %arg13[%c80, %c0_38], %59 {strides = array<i32>} : memref<224x128xf32, #tpu.memory_space<vmem>>, vector<16x128xf32>,
    %61 = vector.extract_strided_slice %36 {offsets = [192, 0], sizes = [16, 128], strides = [1, 1]} : vector<448x128xf32> to vector<16x128xf32>
    %62 = vector.extract_strided_slice %36 {offsets = [208, 0], sizes = [16, 128], strides = [1, 1]} : vector<448x128xf32> to vector<16x128xf32>
    %63 = arith.maximumf %61, %62 : vector<16x128xf32>
    %c96 = arith.constant 96 : index
    %c0_39 = arith.constant 0 : index
    %64 = vector.load %arg13[%c96, %c0_39] : memref<224x128xf32, #tpu.memory_space<vmem>>, vector<16x128xf32>
    tpu.vector_store %arg13[%c96, %c0_39], %63 {strides = array<i32>} : memref<224x128xf32, #tpu.memory_space<vmem>>, vector<16x128xf32>,
    %65 = vector.extract_strided_slice %36 {offsets = [224, 0], sizes = [16, 128], strides = [1, 1]} : vector<448x128xf32> to vector<16x128xf32>
    %66 = vector.extract_strided_slice %36 {offsets = [240, 0], sizes = [16, 128], strides = [1, 1]} : vector<448x128xf32> to vector<16x128xf32>
    %67 = arith.maximumf %65, %66 : vector<16x128xf32>
    %c112 = arith.constant 112 : index
    %c0_40 = arith.constant 0 : index
    %68 = vector.load %arg13[%c112, %c0_40] : memref<224x128xf32, #tpu.memory_space<vmem>>, vector<16x128xf32>
    tpu.vector_store %arg13[%c112, %c0_40], %67 {strides = array<i32>} : memref<224x128xf32, #tpu.memory_space<vmem>>, vector<16x128xf32>,
    %69 = vector.extract_strided_slice %36 {offsets = [256, 0], sizes = [16, 128], strides = [1, 1]} : vector<448x128xf32> to vector<16x128xf32>
    %70 = vector.extract_strided_slice %36 {offsets = [272, 0], sizes = [16, 128], strides = [1, 1]} : vector<448x128xf32> to vector<16x128xf32>
    %71 = arith.maximumf %69, %70 : vector<16x128xf32>
    %c128 = arith.constant 128 : index
    %c0_41 = arith.constant 0 : index
    %72 = vector.load %arg13[%c128, %c0_41] : memref<224x128xf32, #tpu.memory_space<vmem>>, vector<16x128xf32>
    tpu.vector_store %arg13[%c128, %c0_41], %71 {strides = array<i32>} : memref<224x128xf32, #tpu.memory_space<vmem>>, vector<16x128xf32>,
    %73 = vector.extract_strided_slice %36 {offsets = [288, 0], sizes = [16, 128], strides = [1, 1]} : vector<448x128xf32> to vector<16x128xf32>
    %74 = vector.extract_strided_slice %36 {offsets = [304, 0], sizes = [16, 128], strides = [1, 1]} : vector<448x128xf32> to vector<16x128xf32>
    %75 = arith.maximumf %73, %74 : vector<16x128xf32>
    %c144 = arith.constant 144 : index
    %c0_42 = arith.constant 0 : index
    %76 = vector.load %arg13[%c144, %c0_42] : memref<224x128xf32, #tpu.memory_space<vmem>>, vector<16x128xf32>
    tpu.vector_store %arg13[%c144, %c0_42], %75 {strides = array<i32>} : memref<224x128xf32, #tpu.memory_space<vmem>>, vector<16x128xf32>,
    %77 = vector.extract_strided_slice %36 {offsets = [320, 0], sizes = [16, 128], strides = [1, 1]} : vector<448x128xf32> to vector<16x128xf32>
    %78 = vector.extract_strided_slice %36 {offsets = [336, 0], sizes = [16, 128], strides = [1, 1]} : vector<448x128xf32> to vector<16x128xf32>
    %79 = arith.maximumf %77, %78 : vector<16x128xf32>
    %c160 = arith.constant 160 : index
    %c0_43 = arith.constant 0 : index
    %80 = vector.load %arg13[%c160, %c0_43] : memref<224x128xf32, #tpu.memory_space<vmem>>, vector<16x128xf32>
    tpu.vector_store %arg13[%c160, %c0_43], %79 {strides = array<i32>} : memref<224x128xf32, #tpu.memory_space<vmem>>, vector<16x128xf32>,
    %81 = vector.extract_strided_slice %36 {offsets = [352, 0], sizes = [16, 128], strides = [1, 1]} : vector<448x128xf32> to vector<16x128xf32>
    %82 = vector.extract_strided_slice %36 {offsets = [368, 0], sizes = [16, 128], strides = [1, 1]} : vector<448x128xf32> to vector<16x128xf32>
    %83 = arith.maximumf %81, %82 : vector<16x128xf32>
    %c176 = arith.constant 176 : index
    %c0_44 = arith.constant 0 : index
    %84 = vector.load %arg13[%c176, %c0_44] : memref<224x128xf32, #tpu.memory_space<vmem>>, vector<16x128xf32>
    tpu.vector_store %arg13[%c176, %c0_44], %83 {strides = array<i32>} : memref<224x128xf32, #tpu.memory_space<vmem>>, vector<16x128xf32>,
    %85 = vector.extract_strided_slice %36 {offsets = [384, 0], sizes = [16, 128], strides = [1, 1]} : vector<448x128xf32> to vector<16x128xf32>
    %86 = vector.extract_strided_slice %36 {offsets = [400, 0], sizes = [16, 128], strides = [1, 1]} : vector<448x128xf32> to vector<16x128xf32>
    %87 = arith.maximumf %85, %86 : vector<16x128xf32>
    %c192 = arith.constant 192 : index
    %c0_45 = arith.constant 0 : index
    %88 = vector.load %arg13[%c192, %c0_45] : memref<224x128xf32, #tpu.memory_space<vmem>>, vector<16x128xf32>
    tpu.vector_store %arg13[%c192, %c0_45], %87 {strides = array<i32>} : memref<224x128xf32, #tpu.memory_space<vmem>>, vector<16x128xf32>,
    %89 = vector.extract_strided_slice %36 {offsets = [416, 0], sizes = [16, 128], strides = [1, 1]} : vector<448x128xf32> to vector<16x128xf32>
    %90 = vector.extract_strided_slice %36 {offsets = [432, 0], sizes = [16, 128], strides = [1, 1]} : vector<448x128xf32> to vector<16x128xf32>
    %91 = arith.maximumf %89, %90 : vector<16x128xf32>
    %c208 = arith.constant 208 : index
    %c0_46 = arith.constant 0 : index
    %92 = vector.load %arg13[%c208, %c0_46] : memref<224x128xf32, #tpu.memory_space<vmem>>, vector<16x128xf32>
    tpu.vector_store %arg13[%c208, %c0_46], %91 {strides = array<i32>} : memref<224x128xf32, #tpu.memory_space<vmem>>, vector<16x128xf32>,
    %c0_47 = arith.constant 0 : index
    %c0_48 = arith.constant 0 : index
    %93 = vector.load %arg13[%c0_47, %c0_48] : memref<224x128xf32, #tpu.memory_space<vmem>>, vector<160x128xf32>
    %94 = arith.truncf %93 : vector<160x128xf32> to vector<160x128xbf16>
    %c0_49 = arith.constant 0 : index
    %c0_50 = arith.constant 0 : index
    %c0_51 = arith.constant 0 : index
    %95 = vector.load %arg4[%c0_49, %c0_50, %c0_51] : memref<5x128x256xbf16, #tpu.memory_space<vmem>>, vector<1x128x256xbf16>
    %96 = vector.shape_cast %95 : vector<1x128x256xbf16> to vector<128x256xbf16>
    %cst_52 = arith.constant dense<0.000000e+00> : vector<160x256xf32>
    %97 = tpu.matmul %94, %96, %cst_52 {dimension_numbers = #tpu.dot_dimension_numbers<[1], [0], [0], [1], [0, 0, 1, 1], [], []>} : vector<160x128xbf16>, vector<128x256xbf16>, vector<160x256xf32> -> vector<160x256xf32>
    %c16_53 = arith.constant 16 : index
    %c0_54 = arith.constant 0 : index
    %98 = vector.load %arg13[%c16_53, %c0_54] : memref<224x128xf32, #tpu.memory_space<vmem>>, vector<160x128xf32>
    %99 = arith.truncf %98 : vector<160x128xf32> to vector<160x128xbf16>
    %c1_55 = arith.constant 1 : index
    %c0_56 = arith.constant 0 : index
    %c0_57 = arith.constant 0 : index
    %100 = vector.load %arg4[%c1_55, %c0_56, %c0_57] : memref<5x128x256xbf16, #tpu.memory_space<vmem>>, vector<1x128x256xbf16>
    %101 = vector.shape_cast %100 : vector<1x128x256xbf16> to vector<128x256xbf16>
    %cst_58 = arith.constant dense<0.000000e+00> : vector<160x256xf32>
    %102 = tpu.matmul %99, %101, %cst_58 {dimension_numbers = #tpu.dot_dimension_numbers<[1], [0], [0], [1], [0, 0, 1, 1], [], []>} : vector<160x128xbf16>, vector<128x256xbf16>, vector<160x256xf32> -> vector<160x256xf32>
    %103 = arith.addf %97, %102 : vector<160x256xf32>
    %c32_59 = arith.constant 32 : index
    %c0_60 = arith.constant 0 : index
    %104 = vector.load %arg13[%c32_59, %c0_60] : memref<224x128xf32, #tpu.memory_space<vmem>>, vector<160x128xf32>
    %105 = arith.truncf %104 : vector<160x128xf32> to vector<160x128xbf16>
    %c2_61 = arith.constant 2 : index
    %c0_62 = arith.constant 0 : index
    %c0_63 = arith.constant 0 : index
    %106 = vector.load %arg4[%c2_61, %c0_62, %c0_63] : memref<5x128x256xbf16, #tpu.memory_space<vmem>>, vector<1x128x256xbf16>
    %107 = vector.shape_cast %106 : vector<1x128x256xbf16> to vector<128x256xbf16>
    %cst_64 = arith.constant dense<0.000000e+00> : vector<160x256xf32>
    %108 = tpu.matmul %105, %107, %cst_64 {dimension_numbers = #tpu.dot_dimension_numbers<[1], [0], [0], [1], [0, 0, 1, 1], [], []>} : vector<160x128xbf16>, vector<128x256xbf16>, vector<160x256xf32> -> vector<160x256xf32>
    %109 = arith.addf %103, %108 : vector<160x256xf32>
    %c48_65 = arith.constant 48 : index
    %c0_66 = arith.constant 0 : index
    %110 = vector.load %arg13[%c48_65, %c0_66] : memref<224x128xf32, #tpu.memory_space<vmem>>, vector<160x128xf32>
    %111 = arith.truncf %110 : vector<160x128xf32> to vector<160x128xbf16>
    %c3_67 = arith.constant 3 : index
    %c0_68 = arith.constant 0 : index
    %c0_69 = arith.constant 0 : index
    %112 = vector.load %arg4[%c3_67, %c0_68, %c0_69] : memref<5x128x256xbf16, #tpu.memory_space<vmem>>, vector<1x128x256xbf16>
    %113 = vector.shape_cast %112 : vector<1x128x256xbf16> to vector<128x256xbf16>
    %cst_70 = arith.constant dense<0.000000e+00> : vector<160x256xf32>
    %114 = tpu.matmul %111, %113, %cst_70 {dimension_numbers = #tpu.dot_dimension_numbers<[1], [0], [0], [1], [0, 0, 1, 1], [], []>} : vector<160x128xbf16>, vector<128x256xbf16>, vector<160x256xf32> -> vector<160x256xf32>
    %115 = arith.addf %109, %114 : vector<160x256xf32>
    %c64_71 = arith.constant 64 : index
    %c0_72 = arith.constant 0 : index
    %116 = vector.load %arg13[%c64_71, %c0_72] : memref<224x128xf32, #tpu.memory_space<vmem>>, vector<160x128xf32>
    %117 = arith.truncf %116 : vector<160x128xf32> to vector<160x128xbf16>
    %c4_73 = arith.constant 4 : index
    %c0_74 = arith.constant 0 : index
    %c0_75 = arith.constant 0 : index
    %118 = vector.load %arg4[%c4_73, %c0_74, %c0_75] : memref<5x128x256xbf16, #tpu.memory_space<vmem>>, vector<1x128x256xbf16>
    %119 = vector.shape_cast %118 : vector<1x128x256xbf16> to vector<128x256xbf16>
    %cst_76 = arith.constant dense<0.000000e+00> : vector<160x256xf32>
    %120 = tpu.matmul %117, %119, %cst_76 {dimension_numbers = #tpu.dot_dimension_numbers<[1], [0], [0], [1], [0, 0, 1, 1], [], []>} : vector<160x128xbf16>, vector<128x256xbf16>, vector<160x256xf32> -> vector<160x256xf32>
    %121 = arith.addf %115, %120 : vector<160x256xf32>
    %122 = vector.extract_strided_slice %121 {offsets = [0, 0], sizes = [160, 128], strides = [1, 1]} : vector<160x256xf32> to vector<160x128xf32>
    %123 = vector.extract_strided_slice %121 {offsets = [0, 128], sizes = [160, 128], strides = [1, 1]} : vector<160x256xf32> to vector<160x128xf32>
    %124 = arith.maximumf %122, %123 : vector<160x128xf32>
    %c0_77 = arith.constant 0 : index
    %c0_78 = arith.constant 0 : index
    %125 = vector.load %arg5[%c0_77, %c0_78] : memref<1x128xf32, #tpu.memory_space<vmem>>, vector<1x128xf32>
    %126 = vector.broadcast %125 : vector<1x128xf32> to vector<160x128xf32>
    %127 = arith.addf %124, %126 : vector<160x128xf32>
    %cst_79 = arith.constant 0.000000e+00 : f32
    %128 = vector.broadcast %cst_79 : f32 to vector<160x128xf32>
    %129 = arith.maximumf %127, %128 : vector<160x128xf32>
    %130 = vector.extract_strided_slice %129 {offsets = [0, 0], sizes = [16, 128], strides = [1, 1]} : vector<160x128xf32> to vector<16x128xf32>
    %131 = vector.extract_strided_slice %129 {offsets = [16, 0], sizes = [16, 128], strides = [1, 1]} : vector<160x128xf32> to vector<16x128xf32>
    %132 = arith.maximumf %130, %131 : vector<16x128xf32>
    %133 = arith.truncf %132 : vector<16x128xf32> to vector<16x128xbf16>
    %c0_80 = arith.constant 0 : index
    %c0_81 = arith.constant 0 : index
    %c0_82 = arith.constant 0 : index
    %134 = vector.load %arg6[%c0_80, %c0_81, %c0_82] : memref<5x128x128xbf16, #tpu.memory_space<vmem>>, vector<1x128x128xbf16>
    %135 = vector.shape_cast %134 : vector<1x128x128xbf16> to vector<128x128xbf16>
    %cst_83 = arith.constant dense<0.000000e+00> : vector<16x128xf32>
    %136 = tpu.matmul %133, %135, %cst_83 {dimension_numbers = #tpu.dot_dimension_numbers<[1], [0], [0], [1], [0, 0, 1, 1], [], []>} : vector<16x128xbf16>, vector<128x128xbf16>, vector<16x128xf32> -> vector<16x128xf32>
    %137 = vector.extract_strided_slice %129 {offsets = [32, 0], sizes = [16, 128], strides = [1, 1]} : vector<160x128xf32> to vector<16x128xf32>
    %138 = vector.extract_strided_slice %129 {offsets = [48, 0], sizes = [16, 128], strides = [1, 1]} : vector<160x128xf32> to vector<16x128xf32>
    %139 = arith.maximumf %137, %138 : vector<16x128xf32>
    %140 = arith.truncf %139 : vector<16x128xf32> to vector<16x128xbf16>
    %c1_84 = arith.constant 1 : index
    %c0_85 = arith.constant 0 : index
    %c0_86 = arith.constant 0 : index
    %141 = vector.load %arg6[%c1_84, %c0_85, %c0_86] : memref<5x128x128xbf16, #tpu.memory_space<vmem>>, vector<1x128x128xbf16>
    %142 = vector.shape_cast %141 : vector<1x128x128xbf16> to vector<128x128xbf16>
    %cst_87 = arith.constant dense<0.000000e+00> : vector<16x128xf32>
    %143 = tpu.matmul %140, %142, %cst_87 {dimension_numbers = #tpu.dot_dimension_numbers<[1], [0], [0], [1], [0, 0, 1, 1], [], []>} : vector<16x128xbf16>, vector<128x128xbf16>, vector<16x128xf32> -> vector<16x128xf32>
    %144 = arith.addf %136, %143 : vector<16x128xf32>
    %145 = vector.extract_strided_slice %129 {offsets = [64, 0], sizes = [16, 128], strides = [1, 1]} : vector<160x128xf32> to vector<16x128xf32>
    %146 = vector.extract_strided_slice %129 {offsets = [80, 0], sizes = [16, 128], strides = [1, 1]} : vector<160x128xf32> to vector<16x128xf32>
    %147 = arith.maximumf %145, %146 : vector<16x128xf32>
    %148 = arith.truncf %147 : vector<16x128xf32> to vector<16x128xbf16>
    %c2_88 = arith.constant 2 : index
    %c0_89 = arith.constant 0 : index
    %c0_90 = arith.constant 0 : index
    %149 = vector.load %arg6[%c2_88, %c0_89, %c0_90] : memref<5x128x128xbf16, #tpu.memory_space<vmem>>, vector<1x128x128xbf16>
    %150 = vector.shape_cast %149 : vector<1x128x128xbf16> to vector<128x128xbf16>
    %cst_91 = arith.constant dense<0.000000e+00> : vector<16x128xf32>
    %151 = tpu.matmul %148, %150, %cst_91 {dimension_numbers = #tpu.dot_dimension_numbers<[1], [0], [0], [1], [0, 0, 1, 1], [], []>} : vector<16x128xbf16>, vector<128x128xbf16>, vector<16x128xf32> -> vector<16x128xf32>
    %152 = arith.addf %144, %151 : vector<16x128xf32>
    %153 = vector.extract_strided_slice %129 {offsets = [96, 0], sizes = [16, 128], strides = [1, 1]} : vector<160x128xf32> to vector<16x128xf32>
    %154 = vector.extract_strided_slice %129 {offsets = [112, 0], sizes = [16, 128], strides = [1, 1]} : vector<160x128xf32> to vector<16x128xf32>
    %155 = arith.maximumf %153, %154 : vector<16x128xf32>
    %156 = arith.truncf %155 : vector<16x128xf32> to vector<16x128xbf16>
    %c3_92 = arith.constant 3 : index
    %c0_93 = arith.constant 0 : index
    %c0_94 = arith.constant 0 : index
    %157 = vector.load %arg6[%c3_92, %c0_93, %c0_94] : memref<5x128x128xbf16, #tpu.memory_space<vmem>>, vector<1x128x128xbf16>
    %158 = vector.shape_cast %157 : vector<1x128x128xbf16> to vector<128x128xbf16>
    %cst_95 = arith.constant dense<0.000000e+00> : vector<16x128xf32>
    %159 = tpu.matmul %156, %158, %cst_95 {dimension_numbers = #tpu.dot_dimension_numbers<[1], [0], [0], [1], [0, 0, 1, 1], [], []>} : vector<16x128xbf16>, vector<128x128xbf16>, vector<16x128xf32> -> vector<16x128xf32>
    %160 = arith.addf %152, %159 : vector<16x128xf32>
    %161 = vector.extract_strided_slice %129 {offsets = [128, 0], sizes = [16, 128], strides = [1, 1]} : vector<160x128xf32> to vector<16x128xf32>
    %162 = vector.extract_strided_slice %129 {offsets = [144, 0], sizes = [16, 128], strides = [1, 1]} : vector<160x128xf32> to vector<16x128xf32>
    %163 = arith.maximumf %161, %162 : vector<16x128xf32>
    %164 = arith.truncf %163 : vector<16x128xf32> to vector<16x128xbf16>
    %c4_96 = arith.constant 4 : index
    %c0_97 = arith.constant 0 : index
    %c0_98 = arith.constant 0 : index
    %165 = vector.load %arg6[%c4_96, %c0_97, %c0_98] : memref<5x128x128xbf16, #tpu.memory_space<vmem>>, vector<1x128x128xbf16>
    %166 = vector.shape_cast %165 : vector<1x128x128xbf16> to vector<128x128xbf16>
    %cst_99 = arith.constant dense<0.000000e+00> : vector<16x128xf32>
    %167 = tpu.matmul %164, %166, %cst_99 {dimension_numbers = #tpu.dot_dimension_numbers<[1], [0], [0], [1], [0, 0, 1, 1], [], []>} : vector<16x128xbf16>, vector<128x128xbf16>, vector<16x128xf32> -> vector<16x128xf32>
    %168 = arith.addf %160, %167 : vector<16x128xf32>
    %c0_100 = arith.constant 0 : index
    %c0_101 = arith.constant 0 : index
    %169 = vector.load %arg7[%c0_100, %c0_101] : memref<1x128xf32, #tpu.memory_space<vmem>>, vector<1x128xf32>
    %170 = vector.broadcast %169 : vector<1x128xf32> to vector<16x128xf32>
    %171 = arith.addf %168, %170 : vector<16x128xf32>
    %cst_102 = arith.constant 0.000000e+00 : f32
    %172 = vector.broadcast %cst_102 : f32 to vector<16x128xf32>
    %173 = arith.maximumf %171, %172 : vector<16x128xf32>
    %174 = arith.truncf %173 : vector<16x128xf32> to vector<16x128xbf16>
    %c0_103 = arith.constant 0 : index
    %c0_104 = arith.constant 0 : index
    %175 = vector.load %arg8[%c0_103, %c0_104] : memref<128x128xbf16, #tpu.memory_space<vmem>>, vector<128x128xbf16>
    %cst_105 = arith.constant dense<0.000000e+00> : vector<16x128xf32>
    %176 = tpu.matmul %174, %175, %cst_105 {dimension_numbers = #tpu.dot_dimension_numbers<[1], [0], [0], [1], [0, 0, 1, 1], [], []>} : vector<16x128xbf16>, vector<128x128xbf16>, vector<16x128xf32> -> vector<16x128xf32>
    %c0_106 = arith.constant 0 : index
    %c0_107 = arith.constant 0 : index
    %177 = vector.load %arg9[%c0_106, %c0_107] : memref<1x128xf32, #tpu.memory_space<vmem>>, vector<1x128xf32>
    %178 = vector.broadcast %177 : vector<1x128xf32> to vector<16x128xf32>
    %179 = arith.addf %176, %178 : vector<16x128xf32>
    %cst_108 = arith.constant 0.000000e+00 : f32
    %180 = vector.broadcast %cst_108 : f32 to vector<16x128xf32>
    %181 = arith.maximumf %179, %180 : vector<16x128xf32>
    %182 = arith.truncf %181 : vector<16x128xf32> to vector<16x128xbf16>
    %c0_109 = arith.constant 0 : index
    %c0_110 = arith.constant 0 : index
    %183 = vector.load %arg10[%c0_109, %c0_110] : memref<128x128xbf16, #tpu.memory_space<vmem>>, vector<128x128xbf16>
    %cst_111 = arith.constant dense<0.000000e+00> : vector<16x128xf32>
    %184 = tpu.matmul %182, %183, %cst_111 {dimension_numbers = #tpu.dot_dimension_numbers<[1], [0], [0], [1], [0, 0, 1, 1], [], []>} : vector<16x128xbf16>, vector<128x128xbf16>, vector<16x128xf32> -> vector<16x128xf32>
    %c0_112 = arith.constant 0 : index
    %c0_113 = arith.constant 0 : index
    %185 = vector.load %arg11[%c0_112, %c0_113] : memref<1x128xf32, #tpu.memory_space<vmem>>, vector<1x128xf32>
    %186 = vector.broadcast %185 : vector<1x128xf32> to vector<16x128xf32>
    %187 = arith.addf %184, %186 : vector<16x128xf32>
    %c0_114 = arith.constant 0 : index
    %c0_115 = arith.constant 0 : index
    %c0_116 = arith.constant 0 : index
    %188 = vector.load %arg12[%c0_114, %c0_115, %c0_116] : memref<1x16x128xf32, #tpu.memory_space<vmem>>, vector<1x16x128xf32>
    %189 = vector.shape_cast %188 : vector<1x16x128xf32> to vector<16x128xf32>
    %190 = vector.shape_cast %187 : vector<16x128xf32> to vector<1x16x128xf32>
    tpu.vector_store %arg12[%c0_114, %c0_115, %c0_116], %190 {strides = array<i32>} : memref<1x16x128xf32, #tpu.memory_space<vmem>>, vector<1x16x128xf32>,
    return
  }
  func.func @transform_0(%arg0: i32) -> (i32, i32, i32) {
    %c0_i32 = arith.constant 0 : i32
    %c0_i32_0 = arith.constant 0 : i32
    %c0_i32_1 = arith.constant 0 : i32
    return %arg0, %c0_i32, %c0_i32_0 : i32, i32, i32
  }
  func.func @transform_1(%arg0: i32) -> (i32, i32, i32) {
    %c0_i32 = arith.constant 0 : i32
    %c0_i32_0 = arith.constant 0 : i32
    %c0_i32_1 = arith.constant 0 : i32
    %c0_i32_2 = arith.constant 0 : i32
    return %c0_i32, %c0_i32_0, %c0_i32_1 : i32, i32, i32
  }
  func.func @transform_2(%arg0: i32) -> (i32, i32) {
    %c0_i32 = arith.constant 0 : i32
    %c0_i32_0 = arith.constant 0 : i32
    %c0_i32_1 = arith.constant 0 : i32
    return %c0_i32, %c0_i32_0 : i32, i32
  }
  func.func @transform_3(%arg0: i32) -> (i32, i32, i32) {
    %c0_i32 = arith.constant 0 : i32
    %c0_i32_0 = arith.constant 0 : i32
    %c0_i32_1 = arith.constant 0 : i32
    %c0_i32_2 = arith.constant 0 : i32
    return %c0_i32, %c0_i32_0, %c0_i32_1 : i32, i32, i32
  }
  func.func @transform_4(%arg0: i32) -> (i32, i32) {
    %c0_i32 = arith.constant 0 : i32
    %c0_i32_0 = arith.constant 0 : i32
    %c0_i32_1 = arith.constant 0 : i32
    return %c0_i32, %c0_i32_0 : i32, i32
  }
  func.func @transform_5(%arg0: i32) -> (i32, i32, i32) {
    %c0_i32 = arith.constant 0 : i32
    %c0_i32_0 = arith.constant 0 : i32
    %c0_i32_1 = arith.constant 0 : i32
    %c0_i32_2 = arith.constant 0 : i32
    return %c0_i32, %c0_i32_0, %c0_i32_1 : i32, i32, i32
  }
  func.func @transform_6(%arg0: i32) -> (i32, i32) {
    %c0_i32 = arith.constant 0 : i32
    %c0_i32_0 = arith.constant 0 : i32
    %c0_i32_1 = arith.constant 0 : i32
    return %c0_i32, %c0_i32_0 : i32, i32
  }
  func.func @transform_7(%arg0: i32) -> (i32, i32) {
    %c0_i32 = arith.constant 0 : i32
    %c0_i32_0 = arith.constant 0 : i32
    %c0_i32_1 = arith.constant 0 : i32
    return %c0_i32, %c0_i32_0 : i32, i32
  }
  func.func @transform_8(%arg0: i32) -> (i32, i32) {
    %c0_i32 = arith.constant 0 : i32
    %c0_i32_0 = arith.constant 0 : i32
    %c0_i32_1 = arith.constant 0 : i32
    return %c0_i32, %c0_i32_0 : i32, i32
  }
  func.func @transform_9(%arg0: i32) -> (i32, i32) {
    %c0_i32 = arith.constant 0 : i32
    %c0_i32_0 = arith.constant 0 : i32
    %c0_i32_1 = arith.constant 0 : i32
    return %c0_i32, %c0_i32_0 : i32, i32
  }
  func.func @transform_10(%arg0: i32) -> (i32, i32) {
    %c0_i32 = arith.constant 0 : i32
    %c0_i32_0 = arith.constant 0 : i32
    %c0_i32_1 = arith.constant 0 : i32
    return %c0_i32, %c0_i32_0 : i32, i32
  }
  func.func @transform_11(%arg0: i32) -> (i32, i32, i32) {
    %c0_i32 = arith.constant 0 : i32
    %c0_i32_0 = arith.constant 0 : i32
    %c0_i32_1 = arith.constant 0 : i32
    return %arg0, %c0_i32, %c0_i32_0 : i32, i32, i32
  }
}

</mosaic_0001>

<bundles_post_ra>
// kernel: lenet_forward.1
= control target key start
LH: loop header
LB: loop body
LE: loop exit
PB: predicated region body
PF: predicated region fallthrough
CT: control target
= control target key end

     0   :  { %16 = vsyncpa [#allocation4], 0  ;;  %s9218_s0 = inlined_call_operand.vmem [shape: bf16[1,512,32], index: 0, kind: input, shape index: {}]   ;;  %s9219_s1 = inlined_call_operand.vmem [shape: bf16[5,32,256], index: 1, kind: input, shape index: {}]   ;;  %s9220_s2 = inlined_call_operand.vmem [shape: f32[1,128], index: 2, kind: input, shape index: {}]   ;;  %s9221_s3 = inlined_call_operand.vmem [shape: bf16[5,128,256], index: 3, kind: input, shape index: {}]   ;;  %s9222_s4 = inlined_call_operand.vmem [shape: f32[1,128], index: 4, kind: input, shape index: {}]   ;;  %s9223_s5 = inlined_call_operand.hbm [shape: bf16[5,128,128], index: 5, kind: input, shape index: {}]   ;;  %s9224_s6 = inlined_call_operand.vmem [shape: f32[1,128], index: 6, kind: input, shape index: {}]   ;;  %s9225_s7 = inlined_call_operand.vmem [shape: bf16[128,128], index: 7, kind: input, shape index: {}]   ;;  %s9226_s8 = inlined_call_operand.vmem [shape: f32[1,128], index: 8, kind: input, shape index: {}]   ;;  %s9227_s9 = inlined_call_operand.hbm [shape: bf16[128,128], index: 9, kind: input, shape index: {}]   ;;  %s9228_s10 = inlined_call_operand.vmem [shape: f32[1,128], index: 10, kind: input, shape index: {}]   ;;  %s9229_s11 = inlined_call_operand.vmem [shape: f32[1,16,128], index: 11, kind: output, shape index: {}]  }
   0x1   :  { %17 = vsyncpa [#allocation6], 0  ;;  %s7404_s17 = smov [#allocation3]   ;;  %s7356_s21 = scalar_lea.hbm %s9223_s5, 5120 }
   0x2   :  { %s33_s18 = sshll.u32 %s7404_s17, 4  ;;  %p7357_p0 = scmp.ne.s32.totalorder %s9223_s5, %s7356_s21  ;;  %s34_s18 = int_to_ptr.vmem [resolvable:$true] %s33_s18 }
   0x3   :  { %p7360_p1 = scmp.lt.u32.totalorder %s7356_s21, %s9223_s5 }
   0x5   :  { %p7362_p2 = pnand %p7360_p1, %p7357_p0 }
   0x7   :  { %7365 = shalt.err (!%p7362_p2)
}
   0x8   :  { %s7366_s26 = scalar_lea.vmem %s34_s18, 5120  ;;  %p7371_p4 = scmp.lt.s32.totalorder %s34_s18, %s34_s18 }
   0x9   :  { %p7367_p3 = scmp.ne.s32.totalorder %s34_s18, %s7366_s26  ;;  %p7372_p5 = scmp.lt.s32.totalorder %s7366_s26, %s7366_s26 }
   0xb   :  { %p7373_p6 = por %p7372_p5, %p7371_p4 }
   0xd   :  { %p7374_p7 = pnand %p7373_p6, %p7367_p3 }
   0xf   :  { %7377 = shalt.err (!%p7374_p7)
}
  0x10   :  { %s7405_s27 = smov 64   ;;  %s7406_s28 = smov 4  }
  0x11   :  { %39 = dma.hbm_to_vmem [thread:$0]  %s9223_s5, 5120, %s34_s18, [#allocation4], %s7405_s27, %s7405_s27, %s7406_s28  }
  0x12   :  { %s7407_s12 = smov [#allocation5]   ;;  %s7378_s16 = scalar_lea.hbm %s9227_s9, 1024 }
  0x13   :  { %s51_s13 = sshll.u32 %s7407_s12, 4  ;;  %p7379_p8 = scmp.ne.s32.totalorder %s9227_s9, %s7378_s16  ;;  %s52_s13 = int_to_ptr.vmem [resolvable:$true] %s51_s13 }
  0x14   :  { %p7382_p9 = scmp.lt.u32.totalorder %s7378_s16, %s9227_s9 }
  0x16   :  { %p7384_p10 = pnand %p7382_p9, %p7379_p8 }
  0x18   :  { %7387 = shalt.err (!%p7384_p10)
}
  0x19   :  { %s7388_s22 = scalar_lea.vmem %s52_s13, 1024  ;;  %p7393_p12 = scmp.lt.s32.totalorder %s52_s13, %s52_s13 }
  0x1a   :  { %p7389_p11 = scmp.ne.s32.totalorder %s52_s13, %s7388_s22  ;;  %p7394_p13 = scmp.lt.s32.totalorder %s7388_s22, %s7388_s22 }
  0x1c   :  { %p7395_p0 = por %p7394_p13, %p7393_p12 }
  0x1e   :  { %p7396_p1 = pnand %p7395_p0, %p7389_p11 }
  0x20   :  { %7399 = shalt.err (!%p7396_p1)
}
  0x21   :  { %57 = dma.hbm_to_vmem [thread:$0]  %s9227_s9, 1024, %s52_s13, [#allocation6], %s7405_s27, %s7405_s27, %s7406_s28  }
  0x22   :  { %7400 = dma.done.wait [#allocation4], 5120  }
  0x23   :  { %7401 = vsyncadd [#allocation4], 4294962176 }
  0x24   :  { %7402 = dma.done.wait [#allocation6], 1024  }
  0x25   :  { %7403 = vsyncadd [#allocation6], 4294966272  ;;  %v9230_v0 = vmov 0   ;;  %v7026_v1 = vld [vmem:[%s9219_s1 + $0x4] ss:$8 sps:$4 sm:$0xff]   ;;  %vm294_vm0 = vcmask 261120  }
  0x26   :  { %752 = vmatprep.mubr.bf16.mxu0 %v9230_v0  ;;  %411 = vmatprep.mubr.bf16.mxu1 %v9230_v0  ;;  %v7028_v2 = vld [vmem:[%s9219_s1] ss:$8 sps:$4 sm:$0xff]   ;;  %v7029_v3 = vld [vmem:[%s9219_s1 + $0x14] ss:$8 sps:$4 sm:$0xff]   ;;  %v7031_v4 = vld [vmem:[%s9219_s1 + $0x10] ss:$8 sps:$4 sm:$0xff]  }
  0x27   :  { %720 = vmatprep.subr.bf16.mxu0 %v7026_v1  ;;  %v7035_v5 = vld [vmem:[%s9219_s1 + $0x44] ss:$8 sps:$4 sm:$0xff]   ;;  %v7033_v7 = vld [vmem:[%s9219_s1 + $0x40] ss:$8 sps:$4 sm:$0xff]   ;;  %v7048_v9 = vld [vmem:[%s9219_s1 + $0x50] ss:$8 sps:$4 sm:$0xff]  }
  0x28   :  { %721 = vmatpush1.bf16.msra.mxu0 %v7028_v2  ;;  %v7032_v6 = vld [vmem:[%s9218_s0] sm:$0xff]   ;;  %v7036_v8 = vld [vmem:[%s9218_s0 + $0x8] sm:$0xff]   ;;  %v7050_v10 = vld [vmem:[%s9219_s1 + $0x54] ss:$8 sps:$4 sm:$0xff]   ;;  %vm7410_vm1 = vmmov 0  }
  0x29   :  { %722 = vmatprep.subr.bf16.mxu0 %v7029_v3  ;;  %v7037_v11 = vld [vmem:[%s9218_s0 + $0x10] sm:$0xff]   ;;  %v7038_v12 = vld [vmem:[%s9218_s0 + $0x18] sm:$0xff]   ;;  %v7039_v13 = vld [vmem:[%s9218_s0 + $0x20] sm:$0xff]  }
  0x2a   :  { %v7040_v14 = vld [vmem:[%s9218_s0 + $0x28] sm:$0xff]   ;;  %v7041_v15 = vld [vmem:[%s9218_s0 + $0x30] sm:$0xff]   ;;  %v7559_v16 = vld [vmem:[%s9218_s0 + $0x38] sm:$0xff]  }
  0x2b   :  { %v7567_v17 = vld [vmem:[%s9218_s0 + $0x40] sm:$0xff]   ;;  %v7578_v19 = vld [vmem:[%s9218_s0 + $0x48] sm:$0xff]   ;;  %v7586_v20 = vld [vmem:[%s9218_s0 + $0x50] sm:$0xff]  }
  0x2c   :  { %723 = vmatpush1.bf16.msra.mxu0 %v7031_v4  ;;  %v7065_v18 = vld [vmem:[%s9219_s1 + $0x64] ss:$8 sps:$4 sm:$0xff]   ;;  %v7594_v21 = vld [vmem:[%s9218_s0 + $0x58] sm:$0xff]   ;;  %v7618_v24 = vld [vmem:[%s9218_s0 + $0x70] sm:$0xff]  }
  0x2d   :  { %1338 = vmatprep.subr.bf16.mxu0 %v7035_v5  ;;  %v7602_v22 = vld [vmem:[%s9218_s0 + $0x60] sm:$0xff]   ;;  %v7610_v23 = vld [vmem:[%s9218_s0 + $0x68] sm:$0xff]   ;;  %v7626_v25 = vld [vmem:[%s9218_s0 + $0x78] sm:$0xff]  }
  0x2e   :  { %v7634_v26 = vld [vmem:[%s9218_s0 + $0x80] sm:$0xff]   ;;  %v7642_v27 = vld [vmem:[%s9218_s0 + $0x88] sm:$0xff]   ;;  %v7650_v28 = vld [vmem:[%s9218_s0 + $0x90] sm:$0xff]  }
  0x2f   :  { %5779 = vmatmul.mubr.msk.bf16.vlgmr.msra.gmra.mrb[0].mxu0 %vm294_vm0, %v7032_v6  ;;  %v7658_v29 = vld [vmem:[%s9218_s0 + $0x98] sm:$0xff]   ;;  %v7666_v30 = vld [vmem:[%s9218_s0 + $0xa0] sm:$0xff]   ;;  %v7674_v31 = vld [vmem:[%s9218_s0 + $0xa8] sm:$0xff]  }
  0x30   :  { %1339 = vmatpush1.bf16.msra.mxu0 %v7033_v7  ;;  %762 = vmatprep.mubr.bf16.mxu0 %v9230_v0  ;;  %v7682_v32 = vld [vmem:[%s9218_s0 + $0xb0] sm:$0xff]   ;;  %v7690_v33 = vld [vmem:[%s9218_s0 + $0xb8] sm:$0xff]   ;;  %v7063_v35 = vld [vmem:[%s9219_s1 + $0x60] ss:$8 sps:$4 sm:$0xff]  }
  0x31   :  { %1340 = vmatprep.subr.bf16.mxu0 %v7050_v10  ;;  %v7062_v34 = vld [vmem:[%s9218_s0 + $0x10] sm:$0xff]   ;;  %v7066_v38 = vld [vmem:[%s9218_s0 + $0x18] sm:$0xff]   ;;  %v7067_v39 = vld [vmem:[%s9218_s0 + $0x20] sm:$0xff]  }
  0x32   :  { %v7082_v36 = vld [vmem:[%s9219_s1 + $0x74] ss:$8 sps:$4 sm:$0xff]   ;;  %v7080_v37 = vld [vmem:[%s9219_s1 + $0x70] ss:$8 sps:$4 sm:$0xff]   ;;  %v7068_v40 = vld [vmem:[%s9218_s0 + $0x28] sm:$0xff]  }
  0x33   :  { %v7069_v41 = vld [vmem:[%s9218_s0 + $0x30] sm:$0xff]   ;;  %v7070_v42 = vld [vmem:[%s9218_s0 + $0x38] sm:$0xff]   ;;  %v7071_v43 = vld [vmem:[%s9218_s0 + $0x40] sm:$0xff]  }
  0x34   :  { %1341 = vmatpush1.bf16.msra.mxu0 %v7048_v9  ;;  %v7072_v44 = vld [vmem:[%s9218_s0 + $0x48] sm:$0xff]   ;;  %v7073_v45 = vld [vmem:[%s9218_s0 + $0x50] sm:$0xff]   ;;  %v7074_v46 = vld [vmem:[%s9218_s0 + $0x58] sm:$0xff]  }
  0x35   :  { %2068 = vmatprep.subr.bf16.mxu0 %v7065_v18  ;;  %v7075_v47 = vld [vmem:[%s9218_s0 + $0x60] sm:$0xff]   ;;  %v7076_v48 = vld [vmem:[%s9218_s0 + $0x68] sm:$0xff]   ;;  %v7077_v49 = vld [vmem:[%s9218_s0 + $0x70] sm:$0xff]  }
  0x36   :  { %v7099_v50 = vld [vmem:[%s9219_s1 + $0x84] ss:$8 sps:$4 sm:$0xff]   ;;  %v7078_v51 = vld [vmem:[%s9218_s0 + $0x78] sm:$0xff]   ;;  %v7084_v54 = vld [vmem:[%s9218_s0 + $0x90] sm:$0xff]  }
  0x37   :  { %5780 = vmatmul.mubr.msk.bf16.gmra.mrb[4].mxu0 %vm294_vm0, %v7036_v8  ;;  %v7079_v52 = vld [vmem:[%s9218_s0 + $0x80] sm:$0xff]   ;;  %v7083_v53 = vld [vmem:[%s9218_s0 + $0x88] sm:$0xff]   ;;  %v7085_v55 = vld [vmem:[%s9218_s0 + $0x98] sm:$0xff]  }
  0x38   :  { %772 = vmatprep.mubr.bf16.mxu0 %v9230_v0  ;;  %v7086_v56 = vld [vmem:[%s9218_s0 + $0xa0] sm:$0xff]   ;;  %v7087_v57 = vld [vmem:[%s9218_s0 + $0xa8] sm:$0xff]   ;;  %v7088_v58 = vld [vmem:[%s9218_s0 + $0xb0] sm:$0xff]  }
  0x39   :  { %v7089_v59 = vld [vmem:[%s9218_s0 + $0xb8] sm:$0xff]   ;;  %v7090_v60 = vld [vmem:[%s9218_s0 + $0xc0] sm:$0xff]   ;;  %v7091_v61 = vld [vmem:[%s9218_s0 + $0xc8] sm:$0xff]  }
  0x3a   :  { %v7092_v62 = vld [vmem:[%s9218_s0 + $0xd0] sm:$0xff]   ;;  %v7093_v63 = vld [vmem:[%s9218_s0 + $0xd8] sm:$0xff]   ;;  %v7094_v1 = vld [vmem:[%s9218_s0 + $0xe0] sm:$0xff]  }
  0x3b   :  { %v7095_v2 = vld [vmem:[%s9218_s0 + $0xe8] sm:$0xff]   ;;  %v7096_v3 = vld [vmem:[%s9218_s0 + $0x18] sm:$0xff]   ;;  %v7100_v7 = vld [vmem:[%s9218_s0 + $0x20] sm:$0xff]  }
  0x3c   :  { %v7097_v4 = vld [vmem:[%s9219_s1 + $0x80] ss:$8 sps:$4 sm:$0xff]   ;;  %v7116_v5 = vld [vmem:[%s9219_s1 + $0x94] ss:$8 sps:$4 sm:$0xff]   ;;  %v7114_v6 = vld [vmem:[%s9219_s1 + $0x90] ss:$8 sps:$4 sm:$0xff]  }
  0x3d   :  { %v7101_v8 = vld [vmem:[%s9218_s0 + $0x28] sm:$0xff]   ;;  %v7102_v9 = vld [vmem:[%s9218_s0 + $0x30] sm:$0xff]   ;;  %v7103_v10 = vld [vmem:[%s9218_s0 + $0x38] sm:$0xff]  }
  0x3e   :  { %v7129_v18 = vld [vmem:[%s9219_s1 + $0x34] ss:$8 sps:$4 sm:$0xff]  }
  0x3f   :  { %5781 = vmatmul.mubr.msk.bf16.gmra.mrb[8].mxu0 %vm294_vm0, %v7037_v11  ;;  %v7104_v11 = vld [vmem:[%s9218_s0 + $0x40] sm:$0xff]  }
  0x40   :  { %782 = vmatprep.mubr.bf16.mxu0 %v9230_v0 }
  0x47   :  { %5782 = vmatmul.mubr.msk.bf16.gmra.mrb[12].mxu0 %vm294_vm0, %v7038_v12  ;;  %v7105_v12 = vld [vmem:[%s9218_s0 + $0x48] sm:$0xff]  }
  0x48   :  { %792 = vmatprep.mubr.bf16.mxu0 %v9230_v0 }
  0x4f   :  { %5783 = vmatmul.mubr.msk.bf16.gmra.mrb[16].mxu0 %vm294_vm0, %v7039_v13  ;;  %v7125_v13 = vld [vmem:[%s9219_s1 + $0x24] ss:$8 sps:$4 sm:$0xff]  }
  0x50   :  { %802 = vmatprep.mubr.bf16.mxu0 %v9230_v0  ;;  %379 = vmatprep.subr.bf16.mxu1 %v7125_v13  ;;  %v7174_v13 = vld [vmem:[%s9221_s3 + $0x94] ss:$8 sps:$4 sm:$0xff]  }
  0x57   :  { %5784 = vmatmul.mubr.msk.bf16.gmra.mrb[20].mxu0 %vm294_vm0, %v7040_v14  ;;  %v7106_v14 = vld [vmem:[%s9218_s0 + $0x50] sm:$0xff]  }
  0x58   :  { %812 = vmatprep.mubr.bf16.mxu0 %v9230_v0 }
  0x5f   :  { %5785 = vmatmul.mubr.msk.bf16.gmra.mrb[24].mxu0 %vm294_vm0, %v7041_v15  ;;  %v7128_v15 = vld [vmem:[%s9219_s1 + $0x20] ss:$8 sps:$4 sm:$0xff]  }
  0x60   :  { %822 = vmatprep.mubr.bf16.mxu0 %v9230_v0  ;;  %380 = vmatpush1.bf16.msra.mxu1 %v7128_v15 }
  0x61   :  { %381 = vmatprep.subr.bf16.mxu1 %v7129_v18 }
  0x67   :  { %5786 = vmatmul.mubr.msk.bf16.gmra.mrb[28].mxu0 %vm294_vm0, %v7559_v16 }
  0x68   :  { %832 = vmatprep.mubr.bf16.mxu0 %v9230_v0 }
  0x6f   :  { %5787 = vmatmul.mubr.msk.bf16.gmra.mrb[32].mxu0 %vm294_vm0, %v7567_v17 }
  0x70   :  { %842 = vmatprep.mubr.bf16.mxu0 %v9230_v0 }
  0x77   :  { %5788 = vmatmul.mubr.msk.bf16.gmra.mrb[36].mxu0 %vm294_vm0, %v7578_v19 }
  0x78   :  { %852 = vmatprep.mubr.bf16.mxu0 %v9230_v0 }
  0x7f   :  { %5789 = vmatmul.mubr.msk.bf16.gmra.mrb[40].mxu0 %vm294_vm0, %v7586_v20 }
  0x80   :  { %862 = vmatprep.mubr.bf16.mxu0 %v9230_v0 }
  0x87   :  { %5790 = vmatmul.mubr.msk.bf16.gmra.mrb[44].mxu0 %vm294_vm0, %v7594_v21 }
  0x88   :  { %872 = vmatprep.mubr.bf16.mxu0 %v9230_v0 }
  0x8f   :  { %5791 = vmatmul.mubr.msk.bf16.gmra.mrb[48].mxu0 %vm294_vm0, %v7602_v22 }
  0x90   :  { %882 = vmatprep.mubr.bf16.mxu0 %v9230_v0 }
  0x97   :  { %5792 = vmatmul.mubr.msk.bf16.gmra.mrb[52].mxu0 %vm294_vm0, %v7610_v23 }
  0x98   :  { %892 = vmatprep.mubr.bf16.mxu0 %v9230_v0 }
  0x9f   :  { %5793 = vmatmul.mubr.msk.bf16.gmra.mrb[56].mxu0 %vm294_vm0, %v7618_v24 }
  0xa0   :  { %902 = vmatprep.mubr.bf16.mxu0 %v9230_v0 }
  0xa7   :  { %5794 = vmatmul.mubr.msk.bf16.gmra.mrb[60].mxu0 %vm294_vm0, %v7626_v25 }
  0xa8   :  { %912 = vmatprep.mubr.bf16.mxu0 %v9230_v0 }
  0xaf   :  { %5795 = vmatmul.mubr.msk.bf16.gmra.mrb[64].mxu0 %vm294_vm0, %v7634_v26 }
  0xb0   :  { %922 = vmatprep.mubr.bf16.mxu0 %v9230_v0 }
  0xb7   :  { %5796 = vmatmul.mubr.msk.bf16.gmra.mrb[68].mxu0 %vm294_vm0, %v7642_v27 }
  0xb8   :  { %932 = vmatprep.mubr.bf16.mxu0 %v9230_v0 }
  0xbf   :  { %5797 = vmatmul.mubr.msk.bf16.gmra.mrb[72].mxu0 %vm294_vm0, %v7650_v28 }
  0xc0   :  { %942 = vmatprep.mubr.bf16.mxu0 %v9230_v0 }
  0xc7   :  { %5798 = vmatmul.mubr.msk.bf16.gmra.mrb[76].mxu0 %vm294_vm0, %v7658_v29 }
  0xc8   :  { %952 = vmatprep.mubr.bf16.mxu0 %v9230_v0 }
  0xcf   :  { %5799 = vmatmul.mubr.msk.bf16.gmra.mrb[80].mxu0 %vm294_vm0, %v7666_v30 }
  0xd0   :  { %962 = vmatprep.mubr.bf16.mxu0 %v9230_v0 }
  0xd7   :  { %5800 = vmatmul.mubr.msk.bf16.gmra.mrb[84].mxu0 %vm294_vm0, %v7674_v31 }
  0xd8   :  { %972 = vmatprep.mubr.bf16.mxu0 %v9230_v0 }
  0xdf   :  { %5801 = vmatmul.mubr.msk.bf16.gmra.mrb[88].mxu0 %vm294_vm0, %v7682_v32 }
  0xe0   :  { %982 = vmatprep.mubr.bf16.mxu0 %v9230_v0 }
  0xe7   :  { %5802 = vmatmul.mubr.msk.bf16.gmra.mrb[92].mxu0 %vm294_vm0, %v7690_v33 }
  0xe8   :  { %1370 = vmatprep.mubr.bf16.mxu0 %v9230_v0 }
  0xef   :  { %5843 = vmatmul.mubr.msk.bf16.vlgmr.msra.gmra.mrb[0].mxu0 %vm294_vm0, %v7062_v34  ;;  %v7131_v34 = vld [vmem:[%s9219_s1 + $0x30] ss:$8 sps:$4 sm:$0xff]  }
  0xf0   :  { %2069 = vmatpush1.bf16.msra.mxu0 %v7063_v35  ;;  %1380 = vmatprep.mubr.bf16.mxu0 %v9230_v0  ;;  %v7107_v35 = vld [vmem:[%s9218_s0 + $0x58] sm:$0xff]  }
  0xf1   :  { %2070 = vmatprep.subr.bf16.mxu0 %v7082_v36  ;;  %382 = vmatpush1.bf16.msra.mxu1 %v7131_v34  ;;  %v7345_v36 = vld [vmem:[%s9219_s1 + $0x4] ss:$8 sps:$4 sm:$0xff]  }
  0xf2   :  { %6407 = vmatprep.subr.bf16.mxu1 %v7345_v36  ;;  %v7177_v34 = vld [vmem:[%s9221_s3 + $0xa4] ss:$8 sps:$4 sm:$0xff]   ;;  %v7175_v36 = vld [vmem:[%s9221_s3 + $0xa0] ss:$8 sps:$4 sm:$0xff]  }
  0xf4   :  { %2071 = vmatpush1.bf16.msra.mxu0 %v7080_v37  ;;  %v7346_v37 = vld [vmem:[%s9218_s0 + $0x8] sm:$0xff]  }
  0xf5   :  { %2798 = vmatprep.subr.bf16.mxu0 %v7099_v50  ;;  %5746 = vmatmul.mubr.msk.bf16.vlgmr.msra.gmra.mrb[0].mxu1 %vm294_vm0, %v7346_v37  ;;  %v7354_v50 = vld [vmem:[%s9218_s0 + $0x30] sm:$0xff]  }
  0xf6   :  { %421 = vmatprep.mubr.bf16.mxu1 %v9230_v0 }
  0xf7   :  { %5844 = vmatmul.mubr.msk.bf16.gmra.mrb[4].mxu0 %vm294_vm0, %v7066_v38  ;;  %v7347_v38 = vld [vmem:[%s9219_s1] ss:$8 sps:$4 sm:$0xff]  }
  0xf8   :  { %1390 = vmatprep.mubr.bf16.mxu0 %v9230_v0  ;;  %6409 = vmatpush1.bf16.msra.mxu1 %v7347_v38  ;;  %v7149_v38 = vld [vmem:[%s9218_s0 + $0x88] sm:$0xff]  }
  0xff   :  { %5845 = vmatmul.mubr.msk.bf16.gmra.mrb[8].mxu0 %vm294_vm0, %v7067_v39  ;;  %v7348_v39 = vld [vmem:[%s9219_s1 + $0x14] ss:$8 sps:$4 sm:$0xff]  }
 0x100   :  { %1400 = vmatprep.mubr.bf16.mxu0 %v9230_v0  ;;  %6408 = vmatprep.subr.bf16.mxu1 %v7348_v39  ;;  %v7180_v39 = vld [vmem:[%s9221_s3 + $0xb4] ss:$8 sps:$4 sm:$0xff]  }
 0x107   :  { %5846 = vmatmul.mubr.msk.bf16.gmra.mrb[12].mxu0 %vm294_vm0, %v7068_v40  ;;  %v7108_v40 = vld [vmem:[%s9218_s0 + $0x60] sm:$0xff]  }
 0x108   :  { %1410 = vmatprep.mubr.bf16.mxu0 %v9230_v0 }
 0x10f   :  { %5847 = vmatmul.mubr.msk.bf16.gmra.mrb[16].mxu0 %vm294_vm0, %v7069_v41  ;;  %v7349_v41 = vld [vmem:[%s9219_s1 + $0x10] ss:$8 sps:$4 sm:$0xff]  }
 0x110   :  { %1420 = vmatprep.mubr.bf16.mxu0 %v9230_v0  ;;  %6410 = vmatpush1.bf16.msra.mxu1 %v7349_v41 }
 0x117   :  { %5848 = vmatmul.mubr.msk.bf16.gmra.mrb[20].mxu0 %vm294_vm0, %v7070_v42  ;;  %v7350_v42 = vld [vmem:[%s9218_s0 + $0x10] sm:$0xff]  }
 0x118   :  { %1430 = vmatprep.mubr.bf16.mxu0 %v9230_v0  ;;  %5747 = vmatmul.mubr.msk.bf16.gmra.mrb[4].mxu1 %vm294_vm0, %v7350_v42 }
 0x119   :  { %431 = vmatprep.mubr.bf16.mxu1 %v9230_v0 }
 0x11f   :  { %5849 = vmatmul.mubr.msk.bf16.gmra.mrb[24].mxu0 %vm294_vm0, %v7071_v43  ;;  %v7109_v43 = vld [vmem:[%s9218_s0 + $0x68] sm:$0xff]  }
 0x120   :  { %1440 = vmatprep.mubr.bf16.mxu0 %v9230_v0 }
 0x127   :  { %5850 = vmatmul.mubr.msk.bf16.gmra.mrb[28].mxu0 %vm294_vm0, %v7072_v44  ;;  %v7351_v44 = vld [vmem:[%s9218_s0 + $0x18] sm:$0xff]  }
 0x128   :  { %1450 = vmatprep.mubr.bf16.mxu0 %v9230_v0  ;;  %5748 = vmatmul.mubr.msk.bf16.gmra.mrb[8].mxu1 %vm294_vm0, %v7351_v44 }
 0x129   :  { %441 = vmatprep.mubr.bf16.mxu1 %v9230_v0 }
 0x12f   :  { %5851 = vmatmul.mubr.msk.bf16.gmra.mrb[32].mxu0 %vm294_vm0, %v7073_v45  ;;  %v7110_v45 = vld [vmem:[%s9218_s0 + $0x70] sm:$0xff]  }
 0x130   :  { %1460 = vmatprep.mubr.bf16.mxu0 %v9230_v0 }
 0x137   :  { %5852 = vmatmul.mubr.msk.bf16.gmra.mrb[36].mxu0 %vm294_vm0, %v7074_v46  ;;  %v7352_v46 = vld [vmem:[%s9218_s0 + $0x20] sm:$0xff]  }
 0x138   :  { %1470 = vmatprep.mubr.bf16.mxu0 %v9230_v0  ;;  %5749 = vmatmul.mubr.msk.bf16.gmra.mrb[12].mxu1 %vm294_vm0, %v7352_v46 }
 0x139   :  { %451 = vmatprep.mubr.bf16.mxu1 %v9230_v0 }
 0x13f   :  { %5853 = vmatmul.mubr.msk.bf16.gmra.mrb[40].mxu0 %vm294_vm0, %v7075_v47  ;;  %v7111_v47 = vld [vmem:[%s9218_s0 + $0x78] sm:$0xff]  }
 0x140   :  { %1480 = vmatprep.mubr.bf16.mxu0 %v9230_v0 }
 0x147   :  { %5854 = vmatmul.mubr.msk.bf16.gmra.mrb[44].mxu0 %vm294_vm0, %v7076_v48  ;;  %v7353_v48 = vld [vmem:[%s9218_s0 + $0x28] sm:$0xff]  }
 0x148   :  { %1490 = vmatprep.mubr.bf16.mxu0 %v9230_v0  ;;  %5750 = vmatmul.mubr.msk.bf16.gmra.mrb[16].mxu1 %vm294_vm0, %v7353_v48  ;;  %v7186_v48 = vld [vmem:[%s9221_s3 + $0xd4] ss:$8 sps:$4 sm:$0xff]  }
 0x149   :  { %461 = vmatprep.mubr.bf16.mxu1 %v9230_v0 }
 0x14f   :  { %5855 = vmatmul.mubr.msk.bf16.gmra.mrb[48].mxu0 %vm294_vm0, %v7077_v49  ;;  %v7112_v49 = vld [vmem:[%s9218_s0 + $0x80] sm:$0xff]  }
 0x150   :  { %1500 = vmatprep.mubr.bf16.mxu0 %v9230_v0  ;;  %5751 = vmatmul.mubr.msk.bf16.gmra.mrb[20].mxu1 %vm294_vm0, %v7354_v50 }
 0x151   :  { %471 = vmatprep.mubr.bf16.mxu1 %v9230_v0 }
 0x157   :  { %5856 = vmatmul.mubr.msk.bf16.gmra.mrb[52].mxu0 %vm294_vm0, %v7078_v51  ;;  %v7113_v51 = vld [vmem:[%s9218_s0 + $0x88] sm:$0xff]  }
 0x158   :  { %1510 = vmatprep.mubr.bf16.mxu0 %v9230_v0  ;;  %5752 = vmatmul.mubr.msk.bf16.gmra.mrb[24].mxu1 %vm294_vm0, %v7559_v16  ;;  %v7118_v16 = vld [vmem:[%s9218_s0 + $0x98] sm:$0xff]  }
 0x159   :  { %481 = vmatprep.mubr.bf16.mxu1 %v9230_v0 }
 0x15f   :  { %5857 = vmatmul.mubr.msk.bf16.gmra.mrb[56].mxu0 %vm294_vm0, %v7079_v52  ;;  %v7117_v52 = vld [vmem:[%s9218_s0 + $0x90] sm:$0xff]  }
 0x160   :  { %1520 = vmatprep.mubr.bf16.mxu0 %v9230_v0  ;;  %5753 = vmatmul.mubr.msk.bf16.gmra.mrb[28].mxu1 %vm294_vm0, %v7567_v17  ;;  %v7119_v17 = vld [vmem:[%s9218_s0 + $0xa0] sm:$0xff]  }
 0x161   :  { %491 = vmatprep.mubr.bf16.mxu1 %v9230_v0 }
 0x167   :  { %5858 = vmatmul.mubr.msk.bf16.gmra.mrb[60].mxu0 %vm294_vm0, %v7083_v53  ;;  %v7155_v53 = vld [vmem:[%s9218_s0 + $0xc0] sm:$0xff]  }
 0x168   :  { %1530 = vmatprep.mubr.bf16.mxu0 %v9230_v0  ;;  %5754 = vmatmul.mubr.msk.bf16.gmra.mrb[32].mxu1 %vm294_vm0, %v7578_v19  ;;  %v7120_v19 = vld [vmem:[%s9218_s0 + $0xa8] sm:$0xff]  }
 0x169   :  { %501 = vmatprep.mubr.bf16.mxu1 %v9230_v0 }
 0x16f   :  { %5859 = vmatmul.mubr.msk.bf16.gmra.mrb[64].mxu0 %vm294_vm0, %v7084_v54  ;;  %v7157_v54 = vld [vmem:[%s9218_s0 + $0xc8] sm:$0xff]  }
 0x170   :  { %1540 = vmatprep.mubr.bf16.mxu0 %v9230_v0  ;;  %5755 = vmatmul.mubr.msk.bf16.gmra.mrb[36].mxu1 %vm294_vm0, %v7586_v20  ;;  %v7121_v20 = vld [vmem:[%s9218_s0 + $0xb0] sm:$0xff]  }
 0x171   :  { %511 = vmatprep.mubr.bf16.mxu1 %v9230_v0 }
 0x177   :  { %5860 = vmatmul.mubr.msk.bf16.gmra.mrb[68].mxu0 %vm294_vm0, %v7085_v55  ;;  %v7141_v55 = vld [vmem:[%s9218_s0 + $0x48] sm:$0xff]  }
 0x178   :  { %1550 = vmatprep.mubr.bf16.mxu0 %v9230_v0  ;;  %5756 = vmatmul.mubr.msk.bf16.gmra.mrb[40].mxu1 %vm294_vm0, %v7594_v21  ;;  %v7122_v21 = vld [vmem:[%s9218_s0 + $0xb8] sm:$0xff]  }
 0x179   :  { %521 = vmatprep.mubr.bf16.mxu1 %v9230_v0 }
 0x17f   :  { %5861 = vmatmul.mubr.msk.bf16.gmra.mrb[72].mxu0 %vm294_vm0, %v7086_v56  ;;  %v7159_v56 = vld [vmem:[%s9218_s0 + $0xd0] sm:$0xff]  }
 0x180   :  { %1560 = vmatprep.mubr.bf16.mxu0 %v9230_v0  ;;  %5757 = vmatmul.mubr.msk.bf16.gmra.mrb[44].mxu1 %vm294_vm0, %v7602_v22  ;;  %v7123_v22 = vld [vmem:[%s9218_s0 + $0xc0] sm:$0xff]  }
 0x181   :  { %531 = vmatprep.mubr.bf16.mxu1 %v9230_v0 }
 0x187   :  { %5862 = vmatmul.mubr.msk.bf16.gmra.mrb[76].mxu0 %vm294_vm0, %v7087_v57  ;;  %v7142_v57 = vld [vmem:[%s9218_s0 + $0x50] sm:$0xff]  }
 0x188   :  { %1570 = vmatprep.mubr.bf16.mxu0 %v9230_v0  ;;  %5758 = vmatmul.mubr.msk.bf16.gmra.mrb[48].mxu1 %vm294_vm0, %v7610_v23  ;;  %v7124_v23 = vld [vmem:[%s9218_s0 + $0xc8] sm:$0xff]  }
 0x189   :  { %541 = vmatprep.mubr.bf16.mxu1 %v9230_v0 }
 0x18f   :  { %5863 = vmatmul.mubr.msk.bf16.gmra.mrb[80].mxu0 %vm294_vm0, %v7088_v58  ;;  %v7161_v58 = vld [vmem:[%s9218_s0 + $0xd8] sm:$0xff]  }
 0x190   :  { %1580 = vmatprep.mubr.bf16.mxu0 %v9230_v0  ;;  %5759 = vmatmul.mubr.msk.bf16.gmra.mrb[52].mxu1 %vm294_vm0, %v7618_v24  ;;  %v7127_v24 = vld [vmem:[%s9218_s0 + $0xd0] sm:$0xff]  }
 0x191   :  { %551 = vmatprep.mubr.bf16.mxu1 %v9230_v0 }
 0x197   :  { %5864 = vmatmul.mubr.msk.bf16.gmra.mrb[84].mxu0 %vm294_vm0, %v7089_v59  ;;  %v7143_v59 = vld [vmem:[%s9218_s0 + $0x58] sm:$0xff]  }
 0x198   :  { %1590 = vmatprep.mubr.bf16.mxu0 %v9230_v0  ;;  %5760 = vmatmul.mubr.msk.bf16.gmra.mrb[56].mxu1 %vm294_vm0, %v7626_v25  ;;  %v7132_v25 = vld [vmem:[%s9218_s0 + $0xd8] sm:$0xff]  }
 0x199   :  { %561 = vmatprep.mubr.bf16.mxu1 %v9230_v0 }
 0x19f   :  { %5865 = vmatmul.mubr.msk.bf16.gmra.mrb[88].mxu0 %vm294_vm0, %v7090_v60  ;;  %v7163_v60 = vld [vmem:[%s9218_s0 + $0xe0] sm:$0xff]  }
 0x1a0   :  { %1600 = vmatprep.mubr.bf16.mxu0 %v9230_v0  ;;  %5761 = vmatmul.mubr.msk.bf16.gmra.mrb[60].mxu1 %vm294_vm0, %v7634_v26  ;;  %v7133_v26 = vld [vmem:[%s9218_s0 + $0xe0] sm:$0xff]  }
 0x1a1   :  { %571 = vmatprep.mubr.bf16.mxu1 %v9230_v0 }
 0x1a7   :  { %5866 = vmatmul.mubr.msk.bf16.gmra.mrb[92].mxu0 %vm294_vm0, %v7091_v61  ;;  %v7144_v61 = vld [vmem:[%s9218_s0 + $0x60] sm:$0xff]  }
 0x1a8   :  { %1610 = vmatprep.mubr.bf16.mxu0 %v9230_v0  ;;  %5762 = vmatmul.mubr.msk.bf16.gmra.mrb[64].mxu1 %vm294_vm0, %v7642_v27  ;;  %v7134_v27 = vld [vmem:[%s9218_s0 + $0xe8] sm:$0xff]  }
 0x1a9   :  { %581 = vmatprep.mubr.bf16.mxu1 %v9230_v0 }
 0x1af   :  { %5867 = vmatmul.mubr.msk.bf16.gmra.mrb[96].mxu0 %vm294_vm0, %v7092_v62  ;;  %v7145_v62 = vld [vmem:[%s9218_s0 + $0x68] sm:$0xff]  }
 0x1b0   :  { %1620 = vmatprep.mubr.bf16.mxu0 %v9230_v0  ;;  %5763 = vmatmul.mubr.msk.bf16.gmra.mrb[68].mxu1 %vm294_vm0, %v7650_v28  ;;  %v7135_v28 = vld [vmem:[%s9218_s0 + $0xf0] sm:$0xff]  }
 0x1b1   :  { %591 = vmatprep.mubr.bf16.mxu1 %v9230_v0 }
 0x1b7   :  { %5868 = vmatmul.mubr.msk.bf16.gmra.mrb[100].mxu0 %vm294_vm0, %v7093_v63  ;;  %v7146_v63 = vld [vmem:[%s9218_s0 + $0x70] sm:$0xff]  }
 0x1b8   :  { %1630 = vmatprep.mubr.bf16.mxu0 %v9230_v0  ;;  %5764 = vmatmul.mubr.msk.bf16.gmra.mrb[72].mxu1 %vm294_vm0, %v7658_v29  ;;  %v7136_v29 = vld [vmem:[%s9218_s0 + $0x20] sm:$0xff]  }
 0x1b9   :  { %601 = vmatprep.mubr.bf16.mxu1 %v9230_v0 }
 0x1bf   :  { %5869 = vmatmul.mubr.msk.bf16.gmra.mrb[104].mxu0 %vm294_vm0, %v7094_v1 }
 0x1c0   :  { %1640 = vmatprep.mubr.bf16.mxu0 %v9230_v0  ;;  %5765 = vmatmul.mubr.msk.bf16.gmra.mrb[76].mxu1 %vm294_vm0, %v7666_v30  ;;  %v7137_v30 = vld [vmem:[%s9218_s0 + $0x28] sm:$0xff]  }
 0x1c1   :  { %611 = vmatprep.mubr.bf16.mxu1 %v9230_v0 }
 0x1c7   :  { %5870 = vmatmul.mubr.msk.bf16.gmra.mrb[108].mxu0 %vm294_vm0, %v7095_v2 }
 0x1c8   :  { %2100 = vmatprep.mubr.bf16.mxu0 %v9230_v0  ;;  %5766 = vmatmul.mubr.msk.bf16.gmra.mrb[80].mxu1 %vm294_vm0, %v7674_v31  ;;  %v7138_v31 = vld [vmem:[%s9218_s0 + $0x30] sm:$0xff]   ;;  %v8185_v1 = vpop.f32.mrb[0].mxu1 }
 0x1c9   :  { %621 = vmatprep.mubr.bf16.mxu1 %v9230_v0  ;;  %v8188_v2 = vpop.f32.mrb[1].mxu1 }
 0x1cf   :  { %5907 = vmatmul.mubr.msk.bf16.vlgmr.msra.gmra.mrb[0].mxu0 %vm294_vm0, %v7096_v3  ;;  %v8191_v3 = vpop.f32.mrb[2].mxu1 }
 0x1d0   :  { %2799 = vmatpush1.bf16.msra.mxu0 %v7097_v4  ;;  %2110 = vmatprep.mubr.bf16.mxu0 %v9230_v0  ;;  %v8193_v4 = vpop.f32.mrb[3].mxu1 }
 0x1d1   :  { %2800 = vmatprep.subr.bf16.mxu0 %v7116_v5  ;;  %5767 = vmatmul.mubr.msk.bf16.gmra.mrb[84].mxu1 %vm294_vm0, %v7682_v32  ;;  %v7139_v32 = vld [vmem:[%s9218_s0 + $0x38] sm:$0xff]  }
 0x1d2   :  { %631 = vmatprep.mubr.bf16.mxu1 %v9230_v0  ;;  %v7147_v5 = vld [vmem:[%s9218_s0 + $0x78] sm:$0xff]  }
 0x1d4   :  { %2801 = vmatpush1.bf16.msra.mxu0 %v7114_v6 }
 0x1d7   :  { %5908 = vmatmul.mubr.msk.bf16.gmra.mrb[4].mxu0 %vm294_vm0, %v7100_v7 }
 0x1d8   :  { %2120 = vmatprep.mubr.bf16.mxu0 %v9230_v0 }
 0x1d9   :  { %5768 = vmatmul.mubr.msk.bf16.gmra.mrb[88].mxu1 %vm294_vm0, %v7690_v33  ;;  %v7140_v33 = vld [vmem:[%s9218_s0 + $0x40] sm:$0xff]  }
 0x1da   :  { %641 = vmatprep.mubr.bf16.mxu1 %v9230_v0 }
 0x1df   :  { %5909 = vmatmul.mubr.msk.bf16.gmra.mrb[8].mxu0 %vm294_vm0, %v7101_v8  ;;  %v7171_v8 = vld [vmem:[%s9221_s3 + $0x84] ss:$8 sps:$4 sm:$0xff]  }
 0x1e0   :  { %2130 = vmatprep.mubr.bf16.mxu0 %v9230_v0  ;;  %3600 = vmatprep.subr.bf16.mxu1 %v7171_v8 }
 0x1e1   :  { %5769 = vmatmul.mubr.msk.bf16.gmra.mrb[92].mxu1 %vm294_vm0, %v7155_v53 }
 0x1e2   :  { %651 = vmatprep.mubr.bf16.mxu1 %v9230_v0 }
 0x1e7   :  { %5910 = vmatmul.mubr.msk.bf16.gmra.mrb[12].mxu0 %vm294_vm0, %v7102_v9 }
 0x1e8   :  { %2140 = vmatprep.mubr.bf16.mxu0 %v9230_v0 }
 0x1e9   :  { %5770 = vmatmul.mubr.msk.bf16.gmra.mrb[96].mxu1 %vm294_vm0, %v7157_v54 }
 0x1ea   :  { %661 = vmatprep.mubr.bf16.mxu1 %v9230_v0 }
 0x1eb   :  { %v8200_v6 = vpop.f32.mrb[4].mxu1 }
 0x1ec   :  { %v8203_v7 = vpop.f32.mrb[5].mxu1 }
 0x1ed   :  { %v8209_v9 = vpop.f32.mrb[6].mxu1 }
 0x1ef   :  { %5911 = vmatmul.mubr.msk.bf16.gmra.mrb[16].mxu0 %vm294_vm0, %v7103_v10  ;;  %v7169_v10 = vld [vmem:[%s9221_s3 + $0x80] ss:$8 sps:$4 sm:$0xff]  }
 0x1f0   :  { %2150 = vmatprep.mubr.bf16.mxu0 %v9230_v0 }
 0x1f1   :  { %5771 = vmatmul.mubr.msk.bf16.gmra.mrb[100].mxu1 %vm294_vm0, %v7159_v56 }
 0x1f2   :  { %671 = vmatprep.mubr.bf16.mxu1 %v9230_v0 }
 0x1f7   :  { %5912 = vmatmul.mubr.msk.bf16.gmra.mrb[20].mxu0 %vm294_vm0, %v7104_v11  ;;  %v8214_v11 = vpop.f32.mrb[7].mxu1 }
 0x1f8   :  { %2160 = vmatprep.mubr.bf16.mxu0 %v9230_v0 }
 0x1f9   :  { %5772 = vmatmul.mubr.msk.bf16.gmra.mrb[104].mxu1 %vm294_vm0, %v7161_v58 }
 0x1fa   :  { %681 = vmatprep.mubr.bf16.mxu1 %v9230_v0 }
 0x1fb   :  { %v8226_v15 = vpop.f32.mrb[8].mxu1 }
 0x1fc   :  { %v8229_v18 = vpop.f32.mrb[9].mxu1 }
 0x1ff   :  { %5913 = vmatmul.mubr.msk.bf16.gmra.mrb[24].mxu0 %vm294_vm0, %v7105_v12  ;;  %v7148_v12 = vld [vmem:[%s9218_s0 + $0x80] sm:$0xff]  }
 0x200   :  { %2170 = vmatprep.mubr.bf16.mxu0 %v9230_v0 }
 0x201   :  { %5773 = vmatmul.mubr.msk.bf16.gmra.mrb[108].mxu1 %vm294_vm0, %v7163_v60 }
 0x202   :  { %992 = vmatprep.mubr.bf16.mxu1 %v9230_v0 }
 0x207   :  { %5914 = vmatmul.mubr.msk.bf16.gmra.mrb[28].mxu0 %vm294_vm0, %v7106_v14  ;;  %v7172_v14 = vld [vmem:[%s9221_s3 + $0x90] ss:$8 sps:$4 sm:$0xff]  }
 0x208   :  { %2180 = vmatprep.mubr.bf16.mxu0 %v9230_v0 }
 0x209   :  { %5803 = vmatmul.mubr.msk.bf16.vlgmr.msra.gmra.mrb[96].mxu1 %vm294_vm0, %v7155_v53 }
 0x20a   :  { %1002 = vmatprep.mubr.bf16.mxu1 %v9230_v0  ;;  %3601 = vmatpush1.bf16.msra.mxu1 %v7169_v10  ;;  %v7158_v10 = vld [vmem:[%s9218_s0 + $0xc0] sm:$0xff]  }
 0x20b   :  { %3602 = vmatprep.subr.bf16.mxu1 %v7174_v13 }
 0x20e   :  { %3603 = vmatpush1.bf16.msra.mxu1 %v7172_v14 }
 0x20f   :  { %5915 = vmatmul.mubr.msk.bf16.gmra.mrb[32].mxu0 %vm294_vm0, %v7107_v35  ;;  %v8234_v35 = vpop.f32.mrb[10].mxu1  ;;  %3604 = vmatprep.subr.bf16.mxu1 %v7177_v34 }
 0x210   :  { %2190 = vmatprep.mubr.bf16.mxu0 %v9230_v0  ;;  %v8239_v37 = vpop.f32.mrb[11].mxu1 }
 0x211   :  { %5804 = vmatmul.mubr.msk.bf16.gmra.mrb[100].mxu1 %vm294_vm0, %v7157_v54  ;;  %v8251_v41 = vpop.f32.mrb[12].mxu1 }
 0x212   :  { %1012 = vmatprep.mubr.bf16.mxu1 %v9230_v0  ;;  %3605 = vmatpush1.bf16.msra.mxu1 %v7175_v36  ;;  %v8254_v42 = vpop.f32.mrb[13].mxu1  ;;  %v7160_v36 = vld [vmem:[%s9218_s0 + $0xc8] sm:$0xff]  }
 0x213   :  { %3606 = vmatprep.subr.bf16.mxu1 %v7180_v39  ;;  %v8259_v44 = vpop.f32.mrb[14].mxu1 }
 0x214   :  { %v8264_v46 = vpop.f32.mrb[15].mxu1 }
 0x217   :  { %5916 = vmatmul.mubr.msk.bf16.gmra.mrb[36].mxu0 %vm294_vm0, %v7108_v40  ;;  %v7178_v40 = vld [vmem:[%s9221_s3 + $0xb0] ss:$8 sps:$4 sm:$0xff]  }
 0x218   :  { %2200 = vmatprep.mubr.bf16.mxu0 %v9230_v0  ;;  %3607 = vmatpush1.bf16.msra.mxu1 %v7178_v40 }
 0x219   :  { %5805 = vmatmul.mubr.msk.bf16.gmra.mrb[104].mxu1 %vm294_vm0, %v7159_v56  ;;  %v7154_v56 = vld [vmem:[%s9218_s0 + $0xb0] sm:$0xff]  }
 0x21a   :  { %1022 = vmatprep.mubr.bf16.mxu1 %v9230_v0 }
 0x21b   :  { %v8276_v50 = vpop.f32.mrb[16].mxu1 }
 0x21f   :  { %5917 = vmatmul.mubr.msk.bf16.gmra.mrb[40].mxu0 %vm294_vm0, %v7109_v43  ;;  %v7183_v43 = vld [vmem:[%s9221_s3 + $0xc4] ss:$8 sps:$4 sm:$0xff]  }
 0x220   :  { %2210 = vmatprep.mubr.bf16.mxu0 %v9230_v0  ;;  %3608 = vmatprep.subr.bf16.mxu1 %v7183_v43 }
 0x221   :  { %5806 = vmatmul.mubr.msk.bf16.gmra.mrb[108].mxu1 %vm294_vm0, %v7161_v58 }
 0x222   :  { %3632 = vmatprep.mubr.bf16.mxu1 %v9230_v0 }
 0x227   :  { %5918 = vmatmul.mubr.msk.bf16.gmra.mrb[44].mxu0 %vm294_vm0, %v7110_v45  ;;  %v7181_v45 = vld [vmem:[%s9221_s3 + $0xc0] ss:$8 sps:$4 sm:$0xff]  }
 0x228   :  { %2220 = vmatprep.mubr.bf16.mxu0 %v9230_v0  ;;  %3609 = vmatpush1.bf16.msra.mxu1 %v7181_v45  ;;  %v7162_v45 = vld [vmem:[%s9218_s0 + $0xd0] sm:$0xff]  }
 0x229   :  { %3610 = vmatprep.subr.bf16.mxu1 %v7186_v48 }
 0x22f   :  { %5919 = vmatmul.mubr.msk.bf16.gmra.mrb[48].mxu0 %vm294_vm0, %v7111_v47  ;;  %v7150_v47 = vld [vmem:[%s9218_s0 + $0x90] sm:$0xff]  }
 0x230   :  { %2230 = vmatprep.mubr.bf16.mxu0 %v9230_v0 }
 0x237   :  { %5920 = vmatmul.mubr.msk.bf16.gmra.mrb[52].mxu0 %vm294_vm0, %v7112_v49  ;;  %v7184_v49 = vld [vmem:[%s9221_s3 + $0xd0] ss:$8 sps:$4 sm:$0xff]  }
 0x238   :  { %2240 = vmatprep.mubr.bf16.mxu0 %v9230_v0  ;;  %3611 = vmatpush1.bf16.msra.mxu1 %v7184_v49 }
 0x23f   :  { %5921 = vmatmul.mubr.msk.bf16.gmra.mrb[56].mxu0 %vm294_vm0, %v7113_v51  ;;  %v8279_v51 = vpop.f32.mrb[17].mxu1 }
 0x240   :  { %2250 = vmatprep.mubr.bf16.mxu0 %v9230_v0 }
 0x247   :  { %5922 = vmatmul.mubr.msk.bf16.gmra.mrb[60].mxu0 %vm294_vm0, %v7117_v52  ;;  %v7189_v52 = vld [vmem:[%s9221_s3 + $0xe4] ss:$8 sps:$4 sm:$0xff]  }
 0x248   :  { %2260 = vmatprep.mubr.bf16.mxu0 %v9230_v0  ;;  %3612 = vmatprep.subr.bf16.mxu1 %v7189_v52 }
 0x24f   :  { %5923 = vmatmul.mubr.msk.bf16.gmra.mrb[64].mxu0 %vm294_vm0, %v7118_v16  ;;  %v8284_v16 = vpop.f32.mrb[18].mxu1 }
 0x250   :  { %2270 = vmatprep.mubr.bf16.mxu0 %v9230_v0 }
 0x257   :  { %5924 = vmatmul.mubr.msk.bf16.gmra.mrb[68].mxu0 %vm294_vm0, %v7119_v17  ;;  %v7187_v17 = vld [vmem:[%s9221_s3 + $0xe0] ss:$8 sps:$4 sm:$0xff]  }
 0x258   :  { %2280 = vmatprep.mubr.bf16.mxu0 %v9230_v0  ;;  %3613 = vmatpush1.bf16.msra.mxu1 %v7187_v17  ;;  %v7164_v17 = vld [vmem:[%s9218_s0 + $0xd8] sm:$0xff]  }
 0x25f   :  { %5925 = vmatmul.mubr.msk.bf16.gmra.mrb[72].mxu0 %vm294_vm0, %v7120_v19  ;;  %v8289_v19 = vpop.f32.mrb[19].mxu1 }
 0x260   :  { %2290 = vmatprep.mubr.bf16.mxu0 %v9230_v0 }
 0x267   :  { %5926 = vmatmul.mubr.msk.bf16.gmra.mrb[76].mxu0 %vm294_vm0, %v7121_v20  ;;  %v7151_v20 = vld [vmem:[%s9218_s0 + $0x98] sm:$0xff]  }
 0x268   :  { %2300 = vmatprep.mubr.bf16.mxu0 %v9230_v0 }
 0x26f   :  { %5927 = vmatmul.mubr.msk.bf16.gmra.mrb[80].mxu0 %vm294_vm0, %v7122_v21  ;;  %v7192_v21 = vld [vmem:[%s9221_s3 + $0xf4] ss:$8 sps:$4 sm:$0xff]  }
 0x270   :  { %2310 = vmatprep.mubr.bf16.mxu0 %v9230_v0  ;;  %3614 = vmatprep.subr.bf16.mxu1 %v7192_v21 }
 0x277   :  { %5928 = vmatmul.mubr.msk.bf16.gmra.mrb[84].mxu0 %vm294_vm0, %v7123_v22  ;;  %v7190_v22 = vld [vmem:[%s9221_s3 + $0xf0] ss:$8 sps:$4 sm:$0xff]  }
 0x278   :  { %2320 = vmatprep.mubr.bf16.mxu0 %v9230_v0  ;;  %3615 = vmatpush1.bf16.msra.mxu1 %v7190_v22 }
 0x27f   :  { %5929 = vmatmul.mubr.msk.bf16.gmra.mrb[88].mxu0 %vm294_vm0, %v7124_v23  ;;  %v8301_v23 = vpop.f32.mrb[20].mxu1 }
 0x280   :  { %2330 = vmatprep.mubr.bf16.mxu0 %v9230_v0 }
 0x287   :  { %5930 = vmatmul.mubr.msk.bf16.gmra.mrb[92].mxu0 %vm294_vm0, %v7127_v24  ;;  %v8304_v24 = vpop.f32.mrb[21].mxu1 }
 0x288   :  { %2340 = vmatprep.mubr.bf16.mxu0 %v9230_v0 }
 0x28f   :  { %5931 = vmatmul.mubr.msk.bf16.gmra.mrb[96].mxu0 %vm294_vm0, %v7132_v25  ;;  %v8306_v25 = vpop.f32.mrb[22].mxu1 }
 0x290   :  { %2350 = vmatprep.mubr.bf16.mxu0 %v9230_v0 }
 0x297   :  { %5932 = vmatmul.mubr.msk.bf16.gmra.mrb[100].mxu0 %vm294_vm0, %v7133_v26  ;;  %v8308_v26 = vpop.f32.mrb[23].mxu1 }
 0x298   :  { %2360 = vmatprep.mubr.bf16.mxu0 %v9230_v0 }
 0x29f   :  { %5933 = vmatmul.mubr.msk.bf16.gmra.mrb[104].mxu0 %vm294_vm0, %v7134_v27  ;;  %v7152_v27 = vld [vmem:[%s9218_s0 + $0xa0] sm:$0xff]  }
 0x2a0   :  { %2370 = vmatprep.mubr.bf16.mxu0 %v9230_v0 }
 0x2a7   :  { %5934 = vmatmul.mubr.msk.bf16.gmra.mrb[108].mxu0 %vm294_vm0, %v7135_v28  ;;  %v8314_v28 = vpop.f32.mrb[24].mxu1 }
 0x2a8   :  { %2830 = vmatprep.mubr.bf16.mxu0 %v9230_v0 }
 0x2af   :  { %5971 = vmatmul.mubr.msk.bf16.vlgmr.msra.gmra.mrb[0].mxu0 %vm294_vm0, %v7136_v29  ;;  %v8317_v29 = vpop.f32.mrb[25].mxu1 }
 0x2b0   :  { %2840 = vmatprep.mubr.bf16.mxu0 %v9230_v0 }
 0x2b7   :  { %5972 = vmatmul.mubr.msk.bf16.gmra.mrb[4].mxu0 %vm294_vm0, %v7137_v30  ;;  %v8319_v30 = vpop.f32.mrb[26].mxu1 }
 0x2b8   :  { %2850 = vmatprep.mubr.bf16.mxu0 %v9230_v0 }
 0x2bf   :  { %5973 = vmatmul.mubr.msk.bf16.gmra.mrb[8].mxu0 %vm294_vm0, %v7138_v31  ;;  %v8321_v31 = vpop.f32.mrb[27].mxu1 }
 0x2c0   :  { %2860 = vmatprep.mubr.bf16.mxu0 %v9230_v0  ;;  %v8327_v53 = vpop.f32.mrb[28].mxu1 }
 0x2c7   :  { %5974 = vmatmul.mubr.msk.bf16.gmra.mrb[12].mxu0 %vm294_vm0, %v7139_v32  ;;  %v7153_v32 = vld [vmem:[%s9218_s0 + $0xa8] sm:$0xff]  }
 0x2c8   :  { %2870 = vmatprep.mubr.bf16.mxu0 %v9230_v0 }
 0x2cf   :  { %5975 = vmatmul.mubr.msk.bf16.gmra.mrb[16].mxu0 %vm294_vm0, %v7140_v33  ;;  %v8330_v33 = vpop.f32.mrb[29].mxu1 }
 0x2d0   :  { %2880 = vmatprep.mubr.bf16.mxu0 %v9230_v0  ;;  %v8332_v54 = vpop.f32.mrb[30].mxu1 }
 0x2d7   :  { %5976 = vmatmul.mubr.msk.bf16.gmra.mrb[20].mxu0 %vm294_vm0, %v7141_v55  ;;  %v8334_v55 = vpop.f32.mrb[31].mxu1 }
 0x2d8   :  { %2890 = vmatprep.mubr.bf16.mxu0 %v9230_v0 }
 0x2df   :  { %5977 = vmatmul.mubr.msk.bf16.gmra.mrb[24].mxu0 %vm294_vm0, %v7142_v57  ;;  %v8340_v57 = vpop.f32.mrb[32].mxu1 }
 0x2e0   :  { %2900 = vmatprep.mubr.bf16.mxu0 %v9230_v0  ;;  %v8343_v58 = vpop.f32.mrb[33].mxu1 }
 0x2e7   :  { %5978 = vmatmul.mubr.msk.bf16.gmra.mrb[28].mxu0 %vm294_vm0, %v7143_v59  ;;  %v8345_v59 = vpop.f32.mrb[34].mxu1 }
 0x2e8   :  { %2910 = vmatprep.mubr.bf16.mxu0 %v9230_v0  ;;  %v8347_v60 = vpop.f32.mrb[35].mxu1 }
 0x2ef   :  { %5979 = vmatmul.mubr.msk.bf16.gmra.mrb[32].mxu0 %vm294_vm0, %v7144_v61  ;;  %v7156_v61 = vld [vmem:[%s9218_s0 + $0xb8] sm:$0xff]  }
 0x2f0   :  { %2920 = vmatprep.mubr.bf16.mxu0 %v9230_v0 }
 0x2f7   :  { %5980 = vmatmul.mubr.msk.bf16.gmra.mrb[36].mxu0 %vm294_vm0, %v7145_v62  ;;  %v8353_v62 = vpop.f32.mrb[36].mxu1 }
 0x2f8   :  { %2930 = vmatprep.mubr.bf16.mxu0 %v9230_v0 }
 0x2ff   :  { %5981 = vmatmul.mubr.msk.bf16.gmra.mrb[40].mxu0 %vm294_vm0, %v7146_v63  ;;  %v8356_v63 = vpop.f32.mrb[37].mxu1 }
 0x300   :  { %2940 = vmatprep.mubr.bf16.mxu0 %v9230_v0 }
 0x307   :  { %5982 = vmatmul.mubr.msk.bf16.gmra.mrb[44].mxu0 %vm294_vm0, %v7147_v5  ;;  %v8358_v5 = vpop.f32.mrb[38].mxu1 }
 0x308   :  { %2950 = vmatprep.mubr.bf16.mxu0 %v9230_v0  ;;  %v8360_v8 = vpop.f32.mrb[39].mxu1 }
 0x30f   :  { %5983 = vmatmul.mubr.msk.bf16.gmra.mrb[48].mxu0 %vm294_vm0, %v7148_v12  ;;  %v8366_v12 = vpop.f32.mrb[40].mxu1 }
 0x310   :  { %2960 = vmatprep.mubr.bf16.mxu0 %v9230_v0  ;;  %v8369_v13 = vpop.f32.mrb[41].mxu1 }
 0x311   :  { %v8371_v14 = vpop.f32.mrb[42].mxu1 }
 0x312   :  { %v8373_v34 = vpop.f32.mrb[43].mxu1 }
 0x317   :  { %5984 = vmatmul.mubr.msk.bf16.gmra.mrb[52].mxu0 %vm294_vm0, %v7149_v38  ;;  %v8379_v38 = vpop.f32.mrb[44].mxu1 }
 0x318   :  { %2970 = vmatprep.mubr.bf16.mxu0 %v9230_v0  ;;  %v8382_v39 = vpop.f32.mrb[45].mxu1 }
 0x319   :  { %v8384_v40 = vpop.f32.mrb[46].mxu1 }
 0x31a   :  { %v8386_v43 = vpop.f32.mrb[47].mxu1 }
 0x31f   :  { %5985 = vmatmul.mubr.msk.bf16.gmra.mrb[56].mxu0 %vm294_vm0, %v7150_v47  ;;  %v8392_v47 = vpop.f32.mrb[48].mxu1 }
 0x320   :  { %2980 = vmatprep.mubr.bf16.mxu0 %v9230_v0  ;;  %v8395_v48 = vpop.f32.mrb[49].mxu1 }
 0x321   :  { %v8397_v49 = vpop.f32.mrb[50].mxu1 }
 0x322   :  { %9244 = vst [vmem:[#allocation9_spill] sm:$0xff] %v8397_v49  ;;  %v8399_v52 = vpop.f32.mrb[51].mxu1 }
 0x323   :  { %9245 = vst [vmem:[#allocation10_spill] sm:$0xff] %v8399_v52 }
 0x327   :  { %5986 = vmatmul.mubr.msk.bf16.gmra.mrb[60].mxu0 %vm294_vm0, %v7151_v20  ;;  %v8405_v20 = vpop.f32.mrb[52].mxu1 }
 0x328   :  { %2990 = vmatprep.mubr.bf16.mxu0 %v9230_v0  ;;  %9246 = vst [vmem:[#allocation11_spill] sm:$0xff] %v8405_v20  ;;  %v8408_v21 = vpop.f32.mrb[53].mxu1 }
 0x329   :  { %9247 = vst [vmem:[#allocation12_spill] sm:$0xff] %v8408_v21  ;;  %v8410_v22 = vpop.f32.mrb[54].mxu1 }
 0x32a   :  { %9248 = vst [vmem:[#allocation13_spill] sm:$0xff] %v8410_v22 }
 0x32f   :  { %5987 = vmatmul.mubr.msk.bf16.gmra.mrb[64].mxu0 %vm294_vm0, %v7152_v27  ;;  %v8412_v27 = vpop.f32.mrb[55].mxu1 }
 0x330   :  { %3000 = vmatprep.mubr.bf16.mxu0 %v9230_v0  ;;  %9249 = vst [vmem:[#allocation14_spill] sm:$0xff] %v8412_v27 }
 0x337   :  { %5988 = vmatmul.mubr.msk.bf16.gmra.mrb[68].mxu0 %vm294_vm0, %v7153_v32  ;;  %v7165_v32 = vld [vmem:[%s9218_s0 + $0xe0] sm:$0xff]  }
 0x338   :  { %3010 = vmatprep.mubr.bf16.mxu0 %v9230_v0 }
 0x33f   :  { %5989 = vmatmul.mubr.msk.bf16.gmra.mrb[72].mxu0 %vm294_vm0, %v7154_v56  ;;  %v8418_v56 = vpop.f32.mrb[56].mxu1 }
 0x340   :  { %3020 = vmatprep.mubr.bf16.mxu0 %v9230_v0  ;;  %9250 = vst [vmem:[#allocation15_spill] sm:$0xff] %v8418_v56 }
 0x347   :  { %5990 = vmatmul.mubr.msk.bf16.gmra.mrb[76].mxu0 %vm294_vm0, %v7156_v61  ;;  %v8421_v61 = vpop.f32.mrb[57].mxu1 }
 0x348   :  { %3030 = vmatprep.mubr.bf16.mxu0 %v9230_v0  ;;  %9251 = vst [vmem:[#allocation16_spill] sm:$0xff] %v8421_v61 }
 0x34f   :  { %5991 = vmatmul.mubr.msk.bf16.gmra.mrb[80].mxu0 %vm294_vm0, %v7158_v10  ;;  %v8423_v10 = vpop.f32.mrb[58].mxu1 }
 0x350   :  { %3040 = vmatprep.mubr.bf16.mxu0 %v9230_v0  ;;  %9252 = vst [vmem:[#allocation17_spill] sm:$0xff] %v8423_v10  ;;  %v7167_v10 = vld [vmem:[%s9218_s0 + $0xf0] sm:$0xff]  }
 0x357   :  { %5992 = vmatmul.mubr.msk.bf16.gmra.mrb[84].mxu0 %vm294_vm0, %v7160_v36  ;;  %v8425_v36 = vpop.f32.mrb[59].mxu1 }
 0x358   :  { %3050 = vmatprep.mubr.bf16.mxu0 %v9230_v0  ;;  %9253 = vst [vmem:[#allocation18_spill] sm:$0xff] %v8425_v36 }
 0x35f   :  { %5993 = vmatmul.mubr.msk.bf16.gmra.mrb[88].mxu0 %vm294_vm0, %v7162_v45  ;;  %v7166_v45 = vld [vmem:[%s9218_s0 + $0xe8] sm:$0xff]  }
 0x360   :  { %3060 = vmatprep.mubr.bf16.mxu0 %v9230_v0 }
 0x367   :  { %5994 = vmatmul.mubr.msk.bf16.gmra.mrb[92].mxu0 %vm294_vm0, %v7164_v17  ;;  %v8431_v17 = vpop.f32.mrb[60].mxu1 }
 0x368   :  { %3070 = vmatprep.mubr.bf16.mxu0 %v9230_v0  ;;  %9254 = vst [vmem:[#allocation19_spill] sm:$0xff] %v8431_v17  ;;  %v8437_v56 = vpop.f32.mrb[61].mxu1 }
 0x369   :  { %9255 = vst [vmem:[#allocation20_spill] sm:$0xff] %v8437_v56  ;;  %v8439_v61 = vpop.f32.mrb[62].mxu1 }
 0x36a   :  { %9256 = vst [vmem:[#allocation21_spill] sm:$0xff] %v8439_v61  ;;  %v8441_v36 = vpop.f32.mrb[63].mxu1  ;;  %v7168_v61 = vld [vmem:[%s9218_s0 + $0xf8] sm:$0xff]  }
 0x36b   :  { %9257 = vst [vmem:[#allocation22_spill] sm:$0xff] %v8441_v36 }
 0x36f   :  { %5995 = vmatmul.mubr.msk.bf16.gmra.mrb[96].mxu0 %vm294_vm0, %v7165_v32  ;;  %v7195_v32 = vld [vmem:[%s9221_s3 + $0x4] ss:$8 sps:$4 sm:$0xff]  }
 0x370   :  { %3080 = vmatprep.mubr.bf16.mxu0 %v9230_v0  ;;  %3813 = vmatprep.subr.bf16.mxu1 %v7195_v32 }
 0x377   :  { %5996 = vmatmul.mubr.msk.bf16.gmra.mrb[100].mxu0 %vm294_vm0, %v7166_v45  ;;  %v8447_v45 = vpop.f32.mrb[64].mxu1 }
 0x378   :  { %3090 = vmatprep.mubr.bf16.mxu0 %v9230_v0  ;;  %9258 = vst [vmem:[#allocation23_spill] sm:$0xff] %v8447_v45  ;;  %v8450_v17 = vpop.f32.mrb[65].mxu1 }
 0x379   :  { %9259 = vst [vmem:[#allocation24_spill] sm:$0xff] %v8450_v17  ;;  %v8452_v27 = vpop.f32.mrb[66].mxu1 }
 0x37a   :  { %9260 = vst [vmem:[#allocation25_spill] sm:$0xff] %v8452_v27  ;;  %v8454_v22 = vpop.f32.mrb[67].mxu1 }
 0x37b   :  { %9261 = vst [vmem:[#allocation26_spill] sm:$0xff] %v8454_v22  ;;  %v8464_v27 = vpop.f32.mrb[68].mxu1 }
 0x37f   :  { %5997 = vmatmul.mubr.msk.bf16.gmra.mrb[104].mxu0 %vm294_vm0, %v7167_v10 }
 0x380   :  { %3100 = vmatprep.mubr.bf16.mxu0 %v9230_v0 }
 0x382   :  { %v2832_v56 = vpop.f32.mrb[0].mxu0 }
 0x383   :  { %v6411_v32 = vadd.f32 %v2832_v56, %v8185_v1  ;;  %v2834_v36 = vpop.f32.mrb[1].mxu0  ;;  %v8466_v1 = vpop.f32.mrb[69].mxu1 }
 0x384   :  { %v6412_v10 = vadd.f32 %v2834_v36, %v8188_v2  ;;  %v2836_v21 = vpop.f32.mrb[2].mxu0  ;;  %9262 = vst [vmem:[#allocation27_spill] sm:$0xff] %v8466_v1  ;;  %v8468_v56 = vpop.f32.mrb[70].mxu1  ;;  %v8475_v2 = vld [vmem:[%s9220_s2] ss:$0 sm:$0xff] }
 0x385   :  { %v6413_v45 = vadd.f32 %v2836_v21, %v8191_v3  ;;  %v2838_v0 = vpop.f32.mrb[3].mxu0  ;;  %9263 = vst [vmem:[#allocation28_spill] sm:$0xff] %v8468_v56  ;;  %v8470_v49 = vpop.f32.mrb[71].mxu1 }
 0x386   :  { %v3223_v20 = vmax.f32 %v6411_v32, %v6412_v10  ;;  %v6414_v17 = vadd.f32 %v2838_v0, %v8193_v4  ;;  %9264 = vst [vmem:[#allocation29_spill] sm:$0xff] %v8470_v49  ;;  %v8482_v10 = vpop.f32.mrb[72].mxu1 }
 0x387   :  { %5998 = vmatmul.mubr.msk.bf16.gmra.mrb[108].mxu0 %vm294_vm0, %v7168_v61 }
 0x388   :  { %v3224_v22 = vmax.f32 %v6413_v45, %v6414_v17  ;;  %v3286_v17 = vadd.f32 %v8475_v2, %v3223_v20 }
 0x38a   :  { %v2842_v52 = vpop.f32.mrb[4].mxu0  ;;  %v3287_v49 = vadd.f32 %v8475_v2, %v3224_v22 }
 0x38b   :  { %v6415_v3 = vadd.f32 %v2842_v52, %v8200_v6  ;;  %v2844_v0 = vpop.f32.mrb[5].mxu0  ;;  %v8486_v6 = vpop.f32.mrb[73].mxu1 }
 0x38c   :  { %v6416_v4 = vadd.f32 %v2844_v0, %v8203_v7  ;;  %v2846_v21 = vpop.f32.mrb[6].mxu0  ;;  %9265 = vst [vmem:[#allocation30_spill] sm:$0xff] %v8486_v6  ;;  %v8488_v52 = vpop.f32.mrb[74].mxu1  ;;  %v3342_v7 = vmax.f32 %v3286_v17, 0.0 }
 0x38d   :  { %v6417_v61 = vadd.f32 %v2846_v21, %v8209_v9  ;;  %v2848_v36 = vpop.f32.mrb[7].mxu0  ;;  %9266 = vst [vmem:[#allocation31_spill] sm:$0xff] %v8488_v52  ;;  %v8491_v20 = vpop.f32.mrb[75].mxu1 }
 0x38e   :  { %v3225_v45 = vmax.f32 %v6415_v3, %v6416_v4  ;;  %v6418_v32 = vadd.f32 %v2848_v36, %v8214_v11  ;;  %v3343_v4 = vmax.f32 %v3287_v49, 0.0  ;;  %v8501_v6 = vpop.f32.mrb[76].mxu1 }
 0x390   :  { %v3288_v56 = vadd.f32 %v8475_v2, %v3225_v45  ;;  %v3226_v1 = vmax.f32 %v6417_v61, %v6418_v32 }
 0x392   :  { %v3344_v0 = vmax.f32 %v3288_v56, 0.0  ;;  %v3289_v9 = vadd.f32 %v8475_v2, %v3226_v1  ;;  %v2852_v21 = vpop.f32.mrb[8].mxu0 }
 0x393   :  { %v6419_v11 = vadd.f32 %v2852_v21, %v8226_v15  ;;  %v2854_v3 = vpop.f32.mrb[9].mxu0 }
 0x394   :  { %v8494_v36 = vmax.f32 %v3342_v7, %v3344_v0  ;;  %v3345_v22 = vmax.f32 %v3289_v9, 0.0  ;;  %v6420_v61 = vadd.f32 %v2854_v3, %v8229_v18  ;;  %v2856_v45 = vpop.f32.mrb[10].mxu0  ;;  %v8505_v7 = vpop.f32.mrb[77].mxu1 }
 0x395   :  { %v6421_v32 = vadd.f32 %v2856_v45, %v8234_v35  ;;  %v2858_v52 = vpop.f32.mrb[11].mxu0  ;;  %v8507_v0 = vpop.f32.mrb[78].mxu1 }
 0x396   :  { %9267 = vst [vmem:[#allocation32_spill] sm:$0xff] %v8494_v36  ;;  %v8498_v17 = vmax.f32 %v3343_v4, %v3345_v22  ;;  %v3227_v56 = vmax.f32 %v6419_v11, %v6420_v61  ;;  %v6422_v1 = vadd.f32 %v2858_v52, %v8239_v37  ;;  %v8509_v9 = vpop.f32.mrb[79].mxu1 }
 0x397   :  { %v8516_v45 = vpop.f32.mrb[80].mxu1 }
 0x398   :  { %9268 = vst [vmem:[#allocation33_spill] sm:$0xff] %v8498_v17  ;;  %v3228_v49 = vmax.f32 %v6421_v32, %v6422_v1  ;;  %v3290_v4 = vadd.f32 %v8475_v2, %v3227_v56 }
 0x39a   :  { %v2862_v18 = vpop.f32.mrb[12].mxu0  ;;  %v3291_v32 = vadd.f32 %v8475_v2, %v3228_v49 }
 0x39b   :  { %v6423_v35 = vadd.f32 %v2862_v18, %v8251_v41  ;;  %v2864_v21 = vpop.f32.mrb[13].mxu0  ;;  %v8520_v41 = vpop.f32.mrb[81].mxu1 }
 0x39c   :  { %v6424_v11 = vadd.f32 %v2864_v21, %v8254_v42  ;;  %v2866_v3 = vpop.f32.mrb[14].mxu0  ;;  %v8522_v18 = vpop.f32.mrb[82].mxu1  ;;  %v3346_v42 = vmax.f32 %v3290_v4, 0.0 }
 0x39d   :  { %v6425_v37 = vadd.f32 %v2866_v3, %v8259_v44  ;;  %v2868_v52 = vpop.f32.mrb[15].mxu0  ;;  %v8525_v56 = vpop.f32.mrb[83].mxu1 }
 0x39e   :  { %v3229_v22 = vmax.f32 %v6423_v35, %v6424_v11  ;;  %v6426_v61 = vadd.f32 %v2868_v52, %v8264_v46  ;;  %9269 = vst [vmem:[#allocation34_spill] sm:$0xff] %v8525_v56  ;;  %v3347_v11 = vmax.f32 %v3291_v32, 0.0  ;;  %v8534_v56 = vpop.f32.mrb[84].mxu1 }
 0x3a0   :  { %v3292_v1 = vadd.f32 %v8475_v2, %v3229_v22  ;;  %v3230_v15 = vmax.f32 %v6425_v37, %v6426_v61 }
 0x3a2   :  { %v3348_v21 = vmax.f32 %v3292_v1, 0.0  ;;  %v3293_v44 = vadd.f32 %v8475_v2, %v3230_v15  ;;  %v2872_v3 = vpop.f32.mrb[16].mxu0  ;;  %v7193_v15 = vld [vmem:[%s9221_s3] ss:$8 sps:$4 sm:$0xff]  }
 0x3a3   :  { %v6427_v46 = vadd.f32 %v2872_v3, %v8276_v50  ;;  %v2874_v35 = vpop.f32.mrb[17].mxu0 }
 0x3a4   :  { %v3402_v52 = vmax.f32 %v3346_v42, %v3348_v21  ;;  %v3349_v49 = vmax.f32 %v3293_v44, 0.0  ;;  %v6428_v22 = vadd.f32 %v2874_v35, %v8279_v51  ;;  %v2876_v37 = vpop.f32.mrb[18].mxu0  ;;  %v7198_v51 = vld [vmem:[%s9221_s3 + $0x14] ss:$8 sps:$4 sm:$0xff]   ;;  %v8541_v42 = vpop.f32.mrb[85].mxu1  ;;  %v9270_v44 = vmov 0  }
 0x3a5   :  { %v6429_v61 = vadd.f32 %v2876_v37, %v8284_v16  ;;  %v2878_v36 = vpop.f32.mrb[19].mxu0  ;;  %v8543_v16 = vpop.f32.mrb[86].mxu1 }
 0x3a6   :  { %v3403_v17 = vmax.f32 %v3347_v11, %v3349_v49  ;;  %v3231_v4 = vmax.f32 %v6427_v46, %v6428_v22  ;;  %v6430_v1 = vadd.f32 %v2878_v36, %v8289_v19  ;;  %v8551_v3 = vpop.f32.mrb[87].mxu1  ;;  %v7201_v11 = vld [vmem:[%s9221_s3 + $0x24] ss:$8 sps:$4 sm:$0xff]  }
 0x3a8   :  { %v8536_v50 = vpack.c.bf16 %v3403_v17, %v3402_v52  ;;  %v3232_v32 = vmax.f32 %v6429_v61, %v6430_v1  ;;  %v7196_v17 = vld [vmem:[%s9221_s3 + $0x10] ss:$8 sps:$4 sm:$0xff]   ;;  %v3294_v49 = vadd.f32 %v8475_v2, %v3231_v4  ;;  %v7199_v61 = vld [vmem:[%s9221_s3 + $0x20] ss:$8 sps:$4 sm:$0xff]  }
 0x3aa   :  { %v2882_v21 = vpop.f32.mrb[20].mxu0  ;;  %3633 = vmatmul.mubr.bf16.vlgmr.msra.gmra.mrb[112].mxu1 %v8536_v50 }
 0x3ab   :  { %v6431_v19 = vadd.f32 %v2882_v21, %v8301_v23  ;;  %v2884_v36 = vpop.f32.mrb[21].mxu0  ;;  %3642 = vmatprep.mubr.bf16.mxu1 %v9270_v44  ;;  %3814 = vmatpush1.bf16.msra.mxu1 %v7193_v15 }
 0x3ac   :  { %v6432_v46 = vadd.f32 %v2884_v36, %v8304_v24  ;;  %v2886_v35 = vpop.f32.mrb[22].mxu0  ;;  %3815 = vmatprep.subr.bf16.mxu1 %v7198_v51  ;;  %v3295_v24 = vadd.f32 %v8475_v2, %v3232_v32  ;;  %v3350_v51 = vmax.f32 %v3294_v49, 0.0  ;;  %v7202_v32 = vld [vmem:[%s9221_s3 + $0x30] ss:$8 sps:$4 sm:$0xff]  }
 0x3ad   :  { %v6433_v23 = vadd.f32 %v2886_v35, %v8306_v25  ;;  %v2888_v52 = vpop.f32.mrb[23].mxu0  ;;  %v7204_v25 = vld [vmem:[%s9221_s3 + $0x34] ss:$8 sps:$4 sm:$0xff]  }
 0x3ae   :  { %v3233_v22 = vmax.f32 %v6431_v19, %v6432_v46  ;;  %v6434_v37 = vadd.f32 %v2888_v52, %v8308_v26  ;;  %v8569_v19 = vpop.f32.mrb[88].mxu1  ;;  %v3351_v35 = vmax.f32 %v3295_v24, 0.0 }
 0x3af   :  { %3816 = vmatpush1.bf16.msra.mxu1 %v7196_v17  ;;  %v8575_v46 = vpop.f32.mrb[89].mxu1 }
 0x3b0   :  { %v3296_v1 = vadd.f32 %v8475_v2, %v3233_v22  ;;  %v3234_v15 = vmax.f32 %v6433_v23, %v6434_v37  ;;  %3817 = vmatprep.subr.bf16.mxu1 %v7201_v11  ;;  %v7207_v22 = vld [vmem:[%s9221_s3 + $0x44] ss:$8 sps:$4 sm:$0xff]  }
 0x3b2   :  { %v3352_v4 = vmax.f32 %v3296_v1, 0.0  ;;  %v3297_v21 = vadd.f32 %v8475_v2, %v3234_v15  ;;  %v2892_v26 = vpop.f32.mrb[24].mxu0 }
 0x3b3   :  { %v6435_v36 = vadd.f32 %v2892_v26, %v8314_v28  ;;  %v2894_v17 = vpop.f32.mrb[25].mxu0  ;;  %3818 = vmatpush1.bf16.msra.mxu1 %v7199_v61  ;;  %v8581_v28 = vpop.f32.mrb[90].mxu1 }
 0x3b4   :  { %v3353_v11 = vmax.f32 %v3297_v21, 0.0  ;;  %v6436_v23 = vadd.f32 %v2894_v17, %v8317_v29  ;;  %v2896_v52 = vpop.f32.mrb[26].mxu0  ;;  %v3406_v49 = vmax.f32 %v3350_v51, %v3352_v4  ;;  %3819 = vmatprep.subr.bf16.mxu1 %v7204_v25  ;;  %v8584_v1 = vpop.f32.mrb[91].mxu1  ;;  %v7205_v29 = vld [vmem:[%s9221_s3 + $0x40] ss:$8 sps:$4 sm:$0xff]  }
 0x3b5   :  { %v6437_v37 = vadd.f32 %v2896_v52, %v8319_v30  ;;  %v2898_v61 = vpop.f32.mrb[27].mxu0  ;;  %v7210_v30 = vld [vmem:[%s9221_s3 + $0x54] ss:$8 sps:$4 sm:$0xff]   ;;  %v8596_v26 = vpop.f32.mrb[92].mxu1  ;;  %v7208_v17 = vld [vmem:[%s9221_s3 + $0x50] ss:$8 sps:$4 sm:$0xff]  }
 0x3b6   :  { %v3235_v15 = vmax.f32 %v6435_v36, %v6436_v23  ;;  %v6438_v24 = vadd.f32 %v2898_v61, %v8321_v31  ;;  %v3407_v21 = vmax.f32 %v3351_v35, %v3353_v11  ;;  %v7213_v23 = vld [vmem:[%s9221_s3 + $0x64] ss:$8 sps:$4 sm:$0xff]  }
 0x3b7   :  { %3820 = vmatpush1.bf16.msra.mxu1 %v7202_v32  ;;  %v8603_v32 = vpop.f32.mrb[93].mxu1 }
 0x3b8   :  { %v3236_v25 = vmax.f32 %v6437_v37, %v6438_v24  ;;  %v8590_v51 = vpack.c.bf16 %v3407_v21, %v3406_v49  ;;  %3821 = vmatprep.subr.bf16.mxu1 %v7207_v22  ;;  %v8610_v49 = vpop.f32.mrb[94].mxu1  ;;  %v3298_v22 = vadd.f32 %v8475_v2, %v3235_v15  ;;  %v7216_v15 = vld [vmem:[%s9221_s3 + $0x74] ss:$8 sps:$4 sm:$0xff]  }
 0x3b9   :  { %v8614_v24 = vpop.f32.mrb[95].mxu1 }
 0x3ba   :  { %9271 = vst [vmem:[#allocation35_spill] sm:$0xff] %v8590_v51  ;;  %v2902_v4 = vpop.f32.mrb[28].mxu0  ;;  %3643 = vmatmul.mubr.bf16.gmra.mrb[116].mxu1 %v8590_v51  ;;  %v3299_v21 = vadd.f32 %v8475_v2, %v3236_v25  ;;  %v7214_v25 = vld [vmem:[%s9221_s3 + $0x70] ss:$8 sps:$4 sm:$0xff]  }
 0x3bb   :  { %v6439_v31 = vadd.f32 %v2902_v4, %v8327_v53  ;;  %v2904_v36 = vpop.f32.mrb[29].mxu0  ;;  %3652 = vmatprep.mubr.bf16.mxu1 %v9270_v44  ;;  %3822 = vmatpush1.bf16.msra.mxu1 %v7205_v29 }
 0x3bc   :  { %v6440_v35 = vadd.f32 %v2904_v36, %v8330_v33  ;;  %v2906_v11 = vpop.f32.mrb[30].mxu0  ;;  %3823 = vmatprep.subr.bf16.mxu1 %v7210_v30  ;;  %v7211_v33 = vld [vmem:[%s9221_s3 + $0x60] ss:$8 sps:$4 sm:$0xff]   ;;  %v3354_v30 = vmax.f32 %v3298_v22, 0.0  ;;  %v8625_v36 = vpop.f32.mrb[96].mxu1 }
 0x3bd   :  { %v6441_v53 = vadd.f32 %v2906_v11, %v8332_v54  ;;  %v2908_v52 = vpop.f32.mrb[31].mxu0  ;;  %v8631_v11 = vpop.f32.mrb[97].mxu1 }
 0x3be   :  { %v3237_v37 = vmax.f32 %v6439_v31, %v6440_v35  ;;  %v6442_v61 = vadd.f32 %v2908_v52, %v8334_v55 }
 0x3bf   :  { %3824 = vmatpush1.bf16.msra.mxu1 %v7208_v17 }
 0x3c0   :  { %v3300_v29 = vadd.f32 %v8475_v2, %v3237_v37  ;;  %v3238_v54 = vmax.f32 %v6441_v53, %v6442_v61  ;;  %3825 = vmatprep.subr.bf16.mxu1 %v7213_v23  ;;  %v3355_v23 = vmax.f32 %v3299_v21, 0.0  ;;  %v7219_v61 = vld [vmem:[%s9221_s3 + $0x104] ss:$8 sps:$4 sm:$0xff]  }
 0x3c2   :  { %v3356_v4 = vmax.f32 %v3300_v29, 0.0  ;;  %v3301_v55 = vadd.f32 %v8475_v2, %v3238_v54  ;;  %v2912_v31 = vpop.f32.mrb[32].mxu0  ;;  %v8638_v29 = vpop.f32.mrb[98].mxu1 }
 0x3c3   :  { %v6443_v17 = vadd.f32 %v2912_v31, %v8340_v57  ;;  %v2914_v35 = vpop.f32.mrb[33].mxu0  ;;  %3826 = vmatpush1.bf16.msra.mxu1 %v7211_v33  ;;  %v8641_v21 = vpop.f32.mrb[99].mxu1 }
 0x3c4   :  { %v3410_v53 = vmax.f32 %v3354_v30, %v3356_v4  ;;  %v3357_v52 = vmax.f32 %v3301_v55, 0.0  ;;  %v6444_v22 = vadd.f32 %v2914_v35, %v8343_v58  ;;  %v2916_v37 = vpop.f32.mrb[34].mxu0  ;;  %3827 = vmatprep.subr.bf16.mxu1 %v7216_v15  ;;  %v8646_v4 = vpop.f32.mrb[100].mxu1 }
 0x3c5   :  { %v6445_v57 = vadd.f32 %v2916_v37, %v8345_v59  ;;  %v2918_v33 = vpop.f32.mrb[35].mxu0 }
 0x3c6   :  { %v3411_v54 = vmax.f32 %v3355_v23, %v3357_v52  ;;  %v3239_v31 = vmax.f32 %v6443_v17, %v6444_v22  ;;  %v6446_v51 = vadd.f32 %v2918_v33, %v8347_v60  ;;  %v8650_v17 = vpop.f32.mrb[101].mxu1 }
 0x3c7   :  { %3828 = vmatpush1.bf16.msra.mxu1 %v7214_v25  ;;  %v8653_v25 = vpop.f32.mrb[102].mxu1 }
 0x3c8   :  { %v3240_v30 = vmax.f32 %v6445_v57, %v6446_v51  ;;  %v8643_v58 = vpack.c.bf16 %v3411_v54, %v3410_v53  ;;  %4073 = vmatprep.subr.bf16.mxu1 %v7219_v61  ;;  %v8656_v53 = vpop.f32.mrb[103].mxu1  ;;  %v3302_v52 = vadd.f32 %v8475_v2, %v3239_v31 }
 0x3ca   :  { %9272 = vst [vmem:[#allocation36_spill] sm:$0xff] %v8643_v58  ;;  %v2922_v15 = vpop.f32.mrb[36].mxu0  ;;  %3653 = vmatmul.mubr.bf16.gmra.mrb[120].mxu1 %v8643_v58  ;;  %v3303_v37 = vadd.f32 %v8475_v2, %v3240_v30  ;;  %v3358_v33 = vmax.f32 %v3302_v52, 0.0 }
 0x3cb   :  { %v6447_v59 = vadd.f32 %v2922_v15, %v8353_v62  ;;  %v2924_v55 = vpop.f32.mrb[37].mxu0  ;;  %3662 = vmatprep.mubr.bf16.mxu1 %v9270_v44 }
 0x3cc   :  { %v6448_v60 = vadd.f32 %v2924_v55, %v8356_v63  ;;  %v2926_v35 = vpop.f32.mrb[38].mxu0  ;;  %v3359_v58 = vmax.f32 %v3303_v37, 0.0 }
 0x3cd   :  { %v6449_v51 = vadd.f32 %v2926_v35, %v8358_v5  ;;  %v2928_v23 = vpop.f32.mrb[39].mxu0  ;;  %v8664_v35 = vpop.f32.mrb[104].mxu1 }
 0x3ce   :  { %v3241_v22 = vmax.f32 %v6447_v59, %v6448_v60  ;;  %v6450_v62 = vadd.f32 %v2928_v23, %v8360_v8  ;;  %v8667_v30 = vpop.f32.mrb[105].mxu1 }
 0x3cf   :  { %v8670_v52 = vpop.f32.mrb[106].mxu1 }
 0x3d0   :  { %v3304_v61 = vadd.f32 %v8475_v2, %v3241_v22  ;;  %v3242_v57 = vmax.f32 %v6449_v51, %v6450_v62 }
 0x3d2   :  { %v3360_v63 = vmax.f32 %v3304_v61, 0.0  ;;  %v3305_v54 = vadd.f32 %v8475_v2, %v3242_v57  ;;  %v2932_v15 = vpop.f32.mrb[40].mxu0  ;;  %v8673_v61 = vpop.f32.mrb[107].mxu1 }
 0x3d3   :  { %v6451_v5 = vadd.f32 %v2932_v15, %v8366_v12  ;;  %v2934_v55 = vpop.f32.mrb[41].mxu0 }
 0x3d4   :  { %v3414_v31 = vmax.f32 %v3358_v33, %v3360_v63  ;;  %v3361_v59 = vmax.f32 %v3305_v54, 0.0  ;;  %v6452_v8 = vadd.f32 %v2934_v55, %v8369_v13  ;;  %v2936_v60 = vpop.f32.mrb[42].mxu0  ;;  %v8678_v13 = vpop.f32.mrb[108].mxu1 }
 0x3d5   :  { %v6453_v51 = vadd.f32 %v2936_v60, %v8371_v14  ;;  %v2938_v23 = vpop.f32.mrb[43].mxu0  ;;  %v8682_v54 = vpop.f32.mrb[109].mxu1 }
 0x3d6   :  { %v3415_v22 = vmax.f32 %v3359_v58, %v3361_v59  ;;  %v3243_v62 = vmax.f32 %v6451_v5, %v6452_v8  ;;  %v6454_v12 = vadd.f32 %v2938_v23, %v8373_v34  ;;  %v8686_v55 = vpop.f32.mrb[110].mxu1 }
 0x3d7   :  { %v8690_v60 = vpop.f32.mrb[111].mxu1 }
 0x3d8   :  { %v8675_v57 = vpack.c.bf16 %v3415_v22, %v3414_v31  ;;  %v3244_v37 = vmax.f32 %v6453_v51, %v6454_v12  ;;  %v3306_v31 = vadd.f32 %v8475_v2, %v3243_v62  ;;  %9274 = vst [vmem:[#allocation38_spill] sm:$0xff] %v8690_v60 }
 0x3da   :  { %9273 = vst [vmem:[#allocation37_spill] sm:$0xff] %v8675_v57  ;;  %v2942_v33 = vpop.f32.mrb[44].mxu0  ;;  %3663 = vmatmul.mubr.bf16.gmra.mrb[124].mxu1 %v8675_v57  ;;  %v3362_v22 = vmax.f32 %v3306_v31, 0.0 }
 0x3db   :  { %v6455_v63 = vadd.f32 %v2942_v33, %v8379_v38  ;;  %v2944_v14 = vpop.f32.mrb[45].mxu0  ;;  %3672 = vmatprep.mubr.bf16.mxu1 %v9270_v44  ;;  %v3307_v38 = vadd.f32 %v8475_v2, %v3244_v37 }
 0x3dc   :  { %v6456_v58 = vadd.f32 %v2944_v14, %v8382_v39  ;;  %v2946_v34 = vpop.f32.mrb[46].mxu0 }
 0x3dd   :  { %v6457_v15 = vadd.f32 %v2946_v34, %v8384_v40  ;;  %v2948_v5 = vpop.f32.mrb[47].mxu0  ;;  %v3363_v34 = vmax.f32 %v3307_v38, 0.0 }
 0x3de   :  { %v3245_v59 = vmax.f32 %v6455_v63, %v6456_v58  ;;  %v6458_v8 = vadd.f32 %v2948_v5, %v8386_v43  ;;  %v9275_v5 = vld [vmem:[#allocation9_spill] sm:$0xff] }
 0x3e0   :  { %v3308_v51 = vadd.f32 %v8475_v2, %v3245_v59  ;;  %v3246_v23 = vmax.f32 %v6457_v15, %v6458_v8  ;;  %v9276_v15 = vld [vmem:[#allocation10_spill] sm:$0xff] }
 0x3e2   :  { %v3364_v39 = vmax.f32 %v3308_v51, 0.0  ;;  %v3309_v12 = vadd.f32 %v8475_v2, %v3246_v23  ;;  %v2952_v40 = vpop.f32.mrb[48].mxu0 }
 0x3e3   :  { %v6459_v33 = vadd.f32 %v2952_v40, %v8392_v47  ;;  %v2954_v14 = vpop.f32.mrb[49].mxu0  ;;  %v9278_v47 = vld [vmem:[#allocation11_spill] sm:$0xff]  ;;  %v9280_v40 = vld [vmem:[#allocation13_spill] sm:$0xff] }
 0x3e4   :  { %v3418_v62 = vmax.f32 %v3362_v22, %v3364_v39  ;;  %v3365_v63 = vmax.f32 %v3309_v12, 0.0  ;;  %v6460_v43 = vadd.f32 %v2954_v14, %v8395_v48  ;;  %v2956_v58 = vpop.f32.mrb[50].mxu0  ;;  %v9279_v48 = vld [vmem:[#allocation12_spill] sm:$0xff] }
 0x3e5   :  { %v6461_v57 = vadd.f32 %v2956_v58, %v9275_v5  ;;  %v2958_v37 = vpop.f32.mrb[51].mxu0 }
 0x3e6   :  { %v3419_v60 = vmax.f32 %v3363_v34, %v3365_v63  ;;  %v3247_v59 = vmax.f32 %v6459_v33, %v6460_v43  ;;  %v6462_v31 = vadd.f32 %v2958_v37, %v9276_v15 }
 0x3e8   :  { %v8699_v8 = vpack.c.bf16 %v3419_v60, %v3418_v62  ;;  %v3248_v51 = vmax.f32 %v6461_v57, %v6462_v31  ;;  %v3310_v33 = vadd.f32 %v8475_v2, %v3247_v59  ;;  %v9281_v60 = vld [vmem:[#allocation14_spill] sm:$0xff]  ;;  %v9283_v59 = vld [vmem:[#allocation16_spill] sm:$0xff] }
 0x3ea   :  { %9277 = vst [vmem:[#allocation9_spill] sm:$0xff] %v8699_v8  ;;  %v2962_v23 = vpop.f32.mrb[52].mxu0  ;;  %3673 = vmatmul.mubr.bf16.gmra.mrb[128].mxu1 %v8699_v8  ;;  %v3311_v57 = vadd.f32 %v8475_v2, %v3248_v51  ;;  %v3366_v5 = vmax.f32 %v3310_v33, 0.0 }
 0x3eb   :  { %v6463_v38 = vadd.f32 %v2962_v23, %v9278_v47  ;;  %v2964_v22 = vpop.f32.mrb[53].mxu0  ;;  %3682 = vmatprep.mubr.bf16.mxu1 %v9270_v44  ;;  %v9282_v23 = vld [vmem:[#allocation15_spill] sm:$0xff] }
 0x3ec   :  { %v6464_v39 = vadd.f32 %v2964_v22, %v9279_v48  ;;  %v2966_v12 = vpop.f32.mrb[54].mxu0  ;;  %v3367_v48 = vmax.f32 %v3311_v57, 0.0 }
 0x3ed   :  { %v6465_v14 = vadd.f32 %v2966_v12, %v9280_v40  ;;  %v2968_v34 = vpop.f32.mrb[55].mxu0 }
 0x3ee   :  { %v3249_v63 = vmax.f32 %v6463_v38, %v6464_v39  ;;  %v6466_v62 = vadd.f32 %v2968_v34, %v9281_v60  ;;  %v9284_v34 = vld [vmem:[#allocation17_spill] sm:$0xff] }
 0x3f0   :  { %v3312_v43 = vadd.f32 %v8475_v2, %v3249_v63  ;;  %v3250_v58 = vmax.f32 %v6465_v14, %v6466_v62  ;;  %v9285_v14 = vld [vmem:[#allocation18_spill] sm:$0xff] }
 0x3f2   :  { %v3368_v37 = vmax.f32 %v3312_v43, 0.0  ;;  %v3313_v15 = vadd.f32 %v8475_v2, %v3250_v58  ;;  %v2972_v31 = vpop.f32.mrb[56].mxu0 }
 0x3f3   :  { %v6467_v47 = vadd.f32 %v2972_v31, %v9282_v23  ;;  %v2974_v22 = vpop.f32.mrb[57].mxu0  ;;  %v9287_v31 = vld [vmem:[#allocation19_spill] sm:$0xff] }
 0x3f4   :  { %v3422_v12 = vmax.f32 %v3366_v5, %v3368_v37  ;;  %v3369_v40 = vmax.f32 %v3313_v15, 0.0  ;;  %v6468_v38 = vadd.f32 %v2974_v22, %v9283_v59  ;;  %v2976_v39 = vpop.f32.mrb[58].mxu0  ;;  %v9288_v37 = vld [vmem:[#allocation20_spill] sm:$0xff]  ;;  %v9289_v22 = vld [vmem:[#allocation21_spill] sm:$0xff] }
 0x3f5   :  { %v6469_v60 = vadd.f32 %v2976_v39, %v9284_v34  ;;  %v2978_v51 = vpop.f32.mrb[59].mxu0 }
 0x3f6   :  { %v3423_v8 = vmax.f32 %v3367_v48, %v3369_v40  ;;  %v3251_v63 = vmax.f32 %v6467_v47, %v6468_v38  ;;  %v6470_v33 = vadd.f32 %v2978_v51, %v9285_v14 }
 0x3f8   :  { %v8715_v62 = vpack.c.bf16 %v3423_v8, %v3422_v12  ;;  %v3252_v43 = vmax.f32 %v6469_v60, %v6470_v33  ;;  %v3314_v47 = vadd.f32 %v8475_v2, %v3251_v63  ;;  %v9290_v8 = vld [vmem:[#allocation22_spill] sm:$0xff]  ;;  %v9292_v63 = vld [vmem:[#allocation24_spill] sm:$0xff] }
 0x3fa   :  { %9286 = vst [vmem:[#allocation10_spill] sm:$0xff] %v8715_v62  ;;  %v2982_v58 = vpop.f32.mrb[60].mxu0  ;;  %3683 = vmatmul.mubr.bf16.gmra.mrb[132].mxu1 %v8715_v62  ;;  %v3315_v38 = vadd.f32 %v8475_v2, %v3252_v43  ;;  %v3370_v60 = vmax.f32 %v3314_v47, 0.0 }
 0x3fb   :  { %v6471_v57 = vadd.f32 %v2982_v58, %v9287_v31  ;;  %v2984_v5 = vpop.f32.mrb[61].mxu0  ;;  %3692 = vmatprep.mubr.bf16.mxu1 %v9270_v44  ;;  %v9291_v58 = vld [vmem:[#allocation23_spill] sm:$0xff] }
 0x3fc   :  { %v6472_v15 = vadd.f32 %v2984_v5, %v9288_v37  ;;  %v2986_v23 = vpop.f32.mrb[62].mxu0  ;;  %v3371_v37 = vmax.f32 %v3315_v38, 0.0 }
 0x3fd   :  { %v6473_v59 = vadd.f32 %v2986_v23, %v9289_v22  ;;  %v2988_v48 = vpop.f32.mrb[63].mxu0 }
 0x3fe   :  { %v3253_v40 = vmax.f32 %v6471_v57, %v6472_v15  ;;  %v6474_v12 = vadd.f32 %v2988_v48, %v9290_v8  ;;  %v9293_v48 = vld [vmem:[#allocation25_spill] sm:$0xff] }
 0x400   :  { %v3316_v39 = vadd.f32 %v8475_v2, %v3253_v40  ;;  %v3254_v34 = vmax.f32 %v6473_v59, %v6474_v12  ;;  %v9294_v59 = vld [vmem:[#allocation26_spill] sm:$0xff] }
 0x402   :  { %v3372_v51 = vmax.f32 %v3316_v39, 0.0  ;;  %v3317_v14 = vadd.f32 %v8475_v2, %v3254_v34  ;;  %v2992_v33 = vpop.f32.mrb[64].mxu0 }
 0x403   :  { %v6475_v31 = vadd.f32 %v2992_v33, %v9291_v58  ;;  %v2994_v5 = vpop.f32.mrb[65].mxu0  ;;  %v9296_v58 = vld [vmem:[#allocation28_spill] sm:$0xff] }
 0x404   :  { %v3426_v23 = vmax.f32 %v3370_v60, %v3372_v51  ;;  %v3373_v22 = vmax.f32 %v3317_v14, 0.0  ;;  %v6476_v57 = vadd.f32 %v2994_v5, %v9292_v63  ;;  %v2996_v15 = vpop.f32.mrb[66].mxu0  ;;  %v9295_v51 = vld [vmem:[#allocation27_spill] sm:$0xff] }
 0x405   :  { %v6477_v8 = vadd.f32 %v2996_v15, %v9293_v48  ;;  %v2998_v43 = vpop.f32.mrb[67].mxu0 }
 0x406   :  { %v3427_v62 = vmax.f32 %v3371_v37, %v3373_v22  ;;  %v3255_v40 = vmax.f32 %v6475_v31, %v6476_v57  ;;  %v6478_v47 = vadd.f32 %v2998_v43, %v9294_v59 }
 0x408   :  { %v8731_v12 = vpack.c.bf16 %v3427_v62, %v3426_v23  ;;  %v3256_v39 = vmax.f32 %v6477_v8, %v6478_v47  ;;  %v3318_v31 = vadd.f32 %v8475_v2, %v3255_v40  ;;  %v9297_v62 = vld [vmem:[#allocation29_spill] sm:$0xff]  ;;  %v9298_v40 = vld [vmem:[#allocation30_spill] sm:$0xff] }
 0x40a   :  { %v3002_v34 = vpop.f32.mrb[68].mxu0  ;;  %3693 = vmatmul.mubr.bf16.gmra.mrb[136].mxu1 %v8731_v12  ;;  %v3319_v63 = vadd.f32 %v8475_v2, %v3256_v39 }
 0x40b   :  { %v6479_v38 = vadd.f32 %v3002_v34, %v8464_v27  ;;  %v3004_v60 = vpop.f32.mrb[69].mxu0  ;;  %3702 = vmatprep.mubr.bf16.mxu1 %v9270_v44  ;;  %v3374_v27 = vmax.f32 %v3318_v31, 0.0 }
 0x40c   :  { %v6480_v14 = vadd.f32 %v3004_v60, %v9295_v51  ;;  %v3006_v33 = vpop.f32.mrb[70].mxu0  ;;  %v3375_v34 = vmax.f32 %v3319_v63, 0.0 }
 0x40d   :  { %v6481_v5 = vadd.f32 %v3006_v33, %v9296_v58  ;;  %v3008_v37 = vpop.f32.mrb[71].mxu0  ;;  %v9299_v33 = vld [vmem:[#allocation31_spill] sm:$0xff] }
 0x40e   :  { %v3257_v22 = vmax.f32 %v6479_v38, %v6480_v14  ;;  %v6482_v23 = vadd.f32 %v3008_v37, %v9297_v62 }
 0x410   :  { %v3320_v57 = vadd.f32 %v8475_v2, %v3257_v22  ;;  %v3258_v15 = vmax.f32 %v6481_v5, %v6482_v23 }
 0x412   :  { %v3376_v48 = vmax.f32 %v3320_v57, 0.0  ;;  %v3321_v8 = vadd.f32 %v8475_v2, %v3258_v15  ;;  %v3012_v43 = vpop.f32.mrb[72].mxu0 }
 0x413   :  { %v6483_v59 = vadd.f32 %v3012_v43, %v8482_v10  ;;  %v3014_v47 = vpop.f32.mrb[73].mxu0 }
 0x414   :  { %v3430_v60 = vmax.f32 %v3374_v27, %v3376_v48  ;;  %v3377_v51 = vmax.f32 %v3321_v8, 0.0  ;;  %v6484_v38 = vadd.f32 %v3014_v47, %v9298_v40  ;;  %v3016_v14 = vpop.f32.mrb[74].mxu0 }
 0x415   :  { %v6485_v58 = vadd.f32 %v3016_v14, %v9299_v33  ;;  %v3018_v39 = vpop.f32.mrb[75].mxu0 }
 0x416   :  { %v3431_v37 = vmax.f32 %v3375_v34, %v3377_v51  ;;  %v3259_v22 = vmax.f32 %v6483_v59, %v6484_v38  ;;  %v6486_v5 = vadd.f32 %v3018_v39, %v8491_v20 }
 0x418   :  { %v8747_v31 = vpack.c.bf16 %v3431_v37, %v3430_v60  ;;  %v3260_v62 = vmax.f32 %v6485_v58, %v6486_v5  ;;  %v3322_v8 = vadd.f32 %v8475_v2, %v3259_v22 }
 0x41a   :  { %v3022_v23 = vpop.f32.mrb[76].mxu0  ;;  %3703 = vmatmul.mubr.bf16.gmra.mrb[140].mxu1 %v8747_v31  ;;  %v3323_v59 = vadd.f32 %v8475_v2, %v3260_v62  ;;  %v9300_v62 = vld [vmem:[#allocation34_spill] sm:$0xff] }
 0x41b   :  { %v6487_v10 = vadd.f32 %v3022_v23, %v8501_v6  ;;  %v3024_v63 = vpop.f32.mrb[77].mxu0  ;;  %3712 = vmatprep.mubr.bf16.mxu1 %v9270_v44  ;;  %v3378_v6 = vmax.f32 %v3322_v8, 0.0 }
 0x41c   :  { %v6488_v57 = vadd.f32 %v3024_v63, %v8505_v7  ;;  %v3026_v15 = vpop.f32.mrb[78].mxu0 }
 0x41d   :  { %v6489_v27 = vadd.f32 %v3026_v15, %v8507_v0  ;;  %v3028_v48 = vpop.f32.mrb[79].mxu0  ;;  %v3379_v0 = vmax.f32 %v3323_v59, 0.0 }
 0x41e   :  { %v3261_v20 = vmax.f32 %v6487_v10, %v6488_v57  ;;  %v6490_v43 = vadd.f32 %v3028_v48, %v8509_v9 }
 0x420   :  { %v3324_v47 = vadd.f32 %v8475_v2, %v3261_v20  ;;  %v3262_v34 = vmax.f32 %v6489_v27, %v6490_v43 }
 0x422   :  { %v3380_v60 = vmax.f32 %v3324_v47, 0.0  ;;  %v3325_v51 = vadd.f32 %v8475_v2, %v3262_v34  ;;  %v3032_v40 = vpop.f32.mrb[80].mxu0 }
 0x423   :  { %v6491_v7 = vadd.f32 %v3032_v40, %v8516_v45  ;;  %v3034_v38 = vpop.f32.mrb[81].mxu0 }
 0x424   :  { %v3434_v14 = vmax.f32 %v3378_v6, %v3380_v60  ;;  %v3381_v33 = vmax.f32 %v3325_v51, 0.0  ;;  %v6492_v58 = vadd.f32 %v3034_v38, %v8520_v41  ;;  %v3036_v39 = vpop.f32.mrb[82].mxu0 }
 0x425   :  { %v6493_v9 = vadd.f32 %v3036_v39, %v8522_v18  ;;  %v3038_v37 = vpop.f32.mrb[83].mxu0 }
 0x426   :  { %v3435_v22 = vmax.f32 %v3379_v0, %v3381_v33  ;;  %v3263_v5 = vmax.f32 %v6491_v7, %v6492_v58  ;;  %v6494_v23 = vadd.f32 %v3038_v37, %v9300_v62 }
 0x428   :  { %v8763_v10 = vpack.c.bf16 %v3435_v22, %v3434_v14  ;;  %v3264_v63 = vmax.f32 %v6493_v9, %v6494_v23  ;;  %v3326_v8 = vadd.f32 %v8475_v2, %v3263_v5 }
 0x42a   :  { %v3042_v57 = vpop.f32.mrb[84].mxu0  ;;  %3713 = vmatmul.mubr.bf16.gmra.mrb[144].mxu1 %v8763_v10  ;;  %v3327_v59 = vadd.f32 %v8475_v2, %v3264_v63 }
 0x42b   :  { %v6495_v45 = vadd.f32 %v3042_v57, %v8534_v56  ;;  %v3044_v15 = vpop.f32.mrb[85].mxu0  ;;  %3722 = vmatprep.mubr.bf16.mxu1 %v9270_v44  ;;  %v3382_v56 = vmax.f32 %v3326_v8, 0.0 }
 0x42c   :  { %v6496_v41 = vadd.f32 %v3044_v15, %v8541_v42  ;;  %v3046_v27 = vpop.f32.mrb[86].mxu0  ;;  %v7217_v15 = vld [vmem:[%s9221_s3 + $0x100] ss:$8 sps:$4 sm:$0xff]  }
 0x42d   :  { %v6497_v18 = vadd.f32 %v3046_v27, %v8543_v16  ;;  %v3048_v48 = vpop.f32.mrb[87].mxu0  ;;  %v3383_v16 = vmax.f32 %v3327_v59, 0.0 }
 0x42e   :  { %v3265_v20 = vmax.f32 %v6495_v45, %v6496_v41  ;;  %v6498_v43 = vadd.f32 %v3048_v48, %v8551_v3 }
 0x430   :  { %v3328_v47 = vadd.f32 %v8475_v2, %v3265_v20  ;;  %v3266_v34 = vmax.f32 %v6497_v18, %v6498_v43  ;;  %v9301_v20 = vld [vmem:[#allocation33_spill] sm:$0xff] }
 0x432   :  { %v3384_v6 = vmax.f32 %v3328_v47, 0.0  ;;  %v3329_v60 = vadd.f32 %v8475_v2, %v3266_v34  ;;  %v3052_v51 = vpop.f32.mrb[88].mxu0  ;;  %v7220_v34 = vld [vmem:[%s9221_s3 + $0x110] ss:$8 sps:$4 sm:$0xff]  }
 0x433   :  { %v6499_v42 = vadd.f32 %v3052_v51, %v8569_v19  ;;  %v3054_v40 = vpop.f32.mrb[89].mxu0 }
 0x434   :  { %v3438_v7 = vmax.f32 %v3382_v56, %v3384_v6  ;;  %v3385_v38 = vmax.f32 %v3329_v60, 0.0  ;;  %v6500_v0 = vadd.f32 %v3054_v40, %v8575_v46  ;;  %v3056_v14 = vpop.f32.mrb[90].mxu0 }
 0x435   :  { %v6501_v3 = vadd.f32 %v3056_v14, %v8581_v28  ;;  %v3058_v33 = vpop.f32.mrb[91].mxu0  ;;  %v7223_v14 = vld [vmem:[%s9221_s3 + $0x120] ss:$8 sps:$4 sm:$0xff]  }
 0x436   :  { %v3439_v58 = vmax.f32 %v3383_v16, %v3385_v38  ;;  %v3267_v39 = vmax.f32 %v6499_v42, %v6500_v0  ;;  %v6502_v9 = vadd.f32 %v3058_v33, %v8584_v1  ;;  %v7225_v42 = vld [vmem:[%s9221_s3 + $0x124] ss:$8 sps:$4 sm:$0xff]  }
 0x438   :  { %v3268_v37 = vmax.f32 %v6501_v3, %v6502_v9  ;;  %v8779_v22 = vpack.c.bf16 %v3439_v58, %v3438_v7  ;;  %v3330_v57 = vadd.f32 %v8475_v2, %v3267_v39  ;;  %v7228_v3 = vld [vmem:[%s9221_s3 + $0x134] ss:$8 sps:$4 sm:$0xff]   ;;  %v7226_v39 = vld [vmem:[%s9221_s3 + $0x130] ss:$8 sps:$4 sm:$0xff]  }
 0x43a   :  { %v3062_v5 = vpop.f32.mrb[92].mxu0  ;;  %3723 = vmatmul.mubr.bf16.gmra.mrb[148].mxu1 %v8779_v22 }
 0x43b   :  { %v6503_v19 = vadd.f32 %v3062_v5, %v8596_v26  ;;  %v3064_v62 = vpop.f32.mrb[93].mxu0  ;;  %3845 = vmatprep.mubr.bf16.mxu1 %v9270_v44  ;;  %v3331_v26 = vadd.f32 %v8475_v2, %v3268_v37  ;;  %v7231_v5 = vld [vmem:[%s9221_s3 + $0x144] ss:$8 sps:$4 sm:$0xff]  }
 0x43c   :  { %v6504_v46 = vadd.f32 %v3064_v62, %v8603_v32  ;;  %v3066_v23 = vpop.f32.mrb[94].mxu0  ;;  %v7222_v32 = vld [vmem:[%s9221_s3 + $0x114] ss:$8 sps:$4 sm:$0xff]  }
 0x43d   :  { %v6505_v28 = vadd.f32 %v3066_v23, %v8610_v49  ;;  %v3068_v63 = vpop.f32.mrb[95].mxu0  ;;  %v3386_v49 = vmax.f32 %v3330_v57, 0.0  ;;  %v3387_v56 = vmax.f32 %v3331_v26, 0.0  ;;  %v7229_v23 = vld [vmem:[%s9221_s3 + $0x140] ss:$8 sps:$4 sm:$0xff]  }
 0x43e   :  { %v3269_v1 = vmax.f32 %v6503_v19, %v6504_v46  ;;  %v6506_v45 = vadd.f32 %v3068_v63, %v8614_v24  ;;  %v9302_v24 = vld [vmem:[#allocation32_spill] sm:$0xff] }
 0x43f   :  { %v9303_v43 = vpack.c.bf16 %v9301_v20, %v9302_v24 }
 0x440   :  { %v3332_v41 = vadd.f32 %v8475_v2, %v3269_v1  ;;  %v3270_v27 = vmax.f32 %v6505_v28, %v6506_v45 }
 0x442   :  { %v3388_v18 = vmax.f32 %v3332_v41, 0.0  ;;  %v3333_v48 = vadd.f32 %v8475_v2, %v3270_v27  ;;  %v3072_v8 = vpop.f32.mrb[96].mxu0  ;;  %3846 = vmatmul.mubr.bf16.vlgmr.msra.gmra.mrb[112].mxu1 %v9303_v43  ;;  %v7232_v27 = vld [vmem:[%s9221_s3 + $0x150] ss:$8 sps:$4 sm:$0xff]  }
 0x443   :  { %v6507_v59 = vadd.f32 %v3072_v8, %v8625_v36  ;;  %v3074_v47 = vpop.f32.mrb[97].mxu0  ;;  %4074 = vmatpush1.bf16.msra.mxu1 %v7217_v15  ;;  %3855 = vmatprep.mubr.bf16.mxu1 %v9270_v44  ;;  %v9304_v15 = vld [vmem:[#allocation35_spill] sm:$0xff] }
 0x444   :  { %v3389_v6 = vmax.f32 %v3333_v48, 0.0  ;;  %v6508_v60 = vadd.f32 %v3074_v47, %v8631_v11  ;;  %v3076_v51 = vpop.f32.mrb[98].mxu0  ;;  %4075 = vmatprep.subr.bf16.mxu1 %v7222_v32  ;;  %v3442_v40 = vmax.f32 %v3386_v49, %v3388_v18  ;;  %v7235_v47 = vld [vmem:[%s9221_s3 + $0x160] ss:$8 sps:$4 sm:$0xff]  }
 0x445   :  { %v6509_v36 = vadd.f32 %v3076_v51, %v8638_v29  ;;  %v3078_v16 = vpop.f32.mrb[99].mxu0  ;;  %v7238_v51 = vld [vmem:[%s9221_s3 + $0x170] ss:$8 sps:$4 sm:$0xff]  }
 0x446   :  { %v3271_v7 = vmax.f32 %v6507_v59, %v6508_v60  ;;  %v6510_v38 = vadd.f32 %v3078_v16, %v8641_v21  ;;  %v3443_v0 = vmax.f32 %v3387_v56, %v3389_v6 }
 0x447   :  { %4076 = vmatpush1.bf16.msra.mxu1 %v7220_v34  ;;  %v7240_v34 = vld [vmem:[%s9221_s3 + $0x174] ss:$8 sps:$4 sm:$0xff]  }
 0x448   :  { %v3272_v11 = vmax.f32 %v6509_v36, %v6510_v38  ;;  %4077 = vmatprep.subr.bf16.mxu1 %v7225_v42  ;;  %v8817_v33 = vpack.c.bf16 %v3443_v0, %v3442_v40  ;;  %v7243_v36 = vld [vmem:[%s9221_s3 + $0x184] ss:$8 sps:$4 sm:$0xff]  }
 0x44a   :  { %v3082_v58 = vpop.f32.mrb[100].mxu0  ;;  %3856 = vmatmul.mubr.bf16.gmra.mrb[116].mxu1 %v8536_v50 }
 0x44b   :  { %v6511_v29 = vadd.f32 %v3082_v58, %v8646_v4  ;;  %v3084_v21 = vpop.f32.mrb[101].mxu0  ;;  %3865 = vmatprep.mubr.bf16.mxu1 %v9270_v44  ;;  %4078 = vmatpush1.bf16.msra.mxu1 %v7223_v14  ;;  %v3334_v4 = vadd.f32 %v8475_v2, %v3271_v7  ;;  %v9306_v14 = vld [vmem:[#allocation38_spill] sm:$0xff] }
 0x44c   :  { %v6512_v9 = vadd.f32 %v3084_v21, %v8650_v17  ;;  %v3086_v37 = vpop.f32.mrb[102].mxu0  ;;  %4079 = vmatprep.subr.bf16.mxu1 %v7228_v3  ;;  %v3335_v17 = vadd.f32 %v8475_v2, %v3272_v11 }
 0x44d   :  { %v6513_v50 = vadd.f32 %v3086_v37, %v8653_v25  ;;  %v3088_v19 = vpop.f32.mrb[103].mxu0  ;;  %v7234_v25 = vld [vmem:[%s9221_s3 + $0x154] ss:$8 sps:$4 sm:$0xff]   ;;  %v3390_v57 = vmax.f32 %v3334_v4, 0.0  ;;  %v9308_v4 = vld [vmem:[#allocation9_spill] sm:$0xff] }
 0x44e   :  { %v3273_v62 = vmax.f32 %v6511_v29, %v6512_v9  ;;  %v6514_v46 = vadd.f32 %v3088_v19, %v8656_v53  ;;  %v3391_v32 = vmax.f32 %v3335_v17, 0.0  ;;  %v9307_v9 = vld [vmem:[#allocation37_spill] sm:$0xff]  ;;  %v7244_v17 = vld [vmem:[%s9221_s3 + $0x190] ss:$8 sps:$4 sm:$0xff]  }
 0x44f   :  { %4080 = vmatpush1.bf16.msra.mxu1 %v7226_v39 }
 0x450   :  { %v3336_v28 = vadd.f32 %v8475_v2, %v3273_v62  ;;  %v3274_v63 = vmax.f32 %v6513_v50, %v6514_v46  ;;  %4081 = vmatprep.subr.bf16.mxu1 %v7231_v5  ;;  %v9309_v62 = vld [vmem:[#allocation10_spill] sm:$0xff] }
 0x451   :  { %v7241_v46 = vld [vmem:[%s9221_s3 + $0x180] ss:$8 sps:$4 sm:$0xff]  }
 0x452   :  { %v3392_v1 = vmax.f32 %v3336_v28, 0.0  ;;  %v3337_v45 = vadd.f32 %v8475_v2, %v3274_v63  ;;  %v3092_v53 = vpop.f32.mrb[104].mxu0  ;;  %3866 = vmatmul.mubr.bf16.gmra.mrb[120].mxu1 %v9304_v15  ;;  %v7237_v2 = vld [vmem:[%s9221_s3 + $0x164] ss:$8 sps:$4 sm:$0xff]   ;;  %v7247_v63 = vld [vmem:[%s9221_s3 + $0x1a0] ss:$8 sps:$4 sm:$0xff]  }
 0x453   :  { %v6515_v26 = vadd.f32 %v3092_v53, %v8664_v35  ;;  %v3094_v41 = vpop.f32.mrb[105].mxu0  ;;  %3875 = vmatprep.mubr.bf16.mxu1 %v9270_v44  ;;  %4082 = vmatpush1.bf16.msra.mxu1 %v7229_v23  ;;  %v7246_v23 = vld [vmem:[%s9221_s3 + $0x194] ss:$8 sps:$4 sm:$0xff]   ;;  %v7249_v28 = vld [vmem:[%s9221_s3 + $0x1a4] ss:$8 sps:$4 sm:$0xff]  }
 0x454   :  { %v3393_v49 = vmax.f32 %v3337_v45, 0.0  ;;  %v6516_v18 = vadd.f32 %v3094_v41, %v8667_v30  ;;  %v3096_v48 = vpop.f32.mrb[106].mxu0  ;;  %4083 = vmatprep.subr.bf16.mxu1 %v7234_v25  ;;  %v3446_v8 = vmax.f32 %v3390_v57, %v3392_v1  ;;  %v7252_v25 = vld [vmem:[%s9221_s3 + $0x1b4] ss:$8 sps:$4 sm:$0xff]   ;;  %v7250_v57 = vld [vmem:[%s9221_s3 + $0x1b0] ss:$8 sps:$4 sm:$0xff]  }
 0x455   :  { %v6517_v35 = vadd.f32 %v3096_v48, %v8670_v52  ;;  %v3098_v20 = vpop.f32.mrb[107].mxu0  ;;  %v9305_v52 = vld [vmem:[#allocation36_spill] sm:$0xff]  ;;  %v7255_v1 = vld [vmem:[%s9221_s3 + $0x1c4] ss:$8 sps:$4 sm:$0xff]   ;;  %v7253_v45 = vld [vmem:[%s9221_s3 + $0x1c0] ss:$8 sps:$4 sm:$0xff]  }
 0x456   :  { %v3275_v24 = vmax.f32 %v6515_v26, %v6516_v18  ;;  %v6518_v43 = vadd.f32 %v3098_v20, %v8673_v61  ;;  %v3447_v59 = vmax.f32 %v3391_v32, %v3393_v49  ;;  %v7258_v53 = vld [vmem:[%s9221_s3 + $0x1d4] ss:$8 sps:$4 sm:$0xff]   ;;  %v7261_v26 = vld [vmem:[%s9221_s3 + $0x1e4] ss:$8 sps:$4 sm:$0xff]   ;;  %v7259_v41 = vld [vmem:[%s9221_s3 + $0x1e0] ss:$8 sps:$4 sm:$0xff]  }
 0x457   :  { %4084 = vmatpush1.bf16.msra.mxu1 %v7232_v27  ;;  %v7264_v27 = vld [vmem:[%s9221_s3 + $0x1f4] ss:$8 sps:$4 sm:$0xff]   ;;  %v7262_v32 = vld [vmem:[%s9221_s3 + $0x1f0] ss:$8 sps:$4 sm:$0xff]   ;;  %v7267_v49 = vld [vmem:[%s9221_s3 + $0x204] ss:$8 sps:$4 sm:$0xff]  }
 0x458   :  { %v3276_v30 = vmax.f32 %v6517_v35, %v6518_v43  ;;  %4085 = vmatprep.subr.bf16.mxu1 %v7237_v2  ;;  %v8859_v56 = vpack.c.bf16 %v3447_v59, %v3446_v8  ;;  %v7265_v18 = vld [vmem:[%s9221_s3 + $0x200] ss:$8 sps:$4 sm:$0xff]   ;;  %v7270_v48 = vld [vmem:[%s9221_s3 + $0x214] ss:$8 sps:$4 sm:$0xff]   ;;  %v7268_v2 = vld [vmem:[%s9221_s3 + $0x210] ss:$8 sps:$4 sm:$0xff]  }
 0x459   :  { %v7273_v8 = vld [vmem:[%s9221_s3 + $0x224] ss:$8 sps:$4 sm:$0xff]   ;;  %v7271_v35 = vld [vmem:[%s9221_s3 + $0x220] ss:$8 sps:$4 sm:$0xff]   ;;  %v7276_v20 = vld [vmem:[%s9221_s3 + $0x234] ss:$8 sps:$4 sm:$0xff]  }
 0x45a   :  { %v3102_v6 = vpop.f32.mrb[108].mxu0  ;;  %3876 = vmatmul.mubr.bf16.gmra.mrb[124].mxu1 %v9305_v52  ;;  %v7279_v43 = vld [vmem:[%s9221_s3 + $0x244] ss:$8 sps:$4 sm:$0xff]   ;;  %v7277_v59 = vld [vmem:[%s9221_s3 + $0x240] ss:$8 sps:$4 sm:$0xff]  }
 0x45b   :  { %v6519_v60 = vadd.f32 %v3102_v6, %v8678_v13  ;;  %v3104_v61 = vpop.f32.mrb[109].mxu0  ;;  %3885 = vmatprep.mubr.bf16.mxu1 %v9270_v44  ;;  %4086 = vmatpush1.bf16.msra.mxu1 %v7235_v47  ;;  %v7355_v13 = vld [vmem:[%s9220_s2] ss:$0 sm:$0xff]  ;;  %v7282_v47 = vld [vmem:[%s9221_s3 + $0x254] ss:$8 sps:$4 sm:$0xff]  }
 0x45c   :  { %v6520_v42 = vadd.f32 %v3104_v61, %v8682_v54  ;;  %v3106_v40 = vpop.f32.mrb[110].mxu0  ;;  %4087 = vmatprep.subr.bf16.mxu1 %v7240_v34  ;;  %v3338_v38 = vadd.f32 %v7355_v13, %v3275_v24  ;;  %v3339_v3 = vadd.f32 %v7355_v13, %v3276_v30  ;;  %v7274_v24 = vld [vmem:[%s9221_s3 + $0x230] ss:$8 sps:$4 sm:$0xff]   ;;  %v7285_v34 = vld [vmem:[%s9221_s3 + $0x264] ss:$8 sps:$4 sm:$0xff]   ;;  %v7409_v61 = vmov 0.0  }
 0x45d   :  { %v6521_v16 = vadd.f32 %v3106_v40, %v8686_v55  ;;  %v3108_v7 = vpop.f32.mrb[111].mxu0  ;;  %v7280_v30 = vld [vmem:[%s9221_s3 + $0x250] ss:$8 sps:$4 sm:$0xff]   ;;  %v7283_v6 = vld [vmem:[%s9221_s3 + $0x260] ss:$8 sps:$4 sm:$0xff]  }
 0x45e   :  { %v3277_v0 = vmax.f32 %v6519_v60, %v6520_v42  ;;  %v6522_v11 = vadd.f32 %v3108_v7, %v9306_v14  ;;  %v3394_v29 = vmax.f32 %v3338_v38, 0.0  ;;  %v3395_v55 = vmax.f32 %v3339_v3, 0.0  ;;  %v7286_v60 = vld [vmem:[%s9221_s3 + $0x270] ss:$8 sps:$4 sm:$0xff]   ;;  %v7290_v42 = vld [vmem:[#allocation3 + $0x48] sm:$0xff]  }
 0x45f   :  { %4088 = vmatpush1.bf16.msra.mxu1 %v7238_v51  ;;  %v7289_v51 = vld [vmem:[#allocation3 + $0x40] sm:$0xff]   ;;  %v7291_v40 = vld [vmem:[#allocation3 + $0x50] sm:$0xff]  }
 0x460   :  { %v3340_v54 = vadd.f32 %v7355_v13, %v3277_v0  ;;  %v3278_v58 = vmax.f32 %v6521_v16, %v6522_v11  ;;  %4373 = vmatprep.subr.bf16.mxu1 %v7243_v36  ;;  %v7292_v36 = vld [vmem:[#allocation3 + $0x58] sm:$0xff]   ;;  %v7293_v16 = vld [vmem:[#allocation3 + $0x60] sm:$0xff]  }
 0x461   :  { %v9062_v38 = vld [vmem:[%s9222_s4] ss:$0 sm:$0xff] }
 0x462   :  { %v3396_v21 = vmax.f32 %v3340_v54, 0.0  ;;  %v3341_v39 = vadd.f32 %v7355_v13, %v3278_v58  ;;  %3886 = vmatmul.mubr.bf16.gmra.mrb[128].mxu1 %v9307_v9 }
 0x463   :  { %3895 = vmatprep.mubr.bf16.mxu1 %v9270_v44 }
 0x464   :  { %v3397_v37 = vmax.f32 %v3341_v39, 0.0  ;;  %v8878_v5 = vmax.f32 %v3394_v29, %v3396_v21 }
 0x466   :  { %v8880_v50 = vmax.f32 %v3395_v55, %v3397_v37 }
 0x468   :  { %v4575_v19 = vpack.c.bf16 %v8880_v50, %v8878_v5 }
 0x46a   :  { %3896 = vmatmul.mubr.bf16.gmra.mrb[132].mxu1 %v9308_v4 }
 0x46b   :  { %3905 = vmatprep.mubr.bf16.mxu1 %v9270_v44 }
 0x472   :  { %3906 = vmatmul.mubr.bf16.gmra.mrb[136].mxu1 %v9309_v62 }
 0x473   :  { %3915 = vmatprep.mubr.bf16.mxu1 %v9270_v44 }
 0x47a   :  { %3916 = vmatmul.mubr.bf16.gmra.mrb[140].mxu1 %v8731_v12 }
 0x47b   :  { %3925 = vmatprep.mubr.bf16.mxu1 %v9270_v44 }
 0x482   :  { %3926 = vmatmul.mubr.bf16.gmra.mrb[144].mxu1 %v8747_v31 }
 0x483   :  { %3935 = vmatprep.mubr.bf16.mxu1 %v9270_v44 }
 0x48a   :  { %3936 = vmatmul.mubr.bf16.gmra.mrb[148].mxu1 %v8763_v10 }
 0x48b   :  { %4105 = vmatprep.mubr.bf16.mxu1 %v9270_v44 }
 0x492   :  { %4106 = vmatmul.mubr.bf16.vlgmr.msra.gmra.mrb[112].mxu1 %v9304_v15  ;;  %v7256_v15 = vld [vmem:[%s9221_s3 + $0x1d0] ss:$8 sps:$4 sm:$0xff]  }
 0x493   :  { %4374 = vmatpush1.bf16.msra.mxu1 %v7241_v46  ;;  %4115 = vmatprep.mubr.bf16.mxu1 %v9270_v44 }
 0x494   :  { %4375 = vmatprep.subr.bf16.mxu1 %v7246_v23 }
 0x497   :  { %4376 = vmatpush1.bf16.msra.mxu1 %v7244_v17 }
 0x498   :  { %4377 = vmatprep.subr.bf16.mxu1 %v7249_v28 }
 0x49a   :  { %4116 = vmatmul.mubr.bf16.gmra.mrb[116].mxu1 %v9305_v52 }
 0x49b   :  { %4125 = vmatprep.mubr.bf16.mxu1 %v9270_v44  ;;  %4378 = vmatpush1.bf16.msra.mxu1 %v7247_v63 }
 0x49c   :  { %4379 = vmatprep.subr.bf16.mxu1 %v7252_v25 }
 0x49f   :  { %4380 = vmatpush1.bf16.msra.mxu1 %v7250_v57 }
 0x4a0   :  { %4381 = vmatprep.subr.bf16.mxu1 %v7255_v1 }
 0x4a2   :  { %4126 = vmatmul.mubr.bf16.gmra.mrb[120].mxu1 %v9307_v9 }
 0x4a3   :  { %4135 = vmatprep.mubr.bf16.mxu1 %v9270_v44  ;;  %4382 = vmatpush1.bf16.msra.mxu1 %v7253_v45 }
 0x4a4   :  { %4383 = vmatprep.subr.bf16.mxu1 %v7258_v53 }
 0x4a7   :  { %4384 = vmatpush1.bf16.msra.mxu1 %v7256_v15 }
 0x4a8   :  { %4385 = vmatprep.subr.bf16.mxu1 %v7261_v26 }
 0x4aa   :  { %4136 = vmatmul.mubr.bf16.gmra.mrb[124].mxu1 %v9308_v4 }
 0x4ab   :  { %4145 = vmatprep.mubr.bf16.mxu1 %v9270_v44  ;;  %4386 = vmatpush1.bf16.msra.mxu1 %v7259_v41 }
 0x4ac   :  { %4387 = vmatprep.subr.bf16.mxu1 %v7264_v27 }
 0x4af   :  { %4388 = vmatpush1.bf16.msra.mxu1 %v7262_v32 }
 0x4b0   :  { %4673 = vmatprep.subr.bf16.mxu1 %v7267_v49 }
 0x4b2   :  { %4146 = vmatmul.mubr.bf16.gmra.mrb[128].mxu1 %v9309_v62 }
 0x4b3   :  { %4155 = vmatprep.mubr.bf16.mxu1 %v9270_v44 }
 0x4ba   :  { %4156 = vmatmul.mubr.bf16.gmra.mrb[132].mxu1 %v8731_v12 }
 0x4bb   :  { %4165 = vmatprep.mubr.bf16.mxu1 %v9270_v44 }
 0x4c2   :  { %4166 = vmatmul.mubr.bf16.gmra.mrb[136].mxu1 %v8747_v31 }
 0x4c3   :  { %4175 = vmatprep.mubr.bf16.mxu1 %v9270_v44 }
 0x4ca   :  { %4176 = vmatmul.mubr.bf16.gmra.mrb[140].mxu1 %v8763_v10 }
 0x4cb   :  { %4185 = vmatprep.mubr.bf16.mxu1 %v9270_v44 }
 0x4d2   :  { %4186 = vmatmul.mubr.bf16.gmra.mrb[144].mxu1 %v8779_v22 }
 0x4d3   :  { %4195 = vmatprep.mubr.bf16.mxu1 %v9270_v44 }
 0x4da   :  { %4196 = vmatmul.mubr.bf16.gmra.mrb[148].mxu1 %v8817_v33 }
 0x4db   :  { %4405 = vmatprep.mubr.bf16.mxu1 %v9270_v44 }
 0x4e2   :  { %4406 = vmatmul.mubr.bf16.vlgmr.msra.gmra.mrb[112].mxu1 %v9305_v52  ;;  %v7288_v52 = vld [vmem:[%s9221_s3 + $0x274] ss:$8 sps:$4 sm:$0xff]  }
 0x4e3   :  { %4674 = vmatpush1.bf16.msra.mxu1 %v7265_v18  ;;  %4415 = vmatprep.mubr.bf16.mxu1 %v9270_v44 }
 0x4e4   :  { %4675 = vmatprep.subr.bf16.mxu1 %v7270_v48 }
 0x4e7   :  { %4676 = vmatpush1.bf16.msra.mxu1 %v7268_v2 }
 0x4e8   :  { %4677 = vmatprep.subr.bf16.mxu1 %v7273_v8 }
 0x4ea   :  { %4416 = vmatmul.mubr.bf16.gmra.mrb[116].mxu1 %v9307_v9 }
 0x4eb   :  { %4425 = vmatprep.mubr.bf16.mxu1 %v9270_v44  ;;  %4678 = vmatpush1.bf16.msra.mxu1 %v7271_v35 }
 0x4ec   :  { %4679 = vmatprep.subr.bf16.mxu1 %v7276_v20 }
 0x4ef   :  { %4680 = vmatpush1.bf16.msra.mxu1 %v7274_v24 }
 0x4f0   :  { %4681 = vmatprep.subr.bf16.mxu1 %v7279_v43 }
 0x4f2   :  { %4426 = vmatmul.mubr.bf16.gmra.mrb[120].mxu1 %v9308_v4 }
 0x4f3   :  { %4435 = vmatprep.mubr.bf16.mxu1 %v9270_v44  ;;  %4682 = vmatpush1.bf16.msra.mxu1 %v7277_v59 }
 0x4f4   :  { %4683 = vmatprep.subr.bf16.mxu1 %v7282_v47 }
 0x4f7   :  { %4684 = vmatpush1.bf16.msra.mxu1 %v7280_v30 }
 0x4f8   :  { %4685 = vmatprep.subr.bf16.mxu1 %v7285_v34  ;;  %v7297_v34 = vld [vmem:[#allocation3] sm:$0xff]  }
 0x4fa   :  { %4436 = vmatmul.mubr.bf16.gmra.mrb[124].mxu1 %v9309_v62 }
 0x4fb   :  { %4445 = vmatprep.mubr.bf16.mxu1 %v9270_v44  ;;  %4686 = vmatpush1.bf16.msra.mxu1 %v7283_v6 }
 0x4fc   :  { %4687 = vmatprep.subr.bf16.mxu1 %v7288_v52 }
 0x4ff   :  { %4688 = vmatpush1.bf16.msra.mxu1 %v7286_v60  ;;  %v7298_v60 = vld [vmem:[#allocation3 + $0x8] sm:$0xff]  }
 0x500   :  { %6267 = vmatprep.subr.bf16.mxu1 %v7409_v61 }
 0x502   :  { %4446 = vmatmul.mubr.bf16.gmra.mrb[128].mxu1 %v8731_v12 }
 0x503   :  { %4455 = vmatprep.mubr.bf16.mxu1 %v9270_v44 }
 0x50a   :  { %4456 = vmatmul.mubr.bf16.gmra.mrb[132].mxu1 %v8747_v31 }
 0x50b   :  { %4465 = vmatprep.mubr.bf16.mxu1 %v9270_v44 }
 0x512   :  { %4466 = vmatmul.mubr.bf16.gmra.mrb[136].mxu1 %v8763_v10 }
 0x513   :  { %4475 = vmatprep.mubr.bf16.mxu1 %v9270_v44 }
 0x51a   :  { %4476 = vmatmul.mubr.bf16.gmra.mrb[140].mxu1 %v8779_v22 }
 0x51b   :  { %4485 = vmatprep.mubr.bf16.mxu1 %v9270_v44 }
 0x522   :  { %4486 = vmatmul.mubr.bf16.gmra.mrb[144].mxu1 %v8817_v33 }
 0x523   :  { %4495 = vmatprep.mubr.bf16.mxu1 %v9270_v44 }
 0x52a   :  { %4496 = vmatmul.mubr.bf16.gmra.mrb[148].mxu1 %v8859_v56 }
 0x52b   :  { %4705 = vmatprep.mubr.bf16.mxu1 %v9270_v44 }
 0x532   :  { %4706 = vmatmul.mubr.bf16.vlgmr.msra.gmra.mrb[112].mxu1 %v9307_v9 }
 0x533   :  { %4715 = vmatprep.mubr.bf16.mxu1 %v9270_v44  ;;  %6268 = vmatpush3.bf16.msra.mxu1 %v7289_v51 }
 0x534   :  { %6269 = vmatprep.subr.bf16.mxu1 %v7409_v61 }
 0x537   :  { %6270 = vmatpush3.bf16.msra.mxu1 %v7290_v42 }
 0x538   :  { %6271 = vmatprep.subr.bf16.mxu1 %v7409_v61 }
 0x53a   :  { %4716 = vmatmul.mubr.bf16.gmra.mrb[116].mxu1 %v9308_v4 }
 0x53b   :  { %4725 = vmatprep.mubr.bf16.mxu1 %v9270_v44  ;;  %6272 = vmatpush3.bf16.msra.mxu1 %v7291_v40 }
 0x53c   :  { %6273 = vmatprep.subr.bf16.mxu1 %v7409_v61 }
 0x53f   :  { %6274 = vmatpush3.bf16.msra.mxu1 %v7292_v36 }
 0x540   :  { %6275 = vmatprep.subr.bf16.mxu1 %v7409_v61 }
 0x542   :  { %4726 = vmatmul.mubr.bf16.gmra.mrb[120].mxu1 %v9309_v62 }
 0x543   :  { %4735 = vmatprep.mubr.bf16.mxu1 %v9270_v44  ;;  %6276 = vmatpush3.bf16.msra.mxu1 %v7293_v16 }
 0x544   :  { %6277 = vmatprep.subr.bf16.mxu1 %v7409_v61 }
 0x54a   :  { %4736 = vmatmul.mubr.bf16.gmra.mrb[124].mxu1 %v8731_v12  ;;  %v7294_v12 = vld [vmem:[#allocation3 + $0x68] sm:$0xff]  }
 0x54b   :  { %4745 = vmatprep.mubr.bf16.mxu1 %v9270_v44  ;;  %6278 = vmatpush3.bf16.msra.mxu1 %v7294_v12 }
 0x54c   :  { %6279 = vmatprep.subr.bf16.mxu1 %v7409_v61 }
 0x552   :  { %4746 = vmatmul.mubr.bf16.gmra.mrb[128].mxu1 %v8747_v31  ;;  %v7295_v31 = vld [vmem:[#allocation3 + $0x70] sm:$0xff]  }
 0x553   :  { %4755 = vmatprep.mubr.bf16.mxu1 %v9270_v44  ;;  %6280 = vmatpush3.bf16.msra.mxu1 %v7295_v31  ;;  %v7299_v31 = vld [vmem:[#allocation3 + $0x10] sm:$0xff]  }
 0x554   :  { %6281 = vmatprep.subr.bf16.mxu1 %v7409_v61 }
 0x55a   :  { %4756 = vmatmul.mubr.bf16.gmra.mrb[132].mxu1 %v8763_v10  ;;  %v7296_v10 = vld [vmem:[#allocation3 + $0x78] sm:$0xff]  }
 0x55b   :  { %4765 = vmatprep.mubr.bf16.mxu1 %v9270_v44  ;;  %6282 = vmatpush3.bf16.msra.mxu1 %v7296_v10 }
 0x55c   :  { %6287 = vmatprep.subr.bf16.mxu1 %v7409_v61 }
 0x562   :  { %4766 = vmatmul.mubr.bf16.gmra.mrb[136].mxu1 %v8779_v22 }
 0x563   :  { %4775 = vmatprep.mubr.bf16.mxu1 %v9270_v44 }
 0x56a   :  { %4776 = vmatmul.mubr.bf16.gmra.mrb[140].mxu1 %v8817_v33 }
 0x56b   :  { %4785 = vmatprep.mubr.bf16.mxu1 %v9270_v44 }
 0x572   :  { %4786 = vmatmul.mubr.bf16.gmra.mrb[144].mxu1 %v8859_v56 }
 0x573   :  { %4795 = vmatprep.mubr.bf16.mxu1 %v9270_v44 }
 0x57a   :  { %4796 = vmatmul.mubr.bf16.gmra.mrb[148].mxu1 %v4575_v19 }
 0x57b   :  { %6283 = vmatprep.mubr.msk.bf16.mxu1 %vm7410_vm1, %v7409_v61 }
 0x605   :  { %v4707_v44 = vpop.f32.mrb[112].mxu1 }
 0x606   :  { %v4709_v22 = vpop.f32.mrb[113].mxu1 }
 0x607   :  { %v4846_v33 = vmax.f32 %v4707_v44, %v4709_v22  ;;  %v4711_v56 = vpop.f32.mrb[114].mxu1 }
 0x608   :  { %v4713_v7 = vpop.f32.mrb[115].mxu1 }
 0x609   :  { %v4847_v13 = vmax.f32 %v4711_v56, %v4713_v7  ;;  %v4873_v11 = vadd.f32 %v9062_v38, %v4846_v33 }
 0x60b   :  { %v4874_v29 = vadd.f32 %v9062_v38, %v4847_v13  ;;  %v4893_v9 = vmax.f32 %v4873_v11, 0.0  ;;  %v7300_v13 = vld [vmem:[#allocation3 + $0x18] sm:$0xff]  }
 0x60d   :  { %v4717_v0 = vpop.f32.mrb[116].mxu1  ;;  %v4894_v5 = vmax.f32 %v4874_v29, 0.0 }
 0x60e   :  { %v4719_v14 = vpop.f32.mrb[117].mxu1 }
 0x60f   :  { %v4848_v3 = vmax.f32 %v4717_v0, %v4719_v14  ;;  %v4721_v54 = vpop.f32.mrb[118].mxu1 }
 0x610   :  { %v4723_v58 = vpop.f32.mrb[119].mxu1 }
 0x611   :  { %v4875_v21 = vadd.f32 %v9062_v38, %v4848_v3  ;;  %v4849_v39 = vmax.f32 %v4721_v54, %v4723_v58 }
 0x613   :  { %v4895_v55 = vmax.f32 %v4875_v21, 0.0  ;;  %v4876_v37 = vadd.f32 %v9062_v38, %v4849_v39 }
 0x615   :  { %v9068_v50 = vmax.f32 %v4893_v9, %v4895_v55  ;;  %v4896_v19 = vmax.f32 %v4876_v37, 0.0  ;;  %v4727_v4 = vpop.f32.mrb[120].mxu1  ;;  %v7301_v9 = vld [vmem:[#allocation3 + $0x20] sm:$0xff]  }
 0x616   :  { %v4729_v62 = vpop.f32.mrb[121].mxu1 }
 0x617   :  { %v9070_v46 = vmax.f32 %v4894_v5, %v4896_v19  ;;  %v4850_v23 = vmax.f32 %v4727_v4, %v4729_v62  ;;  %v4731_v17 = vpop.f32.mrb[122].mxu1  ;;  %v7302_v5 = vld [vmem:[#allocation3 + $0x28] sm:$0xff]  }
 0x618   :  { %v4733_v28 = vpop.f32.mrb[123].mxu1 }
 0x619   :  { %v4915_v63 = vpack.c.bf16 %v9070_v46, %v9068_v50  ;;  %v4851_v25 = vmax.f32 %v4731_v17, %v4733_v28  ;;  %v4877_v45 = vadd.f32 %v9062_v38, %v4850_v23 }
 0x61b   :  { %v4878_v41 = vadd.f32 %v9062_v38, %v4851_v25  ;;  %v4897_v49 = vmax.f32 %v4877_v45, 0.0  ;;  %v7303_v25 = vld [vmem:[#allocation3 + $0x30] sm:$0xff]  }
 0x61d   :  { %v4737_v57 = vpop.f32.mrb[124].mxu1  ;;  %v4898_v2 = vmax.f32 %v4878_v41, 0.0  ;;  %v7304_v41 = vld [vmem:[#allocation3 + $0x38] sm:$0xff]  }
 0x61e   :  { %v4739_v1 = vpop.f32.mrb[125].mxu1 }
 0x61f   :  { %v4852_v53 = vmax.f32 %v4737_v57, %v4739_v1  ;;  %v4741_v15 = vpop.f32.mrb[126].mxu1 }
 0x620   :  { %v4743_v26 = vpop.f32.mrb[127].mxu1 }
 0x621   :  { %v4879_v27 = vadd.f32 %v9062_v38, %v4852_v53  ;;  %v4853_v32 = vmax.f32 %v4741_v15, %v4743_v26 }
 0x623   :  { %v4899_v18 = vmax.f32 %v4879_v27, 0.0  ;;  %v4880_v48 = vadd.f32 %v9062_v38, %v4853_v32 }
 0x625   :  { %v4932_v8 = vmax.f32 %v4897_v49, %v4899_v18  ;;  %v4900_v35 = vmax.f32 %v4880_v48, 0.0  ;;  %v4747_v20 = vpop.f32.mrb[128].mxu1 }
 0x626   :  { %v4749_v24 = vpop.f32.mrb[129].mxu1 }
 0x627   :  { %v4933_v43 = vmax.f32 %v4898_v2, %v4900_v35  ;;  %v4854_v59 = vmax.f32 %v4747_v20, %v4749_v24  ;;  %v4751_v47 = vpop.f32.mrb[130].mxu1  ;;  %v7305_v24 = vld [vmem:[#allocation3 + $0x80] sm:$0xff]  }
 0x628   :  { %v4753_v30 = vpop.f32.mrb[131].mxu1 }
 0x629   :  { %v4934_v6 = vpack.c.bf16 %v4933_v43, %v4932_v8  ;;  %v4855_v52 = vmax.f32 %v4751_v47, %v4753_v30  ;;  %v4881_v40 = vadd.f32 %v9062_v38, %v4854_v59  ;;  %v7306_v47 = vld [vmem:[#allocation3 + $0x88] sm:$0xff]  }
 0x62b   :  { %6284 = vmatmul.mubr.bf16.vlgmr.msra.gmra.mrb[152].mxu1 %v4934_v6  ;;  %v4882_v10 = vadd.f32 %v9062_v38, %v4855_v52  ;;  %v4901_v33 = vmax.f32 %v4881_v40, 0.0 }
 0x62c   :  { %6288 = vmatpush3.bf16.msra.mxu1 %v7297_v34  ;;  %6303 = vmatprep.mubr.msk.bf16.mxu1 %vm7410_vm1, %v7409_v61 }
 0x62d   :  { %v4757_v51 = vpop.f32.mrb[132].mxu1  ;;  %6289 = vmatprep.subr.bf16.mxu1 %v7409_v61  ;;  %v4902_v0 = vmax.f32 %v4882_v10, 0.0 }
 0x62e   :  { %v4759_v42 = vpop.f32.mrb[133].mxu1 }
 0x62f   :  { %v4856_v36 = vmax.f32 %v4757_v51, %v4759_v42  ;;  %v4761_v16 = vpop.f32.mrb[134].mxu1  ;;  %v7307_v42 = vld [vmem:[#allocation3 + $0x90] sm:$0xff]  }
 0x630   :  { %6290 = vmatpush3.bf16.msra.mxu1 %v7298_v60  ;;  %v4763_v12 = vpop.f32.mrb[135].mxu1 }
 0x631   :  { %v4883_v44 = vadd.f32 %v9062_v38, %v4856_v36  ;;  %v4857_v22 = vmax.f32 %v4761_v16, %v4763_v12  ;;  %6291 = vmatprep.subr.bf16.mxu1 %v7409_v61  ;;  %v7308_v12 = vld [vmem:[#allocation3 + $0x98] sm:$0xff]  }
 0x633   :  { %v4903_v56 = vmax.f32 %v4883_v44, 0.0  ;;  %v4884_v7 = vadd.f32 %v9062_v38, %v4857_v22 }
 0x634   :  { %6292 = vmatpush3.bf16.msra.mxu1 %v7299_v31 }
 0x635   :  { %v9086_v14 = vmax.f32 %v4901_v33, %v4903_v56  ;;  %v4904_v11 = vmax.f32 %v4884_v7, 0.0  ;;  %v4767_v3 = vpop.f32.mrb[136].mxu1  ;;  %6293 = vmatprep.subr.bf16.mxu1 %v7409_v61  ;;  %v7309_v33 = vld [vmem:[#allocation3 + $0xa0] sm:$0xff]   ;;  %v7310_v7 = vld [vmem:[#allocation3 + $0xa8] sm:$0xff]  }
 0x636   :  { %v4769_v54 = vpop.f32.mrb[137].mxu1 }
 0x637   :  { %v9089_v58 = vmax.f32 %v4902_v0, %v4904_v11  ;;  %v4858_v29 = vmax.f32 %v4767_v3, %v4769_v54  ;;  %v4771_v21 = vpop.f32.mrb[138].mxu1  ;;  %v7313_v0 = vld [vmem:[#allocation3 + $0xc0] sm:$0xff]   ;;  %v7314_v11 = vld [vmem:[#allocation3 + $0xc8] sm:$0xff]   ;;  %v7315_v3 = vld [vmem:[#allocation3 + $0xd0] sm:$0xff]  }
 0x638   :  { %6294 = vmatpush3.bf16.msra.mxu1 %v7300_v13  ;;  %v4773_v39 = vpop.f32.mrb[139].mxu1  ;;  %v7312_v13 = vld [vmem:[#allocation3 + $0xb8] sm:$0xff]  }
 0x639   :  { %v5132_v55 = vpack.c.bf16 %v9089_v58, %v9086_v14  ;;  %v4859_v37 = vmax.f32 %v4771_v21, %v4773_v39  ;;  %6295 = vmatprep.subr.bf16.mxu1 %v7409_v61  ;;  %v4885_v62 = vadd.f32 %v9062_v38, %v4858_v29  ;;  %v7316_v54 = vld [vmem:[#allocation3 + $0xd8] sm:$0xff]   ;;  %v7317_v29 = vld [vmem:[#allocation3 + $0xe0] sm:$0xff]   ;;  %v7318_v14 = vld [vmem:[#allocation3 + $0xe8] sm:$0xff]  }
 0x63a   :  { %v7319_v58 = vld [vmem:[#allocation3 + $0xf0] sm:$0xff]   ;;  %v7320_v21 = vld [vmem:[#allocation3 + $0xf8] sm:$0xff]   ;;  %v7321_v39 = vld [vmem:[#allocation3 + $0x100] sm:$0xff]  }
 0x63b   :  { %v4886_v57 = vadd.f32 %v9062_v38, %v4859_v37  ;;  %v4905_v53 = vmax.f32 %v4885_v62, 0.0  ;;  %v7324_v37 = vld [vmem:[#allocation3 + $0x118] sm:$0xff]  }
 0x63c   :  { %6296 = vmatpush3.bf16.msra.mxu1 %v7301_v9  ;;  %v7322_v9 = vld [vmem:[#allocation3 + $0x108] sm:$0xff]   ;;  %v7328_v62 = vld [vmem:[#allocation3 + $0x138] sm:$0xff]  }
 0x63d   :  { %v4777_v19 = vpop.f32.mrb[140].mxu1  ;;  %6297 = vmatprep.subr.bf16.mxu1 %v7409_v61  ;;  %v4906_v27 = vmax.f32 %v4886_v57, 0.0  ;;  %v7333_v57 = vld [vmem:[%s9225_s7 + $0x20] sm:$0xff]  }
 0x63e   :  { %v4779_v4 = vpop.f32.mrb[141].mxu1 }
 0x63f   :  { %v4860_v23 = vmax.f32 %v4777_v19, %v4779_v4  ;;  %v4781_v17 = vpop.f32.mrb[142].mxu1  ;;  %v7326_v19 = vld [vmem:[#allocation3 + $0x128] sm:$0xff]   ;;  %v7327_v4 = vld [vmem:[#allocation3 + $0x130] sm:$0xff]  }
 0x640   :  { %6298 = vmatpush3.bf16.msra.mxu1 %v7302_v5  ;;  %v4783_v28 = vpop.f32.mrb[143].mxu1  ;;  %v7325_v5 = vld [vmem:[#allocation3 + $0x120] sm:$0xff]  }
 0x641   :  { %v4887_v1 = vadd.f32 %v9062_v38, %v4860_v23  ;;  %v4861_v45 = vmax.f32 %v4781_v17, %v4783_v28  ;;  %6299 = vmatprep.subr.bf16.mxu1 %v7409_v61  ;;  %v7329_v23 = vld [vmem:[%s9225_s7] sm:$0xff]   ;;  %v7330_v17 = vld [vmem:[%s9225_s7 + $0x8] sm:$0xff]   ;;  %v7331_v28 = vld [vmem:[%s9225_s7 + $0x10] sm:$0xff]  }
 0x643   :  { %v4907_v15 = vmax.f32 %v4887_v1, 0.0  ;;  %v4888_v26 = vadd.f32 %v9062_v38, %v4861_v45  ;;  %v7334_v1 = vld [vmem:[%s9225_s7 + $0x28] sm:$0xff]  }
 0x644   :  { %6300 = vmatpush3.bf16.msra.mxu1 %v7303_v25  ;;  %v7332_v25 = vld [vmem:[%s9225_s7 + $0x18] sm:$0xff]  }
 0x645   :  { %v9100_v32 = vmax.f32 %v4905_v53, %v4907_v15  ;;  %v4908_v49 = vmax.f32 %v4888_v26, 0.0  ;;  %v4787_v18 = vpop.f32.mrb[144].mxu1  ;;  %6301 = vmatprep.subr.bf16.mxu1 %v7409_v61  ;;  %v7335_v26 = vld [vmem:[%s9225_s7 + $0x30] sm:$0xff]  }
 0x646   :  { %v4789_v48 = vpop.f32.mrb[145].mxu1 }
 0x647   :  { %v9103_v2 = vmax.f32 %v4906_v27, %v4908_v49  ;;  %v4862_v8 = vmax.f32 %v4787_v18, %v4789_v48  ;;  %v4791_v35 = vpop.f32.mrb[146].mxu1  ;;  %v7336_v27 = vld [vmem:[%s9225_s7 + $0x38] sm:$0xff]  }
 0x648   :  { %6302 = vmatpush3.bf16.msra.mxu1 %v7304_v41  ;;  %v4793_v20 = vpop.f32.mrb[147].mxu1 }
 0x649   :  { %v5243_v43 = vpack.c.bf16 %v9103_v2, %v9100_v32  ;;  %v4863_v59 = vmax.f32 %v4791_v35, %v4793_v20  ;;  %6307 = vmatprep.subr.bf16.mxu1 %v7409_v61  ;;  %v4889_v6 = vadd.f32 %v9062_v38, %v4862_v8 }
 0x64b   :  { %6304 = vmatmul.mubr.bf16.vlgmr.msra.gmra.mrb[156].mxu1 %v4915_v63  ;;  %v4890_v40 = vadd.f32 %v9062_v38, %v4863_v59  ;;  %v4909_v63 = vmax.f32 %v4889_v6, 0.0 }
 0x64c   :  { %6308 = vmatpush3.bf16.msra.mxu1 %v7305_v24  ;;  %6323 = vmatprep.mubr.msk.bf16.mxu1 %vm7410_vm1, %v7409_v61 }
 0x64d   :  { %v4797_v30 = vpop.f32.mrb[148].mxu1  ;;  %6309 = vmatprep.subr.bf16.mxu1 %v7409_v61  ;;  %v4910_v31 = vmax.f32 %v4890_v40, 0.0  ;;  %v6185_v40 = vld [vmem:[%s9224_s6] ss:$0 sm:$0xff] }
 0x64e   :  { %v4799_v34 = vpop.f32.mrb[149].mxu1 }
 0x64f   :  { %v4864_v52 = vmax.f32 %v4797_v30, %v4799_v34  ;;  %v4801_v60 = vpop.f32.mrb[150].mxu1 }
 0x650   :  { %6310 = vmatpush3.bf16.msra.mxu1 %v7306_v47  ;;  %v4803_v51 = vpop.f32.mrb[151].mxu1 }
 0x651   :  { %v4891_v50 = vadd.f32 %v9062_v38, %v4864_v52  ;;  %v4865_v46 = vmax.f32 %v4801_v60, %v4803_v51  ;;  %6311 = vmatprep.subr.bf16.mxu1 %v7409_v61 }
 0x653   :  { %v4911_v36 = vmax.f32 %v4891_v50, 0.0  ;;  %v4892_v16 = vadd.f32 %v9062_v38, %v4865_v46  ;;  %v7311_v38 = vld [vmem:[#allocation3 + $0xb0] sm:$0xff]  }
 0x654   :  { %6312 = vmatpush3.bf16.msra.mxu1 %v7307_v42 }
 0x655   :  { %v9119_v10 = vmax.f32 %v4909_v63, %v4911_v36  ;;  %v4912_v44 = vmax.f32 %v4892_v16, 0.0  ;;  %6313 = vmatprep.subr.bf16.mxu1 %v7409_v61 }
 0x657   :  { %v9122_v22 = vmax.f32 %v4910_v31, %v4912_v44 }
 0x658   :  { %6314 = vmatpush3.bf16.msra.mxu1 %v7308_v12 }
 0x659   :  { %v5354_v56 = vpack.c.bf16 %v9122_v22, %v9119_v10  ;;  %6315 = vmatprep.subr.bf16.mxu1 %v7409_v61  ;;  %v7337_v22 = vld [vmem:[#allocation5] sm:$0xff]  }
 0x65c   :  { %6316 = vmatpush3.bf16.msra.mxu1 %v7309_v33 }
 0x65d   :  { %6317 = vmatprep.subr.bf16.mxu1 %v7409_v61 }
 0x660   :  { %6318 = vmatpush3.bf16.msra.mxu1 %v7310_v7  ;;  %v7339_v7 = vld [vmem:[#allocation5 + $0x10] sm:$0xff]  }
 0x661   :  { %6319 = vmatprep.subr.bf16.mxu1 %v7409_v61 }
 0x664   :  { %6320 = vmatpush3.bf16.msra.mxu1 %v7311_v38  ;;  %v7340_v38 = vld [vmem:[#allocation5 + $0x18] sm:$0xff]  }
 0x665   :  { %6321 = vmatprep.subr.bf16.mxu1 %v7409_v61 }
 0x668   :  { %6322 = vmatpush3.bf16.msra.mxu1 %v7312_v13  ;;  %v7341_v13 = vld [vmem:[#allocation5 + $0x20] sm:$0xff]  }
 0x669   :  { %6327 = vmatprep.subr.bf16.mxu1 %v7409_v61 }
 0x66b   :  { %6324 = vmatmul.mubr.bf16.vlgmr.msra.gmra.mrb[160].mxu1 %v5132_v55  ;;  %v7323_v55 = vld [vmem:[#allocation3 + $0x110] sm:$0xff]  }
 0x66c   :  { %6328 = vmatpush3.bf16.msra.mxu1 %v7313_v0  ;;  %6343 = vmatprep.mubr.msk.bf16.mxu1 %vm7410_vm1, %v7409_v61  ;;  %v7342_v0 = vld [vmem:[#allocation5 + $0x28] sm:$0xff]  }
 0x66d   :  { %6329 = vmatprep.subr.bf16.mxu1 %v7409_v61 }
 0x670   :  { %6330 = vmatpush3.bf16.msra.mxu1 %v7314_v11  ;;  %v7343_v11 = vld [vmem:[#allocation5 + $0x30] sm:$0xff]  }
 0x671   :  { %6331 = vmatprep.subr.bf16.mxu1 %v7409_v61 }
 0x674   :  { %6332 = vmatpush3.bf16.msra.mxu1 %v7315_v3  ;;  %v7344_v3 = vld [vmem:[#allocation5 + $0x38] sm:$0xff]  }
 0x675   :  { %6333 = vmatprep.subr.bf16.mxu1 %v7409_v61 }
 0x678   :  { %6334 = vmatpush3.bf16.msra.mxu1 %v7316_v54  ;;  %v6186_v54 = vld [vmem:[%s9226_s8] ss:$0 sm:$0xff] }
 0x679   :  { %6335 = vmatprep.subr.bf16.mxu1 %v7409_v61 }
 0x67c   :  { %6336 = vmatpush3.bf16.msra.mxu1 %v7317_v29 }
 0x67d   :  { %6337 = vmatprep.subr.bf16.mxu1 %v7409_v61 }
 0x680   :  { %6338 = vmatpush3.bf16.msra.mxu1 %v7318_v14 }
 0x681   :  { %6339 = vmatprep.subr.bf16.mxu1 %v7409_v61 }
 0x684   :  { %6340 = vmatpush3.bf16.msra.mxu1 %v7319_v58 }
 0x685   :  { %6341 = vmatprep.subr.bf16.mxu1 %v7409_v61 }
 0x688   :  { %6342 = vmatpush3.bf16.msra.mxu1 %v7320_v21 }
 0x689   :  { %6347 = vmatprep.subr.bf16.mxu1 %v7409_v61 }
 0x68b   :  { %6344 = vmatmul.mubr.bf16.vlgmr.msra.gmra.mrb[164].mxu1 %v5243_v43 }
 0x68c   :  { %6348 = vmatpush3.bf16.msra.mxu1 %v7321_v39  ;;  %6363 = vmatprep.mubr.msk.bf16.mxu1 %vm7410_vm1, %v7409_v61 }
 0x68d   :  { %6349 = vmatprep.subr.bf16.mxu1 %v7409_v61 }
 0x690   :  { %6350 = vmatpush3.bf16.msra.mxu1 %v7322_v9 }
 0x691   :  { %6351 = vmatprep.subr.bf16.mxu1 %v7409_v61 }
 0x694   :  { %6352 = vmatpush3.bf16.msra.mxu1 %v7323_v55 }
 0x695   :  { %6353 = vmatprep.subr.bf16.mxu1 %v7409_v61 }
 0x698   :  { %6354 = vmatpush3.bf16.msra.mxu1 %v7324_v37 }
 0x699   :  { %6355 = vmatprep.subr.bf16.mxu1 %v7409_v61 }
 0x69c   :  { %6356 = vmatpush3.bf16.msra.mxu1 %v7325_v5 }
 0x69d   :  { %6357 = vmatprep.subr.bf16.mxu1 %v7409_v61 }
 0x6a0   :  { %6358 = vmatpush3.bf16.msra.mxu1 %v7326_v19 }
 0x6a1   :  { %6359 = vmatprep.subr.bf16.mxu1 %v7409_v61 }
 0x6a4   :  { %6360 = vmatpush3.bf16.msra.mxu1 %v7327_v4 }
 0x6a5   :  { %6361 = vmatprep.subr.bf16.mxu1 %v7409_v61 }
 0x6a8   :  { %6362 = vmatpush3.bf16.msra.mxu1 %v7328_v62 }
 0x6a9   :  { %6367 = vmatprep.subr.bf16.mxu1 %v7409_v61 }
 0x6ab   :  { %6364 = vmatmul.mubr.bf16.vlgmr.msra.gmra.mrb[168].mxu1 %v5354_v56  ;;  %v7338_v56 = vld [vmem:[#allocation5 + $0x8] sm:$0xff]  }
 0x6ac   :  { %6383 = vmatprep.mubr.msk.bf16.mxu1 %vm7410_vm1, %v7409_v61  ;;  %6368 = vmatpush3.bf16.msra.mxu1 %v7329_v23 }
 0x6ad   :  { %6369 = vmatprep.subr.bf16.mxu1 %v7409_v61 }
 0x6b0   :  { %6370 = vmatpush3.bf16.msra.mxu1 %v7330_v17 }
 0x6b1   :  { %6371 = vmatprep.subr.bf16.mxu1 %v7409_v61 }
 0x6b4   :  { %6372 = vmatpush3.bf16.msra.mxu1 %v7331_v28 }
 0x6b5   :  { %6373 = vmatprep.subr.bf16.mxu1 %v7409_v61 }
 0x6b8   :  { %6374 = vmatpush3.bf16.msra.mxu1 %v7332_v25 }
 0x6b9   :  { %6375 = vmatprep.subr.bf16.mxu1 %v7409_v61 }
 0x6bc   :  { %6376 = vmatpush3.bf16.msra.mxu1 %v7333_v57 }
 0x6bd   :  { %6377 = vmatprep.subr.bf16.mxu1 %v7409_v61 }
 0x6c0   :  { %6378 = vmatpush3.bf16.msra.mxu1 %v7334_v1 }
 0x6c1   :  { %6379 = vmatprep.subr.bf16.mxu1 %v7409_v61 }
 0x6c4   :  { %6380 = vmatpush3.bf16.msra.mxu1 %v7335_v26 }
 0x6c5   :  { %6381 = vmatprep.subr.bf16.mxu1 %v7409_v61 }
 0x6c8   :  { %6382 = vmatpush3.bf16.msra.mxu1 %v7336_v27 }
 0x6c9   :  { %6387 = vmatprep.subr.bf16.mxu1 %v7409_v61 }
 0x6fe   :  { %v5034_v45 = vpop.f32.mrb[152].mxu1 }
 0x6ff   :  { %v6285_v53 = vpop.f32.mrb[153].mxu1 }
 0x700   :  { %v5037_v15 = vpop.f32.mrb[154].mxu1 }
 0x701   :  { %v6286_v41 = vpop.f32.mrb[155].mxu1 }
 0x71e   :  { %v5123_v32 = vpop.f32.mrb[156].mxu1 }
 0x71f   :  { %v5124_v49 = vadd.f32 %v5123_v32, %v5034_v45  ;;  %v6305_v18 = vpop.f32.mrb[157].mxu1 }
 0x720   :  { %v5126_v48 = vpop.f32.mrb[158].mxu1 }
 0x721   :  { %v5127_v2 = vadd.f32 %v5126_v48, %v5037_v15  ;;  %v6306_v8 = vpop.f32.mrb[159].mxu1 }
 0x73e   :  { %v5232_v35 = vpop.f32.mrb[160].mxu1 }
 0x73f   :  { %v5239_v20 = vadd.f32 %v5232_v35, %v5124_v49  ;;  %v6325_v24 = vpop.f32.mrb[161].mxu1 }
 0x740   :  { %v5235_v43 = vpop.f32.mrb[162].mxu1 }
 0x741   :  { %v5240_v59 = vadd.f32 %v5235_v43, %v5127_v2  ;;  %v6326_v47 = vpop.f32.mrb[163].mxu1 }
 0x75e   :  { %v5343_v30 = vpop.f32.mrb[164].mxu1 }
 0x75f   :  { %v5350_v34 = vadd.f32 %v5343_v30, %v5239_v20  ;;  %v6345_v6 = vpop.f32.mrb[165].mxu1 }
 0x760   :  { %v5346_v52 = vpop.f32.mrb[166].mxu1 }
 0x761   :  { %v5351_v60 = vadd.f32 %v5346_v52, %v5240_v59  ;;  %v6346_v51 = vpop.f32.mrb[167].mxu1 }
 0x77e   :  { %v5454_v42 = vpop.f32.mrb[168].mxu1 }
 0x77f   :  { %v5461_v50 = vadd.f32 %v5454_v42, %v5350_v34  ;;  %v6365_v46 = vpop.f32.mrb[169].mxu1 }
 0x780   :  { %v5457_v63 = vpop.f32.mrb[170].mxu1 }
 0x781   :  { %v5470_v36 = vadd.f32 %v6185_v40, %v5461_v50  ;;  %v5462_v16 = vadd.f32 %v5457_v63, %v5351_v60  ;;  %v6366_v12 = vpop.f32.mrb[171].mxu1 }
 0x783   :  { %v5471_v31 = vadd.f32 %v6185_v40, %v5462_v16  ;;  %v5472_v10 = vmax.f32 %v5470_v36, 0.0 }
 0x785   :  { %v5473_v44 = vmax.f32 %v5471_v31, 0.0 }
 0x787   :  { %v5474_v33 = vpack.c.bf16 %v5473_v44, %v5472_v10 }
 0x789   :  { %6384 = vmatmul.mubr.bf16.vlgmr.msra.gmra.mrb[172].mxu1 %v5474_v33 }
 0x78a   :  { %6388 = vmatpush3.bf16.msra.mxu1 %v7337_v22  ;;  %6403 = vmatprep.mubr.msk.bf16.mxu1 %vm7410_vm1, %v7409_v61 }
 0x78b   :  { %6389 = vmatprep.subr.bf16.mxu1 %v7409_v61 }
 0x78e   :  { %6390 = vmatpush3.bf16.msra.mxu1 %v7338_v56 }
 0x78f   :  { %6391 = vmatprep.subr.bf16.mxu1 %v7409_v61 }
 0x792   :  { %6392 = vmatpush3.bf16.msra.mxu1 %v7339_v7 }
 0x793   :  { %6393 = vmatprep.subr.bf16.mxu1 %v7409_v61 }
 0x796   :  { %6394 = vmatpush3.bf16.msra.mxu1 %v7340_v38 }
 0x797   :  { %6395 = vmatprep.subr.bf16.mxu1 %v7409_v61 }
 0x79a   :  { %6396 = vmatpush3.bf16.msra.mxu1 %v7341_v13 }
 0x79b   :  { %6397 = vmatprep.subr.bf16.mxu1 %v7409_v61 }
 0x79e   :  { %6398 = vmatpush3.bf16.msra.mxu1 %v7342_v0 }
 0x79f   :  { %6399 = vmatprep.subr.bf16.mxu1 %v7409_v61 }
 0x7a2   :  { %6400 = vmatpush3.bf16.msra.mxu1 %v7343_v11 }
 0x7a3   :  { %6401 = vmatprep.subr.bf16.mxu1 %v7409_v61  ;;  %v6195_v61 = vld [vmem:[%s9228_s10] ss:$0 sm:$0xff] }
 0x7a6   :  { %6402 = vmatpush3.bf16.msra.mxu1 %v7344_v3 }
 0x85c   :  { %v5580_v29 = vpop.f32.mrb[172].mxu1 }
 0x85d   :  { %v5581_v14 = vadd.f32 %v6186_v54, %v5580_v29  ;;  %v6385_v58 = vpop.f32.mrb[173].mxu1 }
 0x85e   :  { %v5583_v21 = vpop.f32.mrb[174].mxu1 }
 0x85f   :  { %v5584_v39 = vadd.f32 %v6186_v54, %v5583_v21  ;;  %v6386_v9 = vpop.f32.mrb[175].mxu1  ;;  %v5587_v55 = vmax.f32 %v5581_v14, 0.0 }
 0x861   :  { %v5588_v37 = vmax.f32 %v5584_v39, 0.0 }
 0x863   :  { %v5589_v5 = vpack.c.bf16 %v5588_v37, %v5587_v55 }
 0x865   :  { %6404 = vmatmul.mubr.bf16.vlgmr.msra.gmra.mrb[176].mxu1 %v5589_v5 }
 0x938   :  { %v5695_v19 = vpop.f32.mrb[176].mxu1 }
 0x939   :  { %v5696_v4 = vadd.f32 %v6195_v61, %v5695_v19  ;;  %v6405_v62 = vpop.f32.mrb[177].mxu1 }
 0x93a   :  { %v5698_v23 = vpop.f32.mrb[178].mxu1 }
 0x93b   :  { %5702 = vst [vmem:[%s9229_s11] sm:$0xff] %v5696_v4  ;;  %v5699_v17 = vadd.f32 %v6195_v61, %v5698_v23  ;;  %v6406_v28 = vpop.f32.mrb[179].mxu1 }
 0x93d   :  { %5703 = vst [vmem:[%s9229_s11 + $0x8] sm:$0xff] %v5699_v17 }
 0x93e   :  { %5708 = vsyncpa [#allocation4], 1 }
 0x93f   :  { %5709 = vsyncpa [#allocation6], 1 }

</bundles_post_ra>
